<compile_context>
chip_gen: v6e
topology: v6e:2x2x1
jax: 0.10.0
libtpu: 0.0.40
codegen_flags: <defaults>
</compile_context>

<pallas_src>
import math

import jax
import jax.numpy as jnp
import numpy as np
from jax import lax
from jax.experimental import pallas as pl
from jax.experimental.pallas import tpu as pltpu

# ----- problem sizes (small, consistent with the module) -----
B      = 2            # batch
S      = 8            # target (decoder) sequence length
S_ENC  = 8            # source (encoder) sequence length
D      = 32           # d_model
FF     = 64           # d_ff
H      = 1            # number of heads (reference only works for h == 1)
EPS    = 1e-6
N      = B * S        # flattened target rows
N_KV   = B * S_ENC    # flattened source rows
INV_SQRT_DK = 1.0 / math.sqrt(D // H)

W_ROWS = 352          # packed weight buffer rows
C_ROWS = 48           # packed const buffer rows (biases + mask biases)

PREC = jax.lax.Precision.HIGHEST


# ----------------- the Pallas kernel -----------------
def decoder_block_kernel(x_ref, enc_ref, w_ref, c_ref, ln_ref, out_ref):
    x = x_ref[...]        # (N, D)
    enc = enc_ref[...]    # (N_KV, D)

    def mm(a, b):
        return jnp.dot(a, b, precision=PREC, preferred_element_type=jnp.float32)

    # --- static, lane-offset-0 views into the packed parameter buffers ---
    def attn_w(i):                                  # i-th (D, D) projection
        return w_ref[32 * i:32 * (i + 1), 0:D]

    def attn_b(i):                                  # i-th (1, D) bias
        return c_ref[i:i + 1, 0:D]

    w1 = w_ref[256:288, 0:FF]                       # (D, FF)
    w2 = w_ref[288:352, 0:D]                        # (FF, D)
    b1 = c_ref[8:9, 0:FF]                           # (1, FF)
    b2 = c_ref[9:10, 0:D]                           # (1, D)
    tgt_bias = c_ref[16:32, 0:N]                    # (N, N)   additive, 0 / -1e9
    src_bias = c_ref[32:48, 0:N_KV]                 # (N, N_KV) additive, 0 / -1e9

    def layer_norm(v, g, bt):
        # torch.std: unbiased (N-1); reference divides by (std + eps)
        mean = jnp.mean(v, axis=-1, keepdims=True)
        diff = v - mean
        var = jnp.sum(diff * diff, axis=-1, keepdims=True) / (D - 1)
        return g * diff / (jnp.sqrt(var) + EPS) + bt

    def attention(q_in, kv_in, widx, bias):
        q = mm(q_in, attn_w(widx)) + attn_b(widx)
        k = mm(kv_in, attn_w(widx + 1)) + attn_b(widx + 1)
        v = mm(kv_in, attn_w(widx + 2)) + attn_b(widx + 2)
        # flattened scores: one (N, N_kv) matmul; block-diag(+causal) bias
        sc = lax.dot_general(q, k, (((1,), (1,)), ((), ())),
                             precision=PREC, preferred_element_type=jnp.float32)
        sc = sc * INV_SQRT_DK + bias
        m = jnp.max(sc, axis=-1, keepdims=True)
        e = jnp.exp(sc - m)                          # masked entries -> exactly 0
        p = e / jnp.sum(e, axis=-1, keepdims=True)   # exact softmax
        o = mm(p, v)
        return mm(o, attn_w(widx + 3)) + attn_b(widx + 3)

    # ---- residual 0: causal self-attention (dropout = identity in eval mode) ----
    xn = layer_norm(x, ln_ref[0], ln_ref[1])
    x = x + attention(xn, xn, 0, tgt_bias)

    # ---- residual 1: cross-attention (encoder output NOT normalized, per reference) ----
    xn = layer_norm(x, ln_ref[2], ln_ref[3])
    x = x + attention(xn, enc, 4, src_bias)

    # ---- residual 2: feed forward  fc2(fc1(x)) -- reference has no activation.
    # TODO(synk): the reference lambda returns the FFN module without calling it
    # (a bug that would raise in PyTorch); we implement the intended x + ffn(norm(x)).
    xn = layer_norm(x, ln_ref[4], ln_ref[5])
    h = mm(xn, w1) + b1
    x = x + (mm(h, w2) + b2)

    out_ref[...] = x


# ----------------- parameter / mask packing -----------------
def pack_inputs(params, src_mask, tgt_mask):
    """Pack all weights into one (352,128) buffer, all biases + additive attention
    mask biases into one (48,64) buffer. Everything lane-aligned at offset 0."""
    sa, ca, ff = params["sa"], params["ca"], params["ff"]

    wbuf = jnp.zeros((W_ROWS, 128), jnp.float32)
    attn_ws = [sa[0], sa[2], sa[4], sa[6], ca[0], ca[2], ca[4], ca[6]]
    for i, w in enumerate(attn_ws):
        wbuf = wbuf.at[32 * i:32 * (i + 1), :D].set(w)
    wbuf = wbuf.at[256:288, :FF].set(ff[0])          # w1 (D, FF)
    wbuf = wbuf.at[288:352, :D].set(ff[2])           # w2 (FF, D)

    cbuf = jnp.zeros((C_ROWS, FF), jnp.float32)
    attn_bs = [sa[1], sa[3], sa[5], sa[7], ca[1], ca[3], ca[5], ca[7]]
    for i, b in enumerate(attn_bs):
        cbuf = cbuf.at[i:i + 1, :D].set(b)
    cbuf = cbuf.at[8:9, :FF].set(ff[1])              # b1
    cbuf = cbuf.at[9:10, :D].set(ff[3])              # b2

    # Flattened additive mask biases (0 where attended, -1e9 where masked /
    # cross-batch).  masked_fill(-1e9) and additive -1e9 are equivalent after exp.
    neg = jnp.float32(-1e9)
    tgt_bias = jnp.full((N, N), neg, jnp.float32)
    src_bias = jnp.full((N, N_KV), neg, jnp.float32)
    for b in range(B):
        tb = jnp.where(tgt_mask[b] == 0, neg, jnp.float32(0.0))
        sb = jnp.where(src_mask[b] == 0, neg, jnp.float32(0.0))
        tgt_bias = tgt_bias.at[b * S:(b + 1) * S, b * S:(b + 1) * S].set(tb)
        src_bias = src_bias.at[b * S:(b + 1) * S, b * S_ENC:(b + 1) * S_ENC].set(sb)
    cbuf = cbuf.at[16:32, :N].set(tgt_bias)
    cbuf = cbuf.at[32:48, :N_KV].set(src_bias)
    return wbuf, cbuf


# ----------------- wrapper -----------------
def decoder_block(x, enc, src_mask, tgt_mask, params):
    wbuf, cbuf = pack_inputs(params, src_mask, tgt_mask)
    x_flat = x.reshape(N, D)
    enc_flat = enc.reshape(N_KV, D)
    out = pl.pallas_call(
        decoder_block_kernel,
        out_shape=jax.ShapeDtypeStruct((N, D), jnp.float32),
        in_specs=[
            pl.BlockSpec(memory_space=pltpu.MemorySpace.VMEM),   # x   (16,32)
            pl.BlockSpec(memory_space=pltpu.MemorySpace.VMEM),   # enc (16,32)
            pl.BlockSpec(memory_space=pltpu.MemorySpace.VMEM),   # weights (352,128)
            pl.BlockSpec(memory_space=pltpu.MemorySpace.VMEM),   # biases+masks (48,64)
            pl.BlockSpec(memory_space=pltpu.MemorySpace.SMEM),   # layer-norm scalars (6,)
        ],
        out_specs=pl.BlockSpec(memory_space=pltpu.MemorySpace.VMEM),
    )(x_flat, enc_flat, wbuf, cbuf, params["ln"])
    return out.reshape(B, S, D)


# ----------------- pure-JAX reference (models the PyTorch module) -----------------
def reference(x, enc, tgt_mask, src_mask, params):
    scale = math.sqrt(D // H)

    def ln(v, g, b_):
        mean = v.mean(-1, keepdims=True)
        diff = v - mean
        var = (diff * diff).sum(-1, keepdims=True) / (v.shape[-1] - 1)
        return g * diff / (jnp.sqrt(var) + EPS) + b_

    def attn(qi, kvi, mask, wq, bq, wk, bk, wv, bv, wo, bo):
        q = jnp.dot(qi, wq, precision=PREC) + bq
        k = jnp.dot(kvi, wk, precision=PREC) + bk
        v = jnp.dot(kvi, wv, precision=PREC) + bv
        sc = jnp.einsum("bqd,bkd->bqk", q, k, precision=PREC) / scale
        sc = jnp.where(mask == 0, -1.0e9, sc)
        p = jax.nn.softmax(sc, axis=-1)
        o = jnp.einsum("bqk,bkd->bqd", p, v, precision=PREC)
        return jnp.dot(o, wo, precision=PREC) + bo

    sa, ca, ff, lnp = params["sa"], params["ca"], params["ff"], params["ln"]
    xn = ln(x, lnp[0], lnp[1])
    x = x + attn(xn, xn, tgt_mask, *sa)
    xn = ln(x, lnp[2], lnp[3])
    x = x + attn(xn, enc, src_mask, *ca)
    xn = ln(x, lnp[4], lnp[5])
    h = jnp.dot(xn, ff[0], precision=PREC) + ff[1]
    x = x + (jnp.dot(h, ff[2], precision=PREC) + ff[3])
    return x


# ----------------- deterministic parameter init -----------------
def make_params(key):
    def linear(k, fan_in, fan_out):
        k1, k2 = jax.random.split(k)
        bound = 1.0 / math.sqrt(fan_in)
        w = jax.random.uniform(k1, (fan_in, fan_out), jnp.float32, -bound, bound)
        b = jax.random.uniform(k2, (1, fan_out), jnp.float32, -bound, bound)
        return w, b

    keys = jax.random.split(key, 10)
    sa = []
    for i in range(4):                       # W_Q, W_K, W_V, W_O
        w, b = linear(keys[i], D, D)
        sa += [w, b]
    ca = []
    for i in range(4):
        w, b = linear(keys[4 + i], D, D)
        ca += [w, b]
    w1, b1 = linear(keys[8], D, FF)
    w2, b2 = linear(keys[9], FF, D)
    # gamma = 1, beta = 0 for each of the 3 residual layer-norms (torch init)
    ln = jnp.array([1.0, 0.0, 1.0, 0.0, 1.0, 0.0], dtype=jnp.float32)
    return {"sa": sa, "ca": ca, "ff": [w1, b1, w2, b2], "ln": ln}


if __name__ == "__main__":
    root = jax.random.PRNGKey(0)
    k_x, k_e, k_p = jax.random.split(root, 3)

    x = jax.random.normal(k_x, (B, S, D), jnp.float32)
    enc = jax.random.normal(k_e, (B, S_ENC, D), jnp.float32)

    tgt_mask = jnp.broadcast_to(jnp.tril(jnp.ones((S, S), jnp.float32)), (B, S, S))
    src_mask = jnp.ones((B, S, S_ENC), jnp.float32)

    params = make_params(k_p)

    out = decoder_block(x, enc, src_mask, tgt_mask, params)
    out = jax.block_until_ready(out)

    ref = reference(x, enc, tgt_mask, src_mask, params)
    np.testing.assert_allclose(np.asarray(out), np.asarray(ref), atol=2e-3, rtol=2e-3)

    print("KERNEL_OK")
</pallas_src>

<mosaic_0001>
module attributes {stable_mosaic.version = 11 : i64} {
  func.func @decoder_block_kernel(%arg0: memref<16x32xf32, #tpu.memory_space<vmem>>, %arg1: memref<16x32xf32, #tpu.memory_space<vmem>>, %arg2: memref<352x128xf32, #tpu.memory_space<vmem>>, %arg3: memref<48x64xf32, #tpu.memory_space<vmem>>, %arg4: memref<6xf32, #tpu.memory_space<smem>>, %arg5: memref<16x32xf32, #tpu.memory_space<vmem>>) attributes {dimension_semantics = [], scalar_prefetch = 0 : i64, scratch_operands = 0 : i64, tpu.core_type = #tpu.core_type<tc>} {
    %c0 = arith.constant 0 : index
    %c0_0 = arith.constant 0 : index
    %0 = vector.load %arg0[%c0, %c0_0] : memref<16x32xf32, #tpu.memory_space<vmem>>, vector<16x32xf32>
    %c0_1 = arith.constant 0 : index
    %c0_2 = arith.constant 0 : index
    %1 = vector.load %arg1[%c0_1, %c0_2] : memref<16x32xf32, #tpu.memory_space<vmem>>, vector<16x32xf32>
    %c256 = arith.constant 256 : index
    %c0_3 = arith.constant 0 : index
    %2 = vector.load %arg2[%c256, %c0_3] : memref<352x128xf32, #tpu.memory_space<vmem>>, vector<32x64xf32>
    %c288 = arith.constant 288 : index
    %c0_4 = arith.constant 0 : index
    %3 = vector.load %arg2[%c288, %c0_4] : memref<352x128xf32, #tpu.memory_space<vmem>>, vector<64x32xf32>
    %c8 = arith.constant 8 : index
    %c0_5 = arith.constant 0 : index
    %4 = vector.load %arg3[%c8, %c0_5] : memref<48x64xf32, #tpu.memory_space<vmem>>, vector<1x64xf32>
    %c9 = arith.constant 9 : index
    %c0_6 = arith.constant 0 : index
    %5 = vector.load %arg3[%c9, %c0_6] : memref<48x64xf32, #tpu.memory_space<vmem>>, vector<1x32xf32>
    %c16 = arith.constant 16 : index
    %c0_7 = arith.constant 0 : index
    %6 = vector.load %arg3[%c16, %c0_7] : memref<48x64xf32, #tpu.memory_space<vmem>>, vector<16x16xf32>
    %c32 = arith.constant 32 : index
    %c0_8 = arith.constant 0 : index
    %7 = vector.load %arg3[%c32, %c0_8] : memref<48x64xf32, #tpu.memory_space<vmem>>, vector<16x16xf32>
    %c0_9 = arith.constant 0 : index
    %8 = memref.load %arg4[%c0_9] : memref<6xf32, #tpu.memory_space<smem>>
    %c1 = arith.constant 1 : index
    %9 = memref.load %arg4[%c1] : memref<6xf32, #tpu.memory_space<smem>>
    %cst = arith.constant dense<0.000000e+00> : vector<16xf32>
    %10 = vector.multi_reduction <add>, %0, %cst [1] : vector<16x32xf32> to vector<16xf32>
    %11 = vector.shape_cast %10 : vector<16xf32> to vector<16x1xf32>
    %cst_10 = arith.constant 3.200000e+01 : f32
    %12 = vector.broadcast %cst_10 : f32 to vector<16x1xf32>
    %13 = arith.divf %11, %12 : vector<16x1xf32>
    %14 = vector.broadcast %13 : vector<16x1xf32> to vector<16x32xf32>
    %15 = arith.subf %0, %14 : vector<16x32xf32>
    %16 = arith.mulf %15, %15 : vector<16x32xf32>
    %cst_11 = arith.constant dense<0.000000e+00> : vector<16xf32>
    %17 = vector.multi_reduction <add>, %16, %cst_11 [1] : vector<16x32xf32> to vector<16xf32>
    %18 = vector.shape_cast %17 : vector<16xf32> to vector<16x1xf32>
    %cst_12 = arith.constant 3.100000e+01 : f32
    %19 = vector.broadcast %cst_12 : f32 to vector<16x1xf32>
    %20 = arith.divf %18, %19 : vector<16x1xf32>
    %21 = vector.broadcast %8 : f32 to vector<16x32xf32>
    %22 = arith.mulf %21, %15 : vector<16x32xf32>
    %23 = math.sqrt %20 : vector<16x1xf32>
    %cst_13 = arith.constant 9.99999997E-7 : f32
    %24 = vector.broadcast %cst_13 : f32 to vector<16x1xf32>
    %25 = arith.addf %23, %24 : vector<16x1xf32>
    %26 = vector.broadcast %25 : vector<16x1xf32> to vector<16x32xf32>
    %27 = arith.divf %22, %26 : vector<16x32xf32>
    %28 = vector.broadcast %9 : f32 to vector<16x32xf32>
    %29 = arith.addf %27, %28 : vector<16x32xf32>
    %c0_14 = arith.constant 0 : index
    %c0_15 = arith.constant 0 : index
    %30 = vector.load %arg2[%c0_14, %c0_15] : memref<352x128xf32, #tpu.memory_space<vmem>>, vector<32x32xf32>
    %cst_16 = arith.constant dense<0.000000e+00> : vector<16x32xf32>
    %31 = tpu.matmul %29, %30, %cst_16 {dimension_numbers = #tpu.dot_dimension_numbers<[1], [0], [0], [1], [0, 0, 1, 1], [], []>, precision = #tpu.contract_precision<fp32>} : vector<16x32xf32>, vector<32x32xf32>, vector<16x32xf32> -> vector<16x32xf32>
    %c0_17 = arith.constant 0 : index
    %c0_18 = arith.constant 0 : index
    %32 = vector.load %arg3[%c0_17, %c0_18] : memref<48x64xf32, #tpu.memory_space<vmem>>, vector<1x32xf32>
    %33 = vector.broadcast %32 : vector<1x32xf32> to vector<16x32xf32>
    %34 = arith.addf %31, %33 : vector<16x32xf32>
    %c32_19 = arith.constant 32 : index
    %c0_20 = arith.constant 0 : index
    %35 = vector.load %arg2[%c32_19, %c0_20] : memref<352x128xf32, #tpu.memory_space<vmem>>, vector<32x32xf32>
    %cst_21 = arith.constant dense<0.000000e+00> : vector<16x32xf32>
    %36 = tpu.matmul %29, %35, %cst_21 {dimension_numbers = #tpu.dot_dimension_numbers<[1], [0], [0], [1], [0, 0, 1, 1], [], []>, precision = #tpu.contract_precision<fp32>} : vector<16x32xf32>, vector<32x32xf32>, vector<16x32xf32> -> vector<16x32xf32>
    %c1_22 = arith.constant 1 : index
    %c0_23 = arith.constant 0 : index
    %37 = vector.load %arg3[%c1_22, %c0_23] : memref<48x64xf32, #tpu.memory_space<vmem>>, vector<1x32xf32>
    %38 = vector.broadcast %37 : vector<1x32xf32> to vector<16x32xf32>
    %39 = arith.addf %36, %38 : vector<16x32xf32>
    %c64 = arith.constant 64 : index
    %c0_24 = arith.constant 0 : index
    %40 = vector.load %arg2[%c64, %c0_24] : memref<352x128xf32, #tpu.memory_space<vmem>>, vector<32x32xf32>
    %cst_25 = arith.constant dense<0.000000e+00> : vector<16x32xf32>
    %41 = tpu.matmul %29, %40, %cst_25 {dimension_numbers = #tpu.dot_dimension_numbers<[1], [0], [0], [1], [0, 0, 1, 1], [], []>, precision = #tpu.contract_precision<fp32>} : vector<16x32xf32>, vector<32x32xf32>, vector<16x32xf32> -> vector<16x32xf32>
    %c2 = arith.constant 2 : index
    %c0_26 = arith.constant 0 : index
    %42 = vector.load %arg3[%c2, %c0_26] : memref<48x64xf32, #tpu.memory_space<vmem>>, vector<1x32xf32>
    %43 = vector.broadcast %42 : vector<1x32xf32> to vector<16x32xf32>
    %44 = arith.addf %41, %43 : vector<16x32xf32>
    %cst_27 = arith.constant dense<0.000000e+00> : vector<16x16xf32>
    %45 = tpu.matmul %34, %39, %cst_27 {dimension_numbers = #tpu.dot_dimension_numbers<[1], [1], [0], [0], [0, 0, 1, 0], [], []>, precision = #tpu.contract_precision<fp32>} : vector<16x32xf32>, vector<16x32xf32>, vector<16x16xf32> -> vector<16x16xf32>
    %cst_28 = arith.constant 0.176776692 : f32
    %46 = vector.broadcast %cst_28 : f32 to vector<16x16xf32>
    %47 = arith.mulf %45, %46 : vector<16x16xf32>
    %48 = arith.addf %47, %6 : vector<16x16xf32>
    %cst_29 = arith.constant dense<0xFF800000> : vector<16xf32>
    %49 = vector.multi_reduction <maximumf>, %48, %cst_29 [1] : vector<16x16xf32> to vector<16xf32>
    %50 = vector.shape_cast %49 : vector<16xf32> to vector<16x1xf32>
    %51 = vector.broadcast %50 : vector<16x1xf32> to vector<16x16xf32>
    %52 = arith.subf %48, %51 : vector<16x16xf32>
    %53 = math.exp %52 : vector<16x16xf32>
    %cst_30 = arith.constant dense<0.000000e+00> : vector<16xf32>
    %54 = vector.multi_reduction <add>, %53, %cst_30 [1] : vector<16x16xf32> to vector<16xf32>
    %55 = vector.shape_cast %54 : vector<16xf32> to vector<16x1xf32>
    %56 = vector.broadcast %55 : vector<16x1xf32> to vector<16x16xf32>
    %57 = arith.divf %53, %56 : vector<16x16xf32>
    %cst_31 = arith.constant dense<0.000000e+00> : vector<16x32xf32>
    %58 = tpu.matmul %57, %44, %cst_31 {dimension_numbers = #tpu.dot_dimension_numbers<[1], [0], [0], [1], [0, 0, 1, 1], [], []>, precision = #tpu.contract_precision<fp32>} : vector<16x16xf32>, vector<16x32xf32>, vector<16x32xf32> -> vector<16x32xf32>
    %c96 = arith.constant 96 : index
    %c0_32 = arith.constant 0 : index
    %59 = vector.load %arg2[%c96, %c0_32] : memref<352x128xf32, #tpu.memory_space<vmem>>, vector<32x32xf32>
    %cst_33 = arith.constant dense<0.000000e+00> : vector<16x32xf32>
    %60 = tpu.matmul %58, %59, %cst_33 {dimension_numbers = #tpu.dot_dimension_numbers<[1], [0], [0], [1], [0, 0, 1, 1], [], []>, precision = #tpu.contract_precision<fp32>} : vector<16x32xf32>, vector<32x32xf32>, vector<16x32xf32> -> vector<16x32xf32>
    %c3 = arith.constant 3 : index
    %c0_34 = arith.constant 0 : index
    %61 = vector.load %arg3[%c3, %c0_34] : memref<48x64xf32, #tpu.memory_space<vmem>>, vector<1x32xf32>
    %62 = vector.broadcast %61 : vector<1x32xf32> to vector<16x32xf32>
    %63 = arith.addf %60, %62 : vector<16x32xf32>
    %64 = arith.addf %0, %63 : vector<16x32xf32>
    %c2_35 = arith.constant 2 : index
    %65 = memref.load %arg4[%c2_35] : memref<6xf32, #tpu.memory_space<smem>>
    %c3_36 = arith.constant 3 : index
    %66 = memref.load %arg4[%c3_36] : memref<6xf32, #tpu.memory_space<smem>>
    %cst_37 = arith.constant dense<0.000000e+00> : vector<16xf32>
    %67 = vector.multi_reduction <add>, %64, %cst_37 [1] : vector<16x32xf32> to vector<16xf32>
    %68 = vector.shape_cast %67 : vector<16xf32> to vector<16x1xf32>
    %cst_38 = arith.constant 3.200000e+01 : f32
    %69 = vector.broadcast %cst_38 : f32 to vector<16x1xf32>
    %70 = arith.divf %68, %69 : vector<16x1xf32>
    %71 = vector.broadcast %70 : vector<16x1xf32> to vector<16x32xf32>
    %72 = arith.subf %64, %71 : vector<16x32xf32>
    %73 = arith.mulf %72, %72 : vector<16x32xf32>
    %cst_39 = arith.constant dense<0.000000e+00> : vector<16xf32>
    %74 = vector.multi_reduction <add>, %73, %cst_39 [1] : vector<16x32xf32> to vector<16xf32>
    %75 = vector.shape_cast %74 : vector<16xf32> to vector<16x1xf32>
    %cst_40 = arith.constant 3.100000e+01 : f32
    %76 = vector.broadcast %cst_40 : f32 to vector<16x1xf32>
    %77 = arith.divf %75, %76 : vector<16x1xf32>
    %78 = vector.broadcast %65 : f32 to vector<16x32xf32>
    %79 = arith.mulf %78, %72 : vector<16x32xf32>
    %80 = math.sqrt %77 : vector<16x1xf32>
    %cst_41 = arith.constant 9.99999997E-7 : f32
    %81 = vector.broadcast %cst_41 : f32 to vector<16x1xf32>
    %82 = arith.addf %80, %81 : vector<16x1xf32>
    %83 = vector.broadcast %82 : vector<16x1xf32> to vector<16x32xf32>
    %84 = arith.divf %79, %83 : vector<16x32xf32>
    %85 = vector.broadcast %66 : f32 to vector<16x32xf32>
    %86 = arith.addf %84, %85 : vector<16x32xf32>
    %c128 = arith.constant 128 : index
    %c0_42 = arith.constant 0 : index
    %87 = vector.load %arg2[%c128, %c0_42] : memref<352x128xf32, #tpu.memory_space<vmem>>, vector<32x32xf32>
    %cst_43 = arith.constant dense<0.000000e+00> : vector<16x32xf32>
    %88 = tpu.matmul %86, %87, %cst_43 {dimension_numbers = #tpu.dot_dimension_numbers<[1], [0], [0], [1], [0, 0, 1, 1], [], []>, precision = #tpu.contract_precision<fp32>} : vector<16x32xf32>, vector<32x32xf32>, vector<16x32xf32> -> vector<16x32xf32>
    %c4 = arith.constant 4 : index
    %c0_44 = arith.constant 0 : index
    %89 = vector.load %arg3[%c4, %c0_44] : memref<48x64xf32, #tpu.memory_space<vmem>>, vector<1x32xf32>
    %90 = vector.broadcast %89 : vector<1x32xf32> to vector<16x32xf32>
    %91 = arith.addf %88, %90 : vector<16x32xf32>
    %c160 = arith.constant 160 : index
    %c0_45 = arith.constant 0 : index
    %92 = vector.load %arg2[%c160, %c0_45] : memref<352x128xf32, #tpu.memory_space<vmem>>, vector<32x32xf32>
    %cst_46 = arith.constant dense<0.000000e+00> : vector<16x32xf32>
    %93 = tpu.matmul %1, %92, %cst_46 {dimension_numbers = #tpu.dot_dimension_numbers<[1], [0], [0], [1], [0, 0, 1, 1], [], []>, precision = #tpu.contract_precision<fp32>} : vector<16x32xf32>, vector<32x32xf32>, vector<16x32xf32> -> vector<16x32xf32>
    %c5 = arith.constant 5 : index
    %c0_47 = arith.constant 0 : index
    %94 = vector.load %arg3[%c5, %c0_47] : memref<48x64xf32, #tpu.memory_space<vmem>>, vector<1x32xf32>
    %95 = vector.broadcast %94 : vector<1x32xf32> to vector<16x32xf32>
    %96 = arith.addf %93, %95 : vector<16x32xf32>
    %c192 = arith.constant 192 : index
    %c0_48 = arith.constant 0 : index
    %97 = vector.load %arg2[%c192, %c0_48] : memref<352x128xf32, #tpu.memory_space<vmem>>, vector<32x32xf32>
    %cst_49 = arith.constant dense<0.000000e+00> : vector<16x32xf32>
    %98 = tpu.matmul %1, %97, %cst_49 {dimension_numbers = #tpu.dot_dimension_numbers<[1], [0], [0], [1], [0, 0, 1, 1], [], []>, precision = #tpu.contract_precision<fp32>} : vector<16x32xf32>, vector<32x32xf32>, vector<16x32xf32> -> vector<16x32xf32>
    %c6 = arith.constant 6 : index
    %c0_50 = arith.constant 0 : index
    %99 = vector.load %arg3[%c6, %c0_50] : memref<48x64xf32, #tpu.memory_space<vmem>>, vector<1x32xf32>
    %100 = vector.broadcast %99 : vector<1x32xf32> to vector<16x32xf32>
    %101 = arith.addf %98, %100 : vector<16x32xf32>
    %cst_51 = arith.constant dense<0.000000e+00> : vector<16x16xf32>
    %102 = tpu.matmul %91, %96, %cst_51 {dimension_numbers = #tpu.dot_dimension_numbers<[1], [1], [0], [0], [0, 0, 1, 0], [], []>, precision = #tpu.contract_precision<fp32>} : vector<16x32xf32>, vector<16x32xf32>, vector<16x16xf32> -> vector<16x16xf32>
    %cst_52 = arith.constant 0.176776692 : f32
    %103 = vector.broadcast %cst_52 : f32 to vector<16x16xf32>
    %104 = arith.mulf %102, %103 : vector<16x16xf32>
    %105 = arith.addf %104, %7 : vector<16x16xf32>
    %cst_53 = arith.constant dense<0xFF800000> : vector<16xf32>
    %106 = vector.multi_reduction <maximumf>, %105, %cst_53 [1] : vector<16x16xf32> to vector<16xf32>
    %107 = vector.shape_cast %106 : vector<16xf32> to vector<16x1xf32>
    %108 = vector.broadcast %107 : vector<16x1xf32> to vector<16x16xf32>
    %109 = arith.subf %105, %108 : vector<16x16xf32>
    %110 = math.exp %109 : vector<16x16xf32>
    %cst_54 = arith.constant dense<0.000000e+00> : vector<16xf32>
    %111 = vector.multi_reduction <add>, %110, %cst_54 [1] : vector<16x16xf32> to vector<16xf32>
    %112 = vector.shape_cast %111 : vector<16xf32> to vector<16x1xf32>
    %113 = vector.broadcast %112 : vector<16x1xf32> to vector<16x16xf32>
    %114 = arith.divf %110, %113 : vector<16x16xf32>
    %cst_55 = arith.constant dense<0.000000e+00> : vector<16x32xf32>
    %115 = tpu.matmul %114, %101, %cst_55 {dimension_numbers = #tpu.dot_dimension_numbers<[1], [0], [0], [1], [0, 0, 1, 1], [], []>, precision = #tpu.contract_precision<fp32>} : vector<16x16xf32>, vector<16x32xf32>, vector<16x32xf32> -> vector<16x32xf32>
    %c224 = arith.constant 224 : index
    %c0_56 = arith.constant 0 : index
    %116 = vector.load %arg2[%c224, %c0_56] : memref<352x128xf32, #tpu.memory_space<vmem>>, vector<32x32xf32>
    %cst_57 = arith.constant dense<0.000000e+00> : vector<16x32xf32>
    %117 = tpu.matmul %115, %116, %cst_57 {dimension_numbers = #tpu.dot_dimension_numbers<[1], [0], [0], [1], [0, 0, 1, 1], [], []>, precision = #tpu.contract_precision<fp32>} : vector<16x32xf32>, vector<32x32xf32>, vector<16x32xf32> -> vector<16x32xf32>
    %c7 = arith.constant 7 : index
    %c0_58 = arith.constant 0 : index
    %118 = vector.load %arg3[%c7, %c0_58] : memref<48x64xf32, #tpu.memory_space<vmem>>, vector<1x32xf32>
    %119 = vector.broadcast %118 : vector<1x32xf32> to vector<16x32xf32>
    %120 = arith.addf %117, %119 : vector<16x32xf32>
    %121 = arith.addf %64, %120 : vector<16x32xf32>
    %c4_59 = arith.constant 4 : index
    %122 = memref.load %arg4[%c4_59] : memref<6xf32, #tpu.memory_space<smem>>
    %c5_60 = arith.constant 5 : index
    %123 = memref.load %arg4[%c5_60] : memref<6xf32, #tpu.memory_space<smem>>
    %cst_61 = arith.constant dense<0.000000e+00> : vector<16xf32>
    %124 = vector.multi_reduction <add>, %121, %cst_61 [1] : vector<16x32xf32> to vector<16xf32>
    %125 = vector.shape_cast %124 : vector<16xf32> to vector<16x1xf32>
    %cst_62 = arith.constant 3.200000e+01 : f32
    %126 = vector.broadcast %cst_62 : f32 to vector<16x1xf32>
    %127 = arith.divf %125, %126 : vector<16x1xf32>
    %128 = vector.broadcast %127 : vector<16x1xf32> to vector<16x32xf32>
    %129 = arith.subf %121, %128 : vector<16x32xf32>
    %130 = arith.mulf %129, %129 : vector<16x32xf32>
    %cst_63 = arith.constant dense<0.000000e+00> : vector<16xf32>
    %131 = vector.multi_reduction <add>, %130, %cst_63 [1] : vector<16x32xf32> to vector<16xf32>
    %132 = vector.shape_cast %131 : vector<16xf32> to vector<16x1xf32>
    %cst_64 = arith.constant 3.100000e+01 : f32
    %133 = vector.broadcast %cst_64 : f32 to vector<16x1xf32>
    %134 = arith.divf %132, %133 : vector<16x1xf32>
    %135 = vector.broadcast %122 : f32 to vector<16x32xf32>
    %136 = arith.mulf %135, %129 : vector<16x32xf32>
    %137 = math.sqrt %134 : vector<16x1xf32>
    %cst_65 = arith.constant 9.99999997E-7 : f32
    %138 = vector.broadcast %cst_65 : f32 to vector<16x1xf32>
    %139 = arith.addf %137, %138 : vector<16x1xf32>
    %140 = vector.broadcast %139 : vector<16x1xf32> to vector<16x32xf32>
    %141 = arith.divf %136, %140 : vector<16x32xf32>
    %142 = vector.broadcast %123 : f32 to vector<16x32xf32>
    %143 = arith.addf %141, %142 : vector<16x32xf32>
    %cst_66 = arith.constant dense<0.000000e+00> : vector<16x64xf32>
    %144 = tpu.matmul %143, %2, %cst_66 {dimension_numbers = #tpu.dot_dimension_numbers<[1], [0], [0], [1], [0, 0, 1, 1], [], []>, precision = #tpu.contract_precision<fp32>} : vector<16x32xf32>, vector<32x64xf32>, vector<16x64xf32> -> vector<16x64xf32>
    %145 = vector.broadcast %4 : vector<1x64xf32> to vector<16x64xf32>
    %146 = arith.addf %144, %145 : vector<16x64xf32>
    %cst_67 = arith.constant dense<0.000000e+00> : vector<16x32xf32>
    %147 = tpu.matmul %146, %3, %cst_67 {dimension_numbers = #tpu.dot_dimension_numbers<[1], [0], [0], [1], [0, 0, 1, 1], [], []>, precision = #tpu.contract_precision<fp32>} : vector<16x64xf32>, vector<64x32xf32>, vector<16x32xf32> -> vector<16x32xf32>
    %148 = vector.broadcast %5 : vector<1x32xf32> to vector<16x32xf32>
    %149 = arith.addf %147, %148 : vector<16x32xf32>
    %150 = arith.addf %121, %149 : vector<16x32xf32>
    %c0_68 = arith.constant 0 : index
    %c0_69 = arith.constant 0 : index
    %151 = vector.load %arg5[%c0_68, %c0_69] : memref<16x32xf32, #tpu.memory_space<vmem>>, vector<16x32xf32>
    tpu.vector_store %arg5[%c0_68, %c0_69], %150 {strides = array<i32>} : memref<16x32xf32, #tpu.memory_space<vmem>>, vector<16x32xf32>,
    return
  }
}

</mosaic_0001>

<bundles_post_ra>
// kernel: tpu_custom_call.1
= control target key start
LH: loop header
LB: loop body
LE: loop exit
PB: predicated region body
PF: predicated region fallthrough
CT: control target
= control target key end

     0   :  { %10 = vsyncpa [#allocation3], 0  ;;  %s10651_s0 = inlined_call_operand.hbm [shape: f32[16,32], index: 0, kind: input, shape index: {}]   ;;  %s10652_s1 = inlined_call_operand.hbm [shape: f32[16,32], index: 1, kind: input, shape index: {}]   ;;  %s10653_s2 = inlined_call_operand.hbm [shape: f32[352,128], index: 2, kind: input, shape index: {}]   ;;  %s10654_s3 = inlined_call_operand.hbm [shape: f32[48,64], index: 3, kind: input, shape index: {}]   ;;  %s10655_s4 = inlined_call_operand.vmem [shape: f32[6], index: 4, kind: input, shape index: {}]   ;;  %s10656_s5 = inlined_call_operand.hbm [shape: f32[16,32], index: 5, kind: output, shape index: {}]  }
   0x1   :  { %11 = vsyncpa [#allocation7], 0 }
   0x2   :  { %12 = vsyncpa [#allocation10], 0 }
   0x3   :  { %13 = vsyncpa [#allocation5], 0 }
   0x4   :  { %14 = vsyncpa [#allocation4], 0  ;;  %s9381_s18 = smov [#allocation6]   ;;  %s9382_s20 = smov [#allocation2]  }
   0x5   :  { %s32_s19 = sshll.u32 %s9381_s18, 4  ;;  %s20_s21 = sshll.u32 %s9382_s20, 4  ;;  %s33_s19 = int_to_ptr.vmem [resolvable:$true] %s32_s19  ;;  %s21_s21 = int_to_ptr.vmem [resolvable:$true] %s20_s21 }
   0x6   :  { %s9267_s22 = scalar_lea.vmem %s33_s19, 256  ;;  %p9272_p1 = scmp.lt.s32.totalorder %s33_s19, %s33_s19 }
   0x7   :  { %p9268_p0 = scmp.ne.s32.totalorder %s33_s19, %s9267_s22  ;;  %p9273_p2 = scmp.lt.s32.totalorder %s9267_s22, %s9267_s22 }
   0x9   :  { %p9274_p3 = por %p9273_p2, %p9272_p1 }
   0xb   :  { %p9275_p4 = pnand %p9274_p3, %p9268_p0 }
   0xd   :  { %9278 = shalt.err (!%p9275_p4)
}
   0xe   :  { %s9383_s23 = smov 128   ;;  %s9384_s24 = smov 8  }
   0xf   :  { %38 = dma.hbm_to_vmem [thread:$0]  %s10652_s1, 256, %s33_s19, [#allocation7], %s9383_s23, %s9383_s23, %s9384_s24  }
  0x10   :  { %s9287_s27 = scalar_lea.vmem %s21_s21, 256  ;;  %p9292_p6 = scmp.lt.s32.totalorder %s21_s21, %s21_s21 }
  0x11   :  { %p9288_p5 = scmp.ne.s32.totalorder %s21_s21, %s9287_s27  ;;  %p9293_p7 = scmp.lt.s32.totalorder %s9287_s27, %s9287_s27 }
  0x13   :  { %p9294_p8 = por %p9293_p7, %p9292_p6 }
  0x15   :  { %p9295_p9 = pnand %p9294_p8, %p9288_p5 }
  0x17   :  { %9298 = shalt.err (!%p9295_p9)
}
  0x18   :  { %26 = dma.hbm_to_vmem [thread:$0]  %s10651_s0, 256, %s21_s21, [#allocation3], %s9383_s23, %s9383_s23, %s9384_s24  }
  0x19   :  { %s9385_s30 = smov [#allocation8]   ;;  %s9386_s7 = smov [#allocation9]  }
  0x1a   :  { %s44_s6 = sshll.u32 %s9385_s30, 4  ;;  %s56_s8 = sshll.u32 %s9386_s7, 4  ;;  %s45_s6 = int_to_ptr.vmem [resolvable:$true] %s44_s6  ;;  %s57_s8 = int_to_ptr.vmem [resolvable:$true] %s56_s8 }
  0x1b   :  { %s9307_s1 = scalar_lea.vmem %s45_s6, 5632  ;;  %p9312_p11 = scmp.lt.s32.totalorder %s45_s6, %s45_s6 }
  0x1c   :  { %p9308_p10 = scmp.ne.s32.totalorder %s45_s6, %s9307_s1  ;;  %p9313_p12 = scmp.lt.s32.totalorder %s9307_s1, %s9307_s1 }
  0x1e   :  { %p9314_p13 = por %p9313_p12, %p9312_p11 }
  0x20   :  { %p9315_p0 = pnand %p9314_p13, %p9308_p10 }
  0x22   :  { %9318 = shalt.err (!%p9315_p0)
}
  0x23   :  { %50 = dma.hbm_to_vmem [thread:$0]  %s10653_s2, 5632, %s45_s6, [#allocation7], %s9383_s23, %s9383_s23, %s9384_s24  }
  0x24   :  { %s9327_s0 = scalar_lea.vmem %s57_s8, 768  ;;  %p9332_p2 = scmp.lt.s32.totalorder %s57_s8, %s57_s8 }
  0x25   :  { %p9328_p1 = scmp.ne.s32.totalorder %s57_s8, %s9327_s0  ;;  %p9333_p3 = scmp.lt.s32.totalorder %s9327_s0, %s9327_s0 }
  0x27   :  { %p9334_p4 = por %p9333_p3, %p9332_p2 }
  0x29   :  { %p9335_p5 = pnand %p9334_p4, %p9328_p1 }
  0x2b   :  { %9338 = shalt.err (!%p9335_p5)
}
  0x2c   :  { %62 = dma.hbm_to_vmem [thread:$0]  %s10654_s3, 768, %s57_s8, [#allocation10], %s9383_s23, %s9383_s23, %s9384_s24  }
  0x2d   :  { %s69_s15 = sshll.u32 %s10655_s4, 4  ;;  %s70_s15 = int_to_ptr.vmem [resolvable:$true] %s69_s15 }
  0x2e   :  { %s9339_s2 = scalar_lea.vmem %s70_s15, 16  ;;  %p9344_p7 = scmp.lt.s32.totalorder %s70_s15, %s70_s15 }
  0x2f   :  { %p9340_p6 = scmp.ne.s32.totalorder %s70_s15, %s9339_s2  ;;  %p9345_p8 = scmp.lt.s32.totalorder %s9339_s2, %s9339_s2 }
  0x31   :  { %p9346_p9 = por %p9345_p8, %p9344_p7 }
  0x33   :  { %p9347_p10 = pnand %p9346_p9, %p9340_p6 }
  0x35   :  { %9350 = shalt.err (!%p9347_p10)
}
  0x36   :  { %s9387_s16 = smov [#allocation11]  }
  0x37   :  { %72 = dma.vmem_to_smem %s70_s15, 16, %s9387_s16, [#allocation5]  }
  0x38   :  { %9371 = dma.done.wait [#allocation3], 256  }
  0x39   :  { %9372 = vsyncadd [#allocation3], 4294967040 }
  0x3a   :  { %9373 = dma.done.wait [#allocation7], 5888  }
  0x3b   :  { %9374 = vsyncadd [#allocation7], 4294961408 }
  0x3c   :  { %9375 = dma.done.wait [#allocation10], 768  }
  0x3d   :  { %9376 = vsyncadd [#allocation10], 4294966528 }
  0x3e   :  { %9377 = dma.done.wait [#allocation5], 16  }
  0x3f   :  { %9378 = vsyncadd [#allocation5], 4294967280 }
  0x40   :  { %88 = sfence }
  0x41   :  { %v89_v0 = vld [vmem:[#allocation2] sm:$0xff]  ;;  %vm113_vm0 = vcmask 261120   ;;  %v90_v1 = vld [vmem:[#allocation2 + $0x8] sm:$0xff]  ;;  %v165_v14 = vld [vmem:[#allocation8 + $0x18] sm:$0xff]  ;;  %s111_s3 = sld [smem:[#allocation11]]  ;;  %vm2297_vm5 = vcmask 130048  }
  0x42   :  { %v114_v2 = vsel %vm113_vm0, %v89_v0, 0.0  ;;  %v117_v3 = vsel %vm113_vm0, %v90_v1, 0.0  ;;  %v9458_v15 = vand.u32 4294901760, %v165_v14  ;;  %v164_v16 = vld [vmem:[#allocation8 + $0x10] sm:$0xff]  ;;  %v163_v19 = vld [vmem:[#allocation8 + $0x8] sm:$0xff]  ;;  %v162_v23 = vld [vmem:[#allocation8] sm:$0xff] }
  0x43   :  { %115 = vadd.xlane.f32.xlu0 %v114_v2  ;;  %v9463_v18 = vand.u32 4294901760, %v164_v16  ;;  %v9473_v22 = vand.u32 4294901760, %v163_v19  ;;  %v9485_v27 = vand.u32 4294901760, %v162_v23  ;;  %s7838_s4 = sld [smem:[#allocation11 + $0x1]]  ;;  %vm7227_vm14 = vcmask 523264   ;;  %s9388_s21 = smov [#allocation12]  }
  0x44   :  { %v9461_v17 = vsub.f32 %v165_v14, %v9458_v15  ;;  %8333 = vmatprep.subr.mxu0 %v9458_v15  ;;  %s7843_s17 = sld [smem:[#allocation11 + $0x2]]  ;;  %s7823_s22 = sshll.u32 %s9388_s21, 4  ;;  %s7824_s22 = int_to_ptr.vmem [resolvable:$true] %s7823_s22 }
  0x45   :  { %8334 = vmatpush3.msra.mxu0 %v9458_v15  ;;  %v9471_v21 = vsub.f32 %v164_v16, %v9463_v18  ;;  %v9483_v26 = vsub.f32 %v163_v19, %v9473_v22  ;;  %v9495_v31 = vsub.f32 %v162_v23, %v9485_v27  ;;  %v705_v19 = vld [vmem:[#allocation8 + $0x20] sm:$0xff]  ;;  %s7844_s18 = sld [smem:[#allocation11 + $0x3]]  ;;  %s9351_s25 = scalar_lea.vmem %s7824_s22, 256 }
  0x46   :  { %v9468_v20 = vand.u32 4294901760, %v9461_v17  ;;  %8335 = vmatprep.subr.mxu0 %v9463_v18  ;;  %s7849_s19 = sld [smem:[#allocation11 + $0x4]]  ;;  %p9352_p11 = scmp.ne.s32.totalorder %s7824_s22, %s9351_s25 }
  0x47   :  { %118 = vadd.xlane.f32.xlu0 %v117_v3  ;;  %8336 = vmatpush3.msra.mxu0 %v9463_v18  ;;  %v9480_v25 = vand.u32 4294901760, %v9471_v21  ;;  %v9492_v30 = vand.u32 4294901760, %v9483_v26  ;;  %v9502_v34 = vand.u32 4294901760, %v9495_v31  ;;  %v136_v54 = vstv %s111_s3  ;;  %v708_v3 = vld [vmem:[#allocation8 + $0x38] sm:$0xff]  ;;  %s7850_s20 = sld [smem:[#allocation11 + $0x5]]  ;;  %p9356_p12 = scmp.lt.s32.totalorder %s7824_s22, %s7824_s22 }
  0x48   :  { %v294_v24 = vsub.f32 %v9461_v17, %v9468_v20  ;;  %8337 = vmatprep.subr.mxu0 %v9473_v22  ;;  %p9357_p13 = scmp.lt.s32.totalorder %s9351_s25, %s9351_s25 }
  0x49   :  { %8338 = vmatpush3.msra.mxu0 %v9473_v22  ;;  %v301_v29 = vsub.f32 %v9471_v21, %v9480_v25  ;;  %v308_v33 = vsub.f32 %v9483_v26, %v9492_v30  ;;  %v315_v36 = vsub.f32 %v9495_v31, %v9502_v34  ;;  %v159_v57 = vstv %s7838_s4 }
  0x4a   :  { %v295_v28 = vand.u32 4294901760, %v294_v24  ;;  %8339 = vmatprep.subr.mxu0 %v9485_v27  ;;  %p9358_p0 = por %p9357_p13, %p9356_p12 }
  0x4b   :  { %8340 = vmatpush3.msra.mxu0 %v9485_v27  ;;  %v302_v32 = vand.u32 4294901760, %v301_v29  ;;  %v309_v35 = vand.u32 4294901760, %v308_v33  ;;  %v316_v37 = vand.u32 4294901760, %v315_v36 }
  0x4c   :  { %8344 = vmatprep.subr.mxu1 %v295_v28  ;;  %8355 = vmatprep.subr.mxu0 %v9461_v17  ;;  %p9359_p1 = pnand %p9358_p0, %p9352_p11 }
  0x4d   :  { %8345 = vmatpush3.msra.mxu1 %v295_v28 }
  0x4e   :  { %8346 = vmatprep.subr.mxu1 %v302_v32 }
  0x4f   :  { %8347 = vmatpush3.msra.mxu1 %v302_v32  ;;  %v9558_v32 = vand.u32 4294901760, %v705_v19 }
  0x50   :  { %8348 = vmatprep.subr.mxu1 %v309_v35 }
  0x51   :  { %8349 = vmatpush3.msra.mxu1 %v309_v35 }
  0x52   :  { %8350 = vmatprep.subr.mxu1 %v316_v37 }
  0x53   :  { %8351 = vmatpush3.msra.mxu1 %v316_v37  ;;  %v9577_v37 = vsub.f32 %v705_v19, %v9558_v32 }
  0x54   :  { %8366 = vmatprep.subr.mxu1 %v9458_v15 }
  0xcc   :  { %v116_v4 = vpop.xlane.xlu0 %115 }
  0xcd   :  { %v121_v5 = vmul.f32 0.03125, %v116_v4 }
  0xcf   :  { %v9448_v6 = vsub.f32 %v89_v0, %v121_v5 }
  0xd0   :  { %v119_v7 = vpop.xlane.xlu0 %118 }
  0xd1   :  { %v122_v8 = vmul.f32 0.03125, %v119_v7  ;;  %v125_v9 = vmul.f32 %v9448_v6, %v9448_v6  ;;  %v137_v55 = vmul.f32 %v136_v54, %v9448_v6  ;;  %v9523_v7 = vand.u32 4294901760, %v708_v3 }
  0xd3   :  { %v9452_v10 = vsub.f32 %v90_v1, %v122_v8  ;;  %v127_v11 = vsel %vm113_vm0, %v125_v9, 0.0  ;;  %v707_v8 = vld [vmem:[#allocation8 + $0x30] sm:$0xff]  ;;  %v9543_v16 = vsub.f32 %v708_v3, %v9523_v7 }
  0xd4   :  { %128 = vadd.xlane.f32.xlu1 %v127_v11  ;;  %v706_v11 = vld [vmem:[#allocation8 + $0x28] sm:$0xff]  ;;  %v9539_v14 = vand.u32 4294901760, %v707_v8 }
  0xd5   :  { %v126_v12 = vmul.f32 %v9452_v10, %v9452_v10  ;;  %v138_v59 = vmul.f32 %v136_v54, %v9452_v10  ;;  %v9549_v24 = vand.u32 4294901760, %v706_v11  ;;  %v9562_v33 = vand.u32 4294901760, %v9543_v16 }
  0xd6   :  { %v9556_v29 = vsub.f32 %v707_v8, %v9539_v14 }
  0xd7   :  { %v130_v13 = vsel %vm113_vm0, %v126_v12, 0.0  ;;  %v9567_v35 = vsub.f32 %v706_v11, %v9549_v24 }
  0xd8   :  { %131 = vadd.xlane.f32.xlu1 %v130_v13  ;;  %v9574_v36 = vand.u32 4294901760, %v9556_v29 }
 0x15d   :  { %v129_v38 = vpop.xlane.xlu1 %128 }
 0x15e   :  { %v134_v39 = vmul.f32 0.032258064, %v129_v38  ;;  %v831_v38 = vsub.f32 %v9543_v16, %v9562_v33 }
 0x160   :  { %9217 = vrsqrt.f32 %v134_v39  ;;  %vm141_vm1 = vcmp.eq.f32.partialorder %v134_v39, inf  ;;  %v144_v44 = vand.u32 2147483648, %v134_v39  ;;  %vm143_vm2 = vcmp.eq.f32.partialorder %v134_v39, 0.0 }
 0x161   :  { %v132_v40 = vpop.xlane.xlu1 %131 }
 0x162   :  { %v135_v41 = vmul.f32 0.032258064, %v132_v40 }
 0x164   :  { %9219 = vrsqrt.f32 %v135_v41  ;;  %vm148_vm3 = vcmp.eq.f32.partialorder %v135_v41, inf  ;;  %v151_v50 = vand.u32 2147483648, %v135_v41  ;;  %vm150_vm4 = vcmp.eq.f32.partialorder %v135_v41, 0.0 }
 0x16d   :  { %v9218_v42 = vpop.eup %9217 }
 0x16e   :  { %v140_v43 = vmul.f32 %v9218_v42, %v134_v39  ;;  %v1242_v42 = vld [vmem:[#allocation8 + $0x40] sm:$0xff] }
 0x170   :  { %v142_v45 = vsel %vm141_vm1, %v134_v39, %v140_v43  ;;  %v9595_v39 = vand.u32 4294901760, %v9577_v37 }
 0x171   :  { %v9220_v46 = vpop.eup %9219  ;;  %v145_v47 = vsel %vm143_vm2, %v144_v44, %v142_v45  ;;  %v9649_v45 = vand.u32 4294901760, %v1242_v42 }
 0x172   :  { %v153_v48 = vadd.f32 1e-06, %v145_v47  ;;  %v147_v49 = vmul.f32 %v9220_v46, %v135_v41 }
 0x174   :  { %9221 = vrcp.f32 %v153_v48  ;;  %v149_v51 = vsel %vm148_vm3, %v135_v41, %v147_v49  ;;  %v9669_v49 = vsub.f32 %v1242_v42, %v9649_v45 }
 0x175   :  { %v152_v52 = vsel %vm150_vm4, %v151_v50, %v149_v51 }
 0x176   :  { %v154_v53 = vadd.f32 1e-06, %v152_v52 }
 0x178   :  { %9223 = vrcp.f32 %v154_v53  ;;  %v9687_v53 = vand.u32 4294901760, %v9669_v49 }
 0x181   :  { %v9222_v56 = vpop.eup %9221 }
 0x182   :  { %v156_v58 = vmul.f32 %v9222_v56, %v137_v55 }
 0x184   :  { %v160_v60 = vadd.f32 %v159_v57, %v156_v58 }
 0x185   :  { %v9224_v61 = vpop.eup %9223 }
 0x186   :  { %v172_v62 = vsel %vm113_vm0, %v160_v60, 0  ;;  %v158_v63 = vmul.f32 %v9224_v61, %v138_v59 }
 0x187   :  { %v9511_v0 = vand.u32 4294901760, %v172_v62 }
 0x188   :  { %v161_v1 = vadd.f32 %v159_v57, %v158_v63  ;;  %v1389_v57 = vsub.f32 %v9669_v49, %v9687_v53  ;;  %v7839_v63 = vld [vmem:[#allocation9] ss:$0 sm:$0xff] }
 0x189   :  { %8352 = vmatprep.mubr.f32.mxu1 %v9511_v0  ;;  %v9515_v2 = vsub.f32 %v172_v62, %v9511_v0 }
 0x18a   :  { %v175_v4 = vsel %vm113_vm0, %v161_v1, 0  ;;  %v1390_v59 = vand.u32 4294901760, %v1389_v57 }
 0x18b   :  { %v9518_v5 = vand.u32 4294901760, %v175_v4  ;;  %v9521_v6 = vand.u32 4294901760, %v9515_v2 }
 0x18d   :  { %8353 = vmatmul.mubr.f32.vlgmr.msra.gmra.mxu1 %v9518_v5  ;;  %v249_v9 = vsub.f32 %v9515_v2, %v9521_v6  ;;  %v9529_v10 = vsub.f32 %v175_v4, %v9518_v5 }
 0x18e   :  { %8367 = vmatpush3.msra.mxu1 %v9458_v15  ;;  %8374 = vmatprep.mubr.f32.mxu1 %v9521_v6 }
 0x18f   :  { %8368 = vmatprep.subr.mxu1 %v9463_v18  ;;  %v9534_v12 = vand.u32 4294901760, %v249_v9  ;;  %v9537_v13 = vand.u32 4294901760, %v9529_v10 }
 0x190   :  { %8369 = vmatpush3.msra.mxu1 %v9463_v18 }
 0x191   :  { %8370 = vmatprep.subr.mxu1 %v9473_v22  ;;  %8341 = vmatprep.mubr.f32.mxu0 %v9534_v12  ;;  %v259_v23 = vsub.f32 %v9529_v10, %v9537_v13 }
 0x192   :  { %8371 = vmatpush3.msra.mxu1 %v9473_v22 }
 0x193   :  { %8372 = vmatprep.subr.mxu1 %v9485_v27  ;;  %v9553_v28 = vand.u32 4294901760, %v259_v23 }
 0x194   :  { %8373 = vmatpush3.msra.mxu1 %v9485_v27 }
 0x195   :  { %8375 = vmatmul.mubr.f32.vlgmr.msra.gmra.mxu1 %v9537_v13  ;;  %8388 = vmatprep.subr.mxu1 %v9458_v15 }
 0x196   :  { %8342 = vmatmul.mubr.f32.vlgmr.msra.gmra.mxu0 %v9553_v28  ;;  %8389 = vmatpush3.msra.mxu1 %v9458_v15  ;;  %v9586_v15 = vand.u32 4294901760, %v9567_v35 }
 0x197   :  { %8356 = vmatpush3.msra.mxu0 %v9461_v17  ;;  %8396 = vmatprep.mubr.f32.mxu1 %v9511_v0  ;;  %v838_v17 = vsub.f32 %v9556_v29, %v9574_v36 }
 0x198   :  { %8357 = vmatprep.subr.mxu0 %v9471_v21  ;;  %8363 = vmatprep.mubr.f32.mxu0 %v9515_v2 }
 0x199   :  { %8390 = vmatprep.subr.mxu1 %v9463_v18  ;;  %8358 = vmatpush3.msra.mxu0 %v9471_v21  ;;  %v832_v21 = vand.u32 4294901760, %v831_v38 }
 0x19a   :  { %8391 = vmatpush3.msra.mxu1 %v9463_v18  ;;  %8359 = vmatprep.subr.mxu0 %v9483_v26  ;;  %v845_v18 = vsub.f32 %v9567_v35, %v9586_v15 }
 0x19b   :  { %8392 = vmatprep.subr.mxu1 %v9473_v22  ;;  %8360 = vmatpush3.msra.mxu0 %v9483_v26  ;;  %v839_v26 = vand.u32 4294901760, %v838_v17 }
 0x19c   :  { %8393 = vmatpush3.msra.mxu1 %v9473_v22  ;;  %8361 = vmatprep.subr.mxu0 %v9495_v31  ;;  %v852_v22 = vsub.f32 %v9577_v37, %v9595_v39 }
 0x19d   :  { %8394 = vmatprep.subr.mxu1 %v9485_v27  ;;  %8362 = vmatpush3.msra.mxu0 %v9495_v31  ;;  %v846_v31 = vand.u32 4294901760, %v845_v18 }
 0x19e   :  { %8395 = vmatpush3.msra.mxu1 %v9485_v27  ;;  %8364 = vmatmul.mubr.f32.vlgmr.msra.gmra.mxu0 %v9529_v10  ;;  %v853_v27 = vand.u32 4294901760, %v852_v22 }
 0x19f   :  { %8377 = vmatprep.subr.mxu0 %v9468_v20  ;;  %8397 = vmatmul.mubr.f32.vlgmr.msra.gmra.mxu1 %v9518_v5 }
 0x1a0   :  { %8410 = vmatprep.subr.mxu1 %v832_v21  ;;  %8378 = vmatpush3.msra.mxu0 %v9468_v20  ;;  %v1245_v20 = vld [vmem:[#allocation8 + $0x58] sm:$0xff] }
 0x1a1   :  { %8385 = vmatprep.mubr.f32.mxu0 %v9511_v0  ;;  %8411 = vmatpush3.msra.mxu1 %v832_v21 }
 0x1a2   :  { %8418 = vmatprep.mubr.f32.mxu1 %v9511_v0  ;;  %8379 = vmatprep.subr.mxu0 %v9480_v25 }
 0x1a3   :  { %8412 = vmatprep.subr.mxu1 %v839_v26  ;;  %8380 = vmatpush3.msra.mxu0 %v9480_v25  ;;  %v9623_v25 = vand.u32 4294901760, %v1245_v20 }
 0x1a4   :  { %8413 = vmatpush3.msra.mxu1 %v839_v26  ;;  %8381 = vmatprep.subr.mxu0 %v9492_v30 }
 0x1a5   :  { %8414 = vmatprep.subr.mxu1 %v846_v31  ;;  %8382 = vmatpush3.msra.mxu0 %v9492_v30  ;;  %v1244_v30 = vld [vmem:[#allocation8 + $0x50] sm:$0xff]  ;;  %v9636_v41 = vsub.f32 %v1245_v20, %v9623_v25 }
 0x1a6   :  { %8415 = vmatpush3.msra.mxu1 %v846_v31  ;;  %8383 = vmatprep.subr.mxu0 %v9502_v34  ;;  %v9631_v40 = vand.u32 4294901760, %v1244_v30 }
 0x1a7   :  { %8416 = vmatprep.subr.mxu1 %v853_v27  ;;  %8384 = vmatpush3.msra.mxu0 %v9502_v34  ;;  %v1243_v34 = vld [vmem:[#allocation8 + $0x48] sm:$0xff]  ;;  %v9654_v46 = vand.u32 4294901760, %v9636_v41 }
 0x1a8   :  { %8417 = vmatpush3.msra.mxu1 %v853_v27  ;;  %8386 = vmatmul.mubr.f32.vlgmr.msra.gmra.mxu0 %v9518_v5  ;;  %v9640_v43 = vand.u32 4294901760, %v1243_v34  ;;  %v9647_v44 = vsub.f32 %v1244_v30, %v9631_v40 }
 0x1a9   :  { %8399 = vmatprep.subr.mxu0 %v9523_v7  ;;  %8419 = vmatmul.mubr.f32.vlgmr.msra.gmra.mxu1 %v9518_v5  ;;  %v1368_v50 = vsub.f32 %v9636_v41, %v9654_v46 }
 0x1aa   :  { %8432 = vmatprep.subr.mxu1 %v9523_v7  ;;  %8400 = vmatpush3.msra.mxu0 %v9523_v7  ;;  %v9659_v47 = vsub.f32 %v1243_v34, %v9640_v43  ;;  %v9666_v48 = vand.u32 4294901760, %v9647_v44 }
 0x1ab   :  { %8407 = vmatprep.mubr.f32.mxu0 %v9534_v12  ;;  %8433 = vmatpush3.msra.mxu1 %v9523_v7  ;;  %v1369_v54 = vand.u32 4294901760, %v1368_v50 }
 0x1ac   :  { %8440 = vmatprep.mubr.f32.mxu1 %v9521_v6  ;;  %8401 = vmatprep.subr.mxu0 %v9539_v14  ;;  %v9678_v51 = vand.u32 4294901760, %v9659_v47  ;;  %v1375_v52 = vsub.f32 %v9647_v44, %v9666_v48 }
 0x1ad   :  { %8434 = vmatprep.subr.mxu1 %v9539_v14  ;;  %8402 = vmatpush3.msra.mxu0 %v9539_v14 }
 0x1ae   :  { %8435 = vmatpush3.msra.mxu1 %v9539_v14  ;;  %8403 = vmatprep.subr.mxu0 %v9549_v24  ;;  %v1382_v55 = vsub.f32 %v9659_v47, %v9678_v51  ;;  %v1376_v56 = vand.u32 4294901760, %v1375_v52 }
 0x1af   :  { %8436 = vmatprep.subr.mxu1 %v9549_v24  ;;  %8404 = vmatpush3.msra.mxu0 %v9549_v24 }
 0x1b0   :  { %8437 = vmatpush3.msra.mxu1 %v9549_v24  ;;  %8405 = vmatprep.subr.mxu0 %v9558_v32  ;;  %v1383_v58 = vand.u32 4294901760, %v1382_v55 }
 0x1b1   :  { %8438 = vmatprep.subr.mxu1 %v9558_v32  ;;  %8406 = vmatpush3.msra.mxu0 %v9558_v32 }
 0x1b2   :  { %8439 = vmatpush3.msra.mxu1 %v9558_v32  ;;  %8408 = vmatmul.mubr.f32.vlgmr.msra.gmra.mxu0 %v9553_v28 }
 0x1b3   :  { %8421 = vmatprep.subr.mxu0 %v9543_v16  ;;  %8441 = vmatmul.mubr.f32.vlgmr.msra.gmra.mxu1 %v9537_v13 }
 0x1b4   :  { %8454 = vmatprep.subr.mxu1 %v9523_v7  ;;  %8422 = vmatpush3.msra.mxu0 %v9543_v16 }
 0x1b5   :  { %8429 = vmatprep.mubr.f32.mxu0 %v9515_v2  ;;  %8455 = vmatpush3.msra.mxu1 %v9523_v7 }
 0x1b6   :  { %8462 = vmatprep.mubr.f32.mxu1 %v9511_v0  ;;  %8423 = vmatprep.subr.mxu0 %v9556_v29 }
 0x1b7   :  { %8456 = vmatprep.subr.mxu1 %v9539_v14  ;;  %8424 = vmatpush3.msra.mxu0 %v9556_v29 }
 0x1b8   :  { %8457 = vmatpush3.msra.mxu1 %v9539_v14  ;;  %8425 = vmatprep.subr.mxu0 %v9567_v35 }
 0x1b9   :  { %8458 = vmatprep.subr.mxu1 %v9549_v24  ;;  %8426 = vmatpush3.msra.mxu0 %v9567_v35 }
 0x1ba   :  { %8459 = vmatpush3.msra.mxu1 %v9549_v24  ;;  %8427 = vmatprep.subr.mxu0 %v9577_v37 }
 0x1bb   :  { %8460 = vmatprep.subr.mxu1 %v9558_v32  ;;  %8428 = vmatpush3.msra.mxu0 %v9577_v37  ;;  %v7840_v37 = vld [vmem:[#allocation9 + $0x1] ss:$0 sm:$0xff] }
 0x1bc   :  { %8461 = vmatpush3.msra.mxu1 %v9558_v32  ;;  %8430 = vmatmul.mubr.f32.vlgmr.msra.gmra.mxu0 %v9529_v10 }
 0x1bd   :  { %8443 = vmatprep.subr.mxu0 %v9562_v33  ;;  %8463 = vmatmul.mubr.f32.vlgmr.msra.gmra.mxu1 %v9518_v5 }
 0x1be   :  { %8476 = vmatprep.subr.mxu1 %v1369_v54  ;;  %8444 = vmatpush3.msra.mxu0 %v9562_v33 }
 0x1bf   :  { %8451 = vmatprep.mubr.f32.mxu0 %v9511_v0  ;;  %8477 = vmatpush3.msra.mxu1 %v1369_v54 }
 0x1c0   :  { %8484 = vmatprep.mubr.f32.mxu1 %v9511_v0  ;;  %8445 = vmatprep.subr.mxu0 %v9574_v36 }
 0x1c1   :  { %8478 = vmatprep.subr.mxu1 %v1376_v56  ;;  %8446 = vmatpush3.msra.mxu0 %v9574_v36 }
 0x1c2   :  { %8479 = vmatpush3.msra.mxu1 %v1376_v56  ;;  %8447 = vmatprep.subr.mxu0 %v9586_v15 }
 0x1c3   :  { %8480 = vmatprep.subr.mxu1 %v1383_v58  ;;  %8448 = vmatpush3.msra.mxu0 %v9586_v15 }
 0x1c4   :  { %8481 = vmatpush3.msra.mxu1 %v1383_v58  ;;  %8449 = vmatprep.subr.mxu0 %v9595_v39 }
 0x1c5   :  { %8482 = vmatprep.subr.mxu1 %v1390_v59  ;;  %8450 = vmatpush3.msra.mxu0 %v9595_v39 }
 0x1c6   :  { %8483 = vmatpush3.msra.mxu1 %v1390_v59  ;;  %8452 = vmatmul.mubr.f32.vlgmr.msra.gmra.mxu0 %v9518_v5 }
 0x1c7   :  { %8465 = vmatprep.subr.mxu0 %v9623_v25  ;;  %8485 = vmatmul.mubr.f32.vlgmr.msra.gmra.mxu1 %v9518_v5 }
 0x1c8   :  { %8498 = vmatprep.subr.mxu1 %v9623_v25  ;;  %8466 = vmatpush3.msra.mxu0 %v9623_v25 }
 0x1c9   :  { %8473 = vmatprep.mubr.f32.mxu0 %v9534_v12  ;;  %8499 = vmatpush3.msra.mxu1 %v9623_v25 }
 0x1ca   :  { %8506 = vmatprep.mubr.f32.mxu1 %v9521_v6  ;;  %8467 = vmatprep.subr.mxu0 %v9631_v40 }
 0x1cb   :  { %8500 = vmatprep.subr.mxu1 %v9631_v40  ;;  %8468 = vmatpush3.msra.mxu0 %v9631_v40 }
 0x1cc   :  { %8501 = vmatpush3.msra.mxu1 %v9631_v40  ;;  %8469 = vmatprep.subr.mxu0 %v9640_v43 }
 0x1cd   :  { %8502 = vmatprep.subr.mxu1 %v9640_v43  ;;  %8470 = vmatpush3.msra.mxu0 %v9640_v43 }
 0x1ce   :  { %8503 = vmatpush3.msra.mxu1 %v9640_v43  ;;  %8471 = vmatprep.subr.mxu0 %v9649_v45 }
 0x1cf   :  { %8504 = vmatprep.subr.mxu1 %v9649_v45  ;;  %8472 = vmatpush3.msra.mxu0 %v9649_v45 }
 0x1d0   :  { %8505 = vmatpush3.msra.mxu1 %v9649_v45  ;;  %8474 = vmatmul.mubr.f32.vlgmr.msra.gmra.mxu0 %v9553_v28 }
 0x1d1   :  { %8487 = vmatprep.subr.mxu0 %v9636_v41  ;;  %8507 = vmatmul.mubr.f32.vlgmr.msra.gmra.mxu1 %v9537_v13 }
 0x1d2   :  { %8520 = vmatprep.subr.mxu1 %v9623_v25  ;;  %8488 = vmatpush3.msra.mxu0 %v9636_v41 }
 0x1d3   :  { %8495 = vmatprep.mubr.f32.mxu0 %v9515_v2  ;;  %8521 = vmatpush3.msra.mxu1 %v9623_v25 }
 0x1d4   :  { %8528 = vmatprep.mubr.f32.mxu1 %v9511_v0  ;;  %8489 = vmatprep.subr.mxu0 %v9647_v44 }
 0x1d5   :  { %8522 = vmatprep.subr.mxu1 %v9631_v40  ;;  %8490 = vmatpush3.msra.mxu0 %v9647_v44 }
 0x1d6   :  { %8523 = vmatpush3.msra.mxu1 %v9631_v40  ;;  %8491 = vmatprep.subr.mxu0 %v9659_v47 }
 0x1d7   :  { %8524 = vmatprep.subr.mxu1 %v9640_v43  ;;  %8492 = vmatpush3.msra.mxu0 %v9659_v47 }
 0x1d8   :  { %8525 = vmatpush3.msra.mxu1 %v9640_v43  ;;  %8493 = vmatprep.subr.mxu0 %v9669_v49 }
 0x1d9   :  { %8526 = vmatprep.subr.mxu1 %v9649_v45  ;;  %8494 = vmatpush3.msra.mxu0 %v9669_v49 }
 0x1da   :  { %8527 = vmatpush3.msra.mxu1 %v9649_v45  ;;  %8496 = vmatmul.mubr.f32.vlgmr.msra.gmra.mxu0 %v9529_v10 }
 0x1db   :  { %8509 = vmatprep.subr.mxu0 %v9654_v46  ;;  %8529 = vmatmul.mubr.f32.vlgmr.msra.gmra.mxu1 %v9518_v5 }
 0x1dc   :  { %8510 = vmatpush3.msra.mxu0 %v9654_v46  ;;  %8517 = vmatprep.mubr.f32.mxu0 %v9511_v0 }
 0x1dd   :  { %8511 = vmatprep.subr.mxu0 %v9666_v48 }
 0x1de   :  { %8512 = vmatpush3.msra.mxu0 %v9666_v48 }
 0x1df   :  { %8513 = vmatprep.subr.mxu0 %v9678_v51 }
 0x1e0   :  { %8514 = vmatpush3.msra.mxu0 %v9678_v51 }
 0x1e1   :  { %8515 = vmatprep.subr.mxu0 %v9687_v53 }
 0x1e2   :  { %8516 = vmatpush3.msra.mxu0 %v9687_v53 }
 0x1e3   :  { %8518 = vmatmul.mubr.f32.vlgmr.msra.gmra.mxu0 %v9518_v5 }
 0x24d   :  { %v8354_v61 = vpop.f32.mrf.mxu1 }
 0x24f   :  { %v353_v2 = vpop.f32.mrf.mxu1 }
 0x255   :  { %v8376_v3 = vpop.f32.mrf.mxu1 }
 0x256   :  { %v8343_v60 = vpop.f32.mrf.mxu0 }
 0x257   :  { %v523_v8 = vpop.f32.mrf.mxu1  ;;  %v263_v16 = vadd.f32 %v8343_v60, %v7839_v63 }
 0x258   :  { %v252_v62 = vpop.f32.mrf.mxu0 }
 0x259   :  { %v253_v0 = vadd.f32 %v7839_v63, %v252_v62  ;;  %v360_v24 = vadd.f32 %v8354_v61, %v263_v16 }
 0x25b   :  { %v354_v6 = vadd.f32 %v353_v2, %v253_v0 }
 0x25e   :  { %v8365_v1 = vpop.f32.mrf.mxu0 }
 0x25f   :  { %v8398_v9 = vpop.f32.mrf.mxu1  ;;  %v447_v29 = vadd.f32 %v8365_v1, %v360_v24 }
 0x260   :  { %v439_v4 = vpop.f32.mrf.mxu0 }
 0x261   :  { %v440_v7 = vadd.f32 %v439_v4, %v354_v6  ;;  %v695_v14 = vpop.f32.mrf.mxu1  ;;  %v532_v36 = vadd.f32 %v8376_v3, %v447_v29 }
 0x263   :  { %v524_v11 = vadd.f32 %v523_v8, %v440_v7  ;;  %v7841_v7 = vld [vmem:[#allocation9 + $0x2] ss:$0 sm:$0xff] }
 0x268   :  { %v8387_v10 = vpop.f32.mrf.mxu0 }
 0x269   :  { %v621_v15 = vadd.f32 %v8387_v10, %v532_v36  ;;  %v8420_v17 = vpop.f32.mrf.mxu1 }
 0x26a   :  { %v614_v12 = vpop.f32.mrf.mxu0 }
 0x26b   :  { %v615_v13 = vadd.f32 %v614_v12, %v524_v11  ;;  %v702_v26 = vadd.f32 %v8398_v9, %v621_v15  ;;  %v890_v31 = vpop.f32.mrf.mxu1 }
 0x26d   :  { %v696_v5 = vadd.f32 %v695_v14, %v615_v13  ;;  %v1783_v30 = vsel %vm113_vm0, %v702_v26, 0 }
 0x26e   :  { %v9774_v42 = vand.u32 4294901760, %v1783_v30 }
 0x26f   :  { %v1780_v19 = vsel %vm113_vm0, %v696_v5, 0 }
 0x270   :  { %v9763_v23 = vand.u32 4294901760, %v1780_v19  ;;  %v9777_v49 = vsub.f32 %v1783_v30, %v9774_v42 }
 0x272   :  { %v9766_v28 = vsub.f32 %v1780_v19, %v9763_v23  ;;  %8542 = vmatprep.mubr.f32.mxu1 %v9763_v23  ;;  %v8409_v33 = vpop.f32.mrf.mxu0  ;;  %v1870_v57 = vand.u32 4294901760, %v9777_v49 }
 0x273   :  { %v800_v21 = vadd.f32 %v8409_v33, %v7840_v37  ;;  %v8442_v20 = vpop.f32.mrf.mxu1 }
 0x274   :  { %v1860_v32 = vand.u32 4294901760, %v9766_v28  ;;  %v789_v39 = vpop.f32.mrf.mxu0  ;;  %v1871_v62 = vsub.f32 %v9777_v49, %v1870_v57 }
 0x275   :  { %v790_v22 = vadd.f32 %v7840_v37, %v789_v39  ;;  %v897_v27 = vadd.f32 %v8420_v17, %v800_v21  ;;  %v1060_v43 = vpop.f32.mrf.mxu1 }
 0x276   :  { %v1861_v35 = vsub.f32 %v9766_v28, %v1860_v32  ;;  %v1872_v3 = vand.u32 4294901760, %v1871_v62  ;;  %v108_v62 = vld [vmem:[#allocation9 + $0x18] sm:$0xff] }
 0x277   :  { %v891_v40 = vadd.f32 %v890_v31, %v790_v22 }
 0x278   :  { %v1862_v38 = vand.u32 4294901760, %v1861_v35 }
 0x27a   :  { %8535 = vmatprep.mubr.f32.mxu0 %v1862_v38 }
 0x27c   :  { %v8431_v18 = vpop.f32.mrf.mxu0 }
 0x27d   :  { %v984_v34 = vadd.f32 %v8431_v18, %v897_v27  ;;  %v8464_v45 = vpop.f32.mrf.mxu1 }
 0x27e   :  { %v976_v25 = vpop.f32.mrf.mxu0 }
 0x27f   :  { %v977_v41 = vadd.f32 %v976_v25, %v891_v40  ;;  %v1069_v44 = vadd.f32 %v8442_v20, %v984_v34  ;;  %v1232_v53 = vpop.f32.mrf.mxu1 }
 0x281   :  { %v1061_v48 = vadd.f32 %v1060_v43, %v977_v41 }
 0x286   :  { %v8453_v46 = vpop.f32.mrf.mxu0 }
 0x287   :  { %v1158_v47 = vadd.f32 %v8453_v46, %v1069_v44  ;;  %v8486_v9 = vpop.f32.mrf.mxu1 }
 0x288   :  { %v1151_v50 = vpop.f32.mrf.mxu0 }
 0x289   :  { %v1239_v51 = vadd.f32 %v8464_v45, %v1158_v47  ;;  %v1152_v52 = vadd.f32 %v1151_v50, %v1061_v48  ;;  %v1427_v14 = vpop.f32.mrf.mxu1 }
 0x28b   :  { %v1789_v54 = vsel %vm113_vm0, %v1239_v51, 0  ;;  %v1233_v55 = vadd.f32 %v1232_v53, %v1152_v52 }
 0x28c   :  { %v9780_v56 = vand.u32 4294901760, %v1789_v54 }
 0x28d   :  { %v1786_v58 = vsel %vm113_vm0, %v1233_v55, 0 }
 0x28e   :  { %v1908_v59 = vsub.f32 %v1789_v54, %v9780_v56  ;;  %v9785_v60 = vand.u32 4294901760, %v1786_v58  ;;  %8531 = vmatprep.subr.mxu0 %v9780_v56 }
 0x28f   :  { %8532 = vmatpush3.xpose.msra.mxu0 %v9780_v56 }
 0x290   :  { %v1915_v61 = vsub.f32 %v1786_v58, %v9785_v60  ;;  %8533 = vmatprep.subr.mxu0 %v9785_v60  ;;  %v1909_v63 = vand.u32 4294901760, %v1908_v59  ;;  %v8475_v2 = vpop.f32.mrf.mxu0 }
 0x291   :  { %v1337_v11 = vadd.f32 %v8475_v2, %v7841_v7  ;;  %v8508_v5 = vpop.f32.mrf.mxu1 }
 0x292   :  { %v1910_v1 = vsub.f32 %v1908_v59, %v1909_v63  ;;  %v1916_v0 = vand.u32 4294901760, %v1915_v61  ;;  %v1326_v10 = vpop.f32.mrf.mxu0 }
 0x293   :  { %8534 = vmatpush3.xpose.msra.mxu0 %v9785_v60  ;;  %v1327_v12 = vadd.f32 %v7841_v7, %v1326_v10  ;;  %v1434_v16 = vadd.f32 %v8486_v9, %v1337_v11  ;;  %v1597_v35 = vpop.f32.mrf.mxu1 }
 0x294   :  { %8545 = vmatprep.subr.mxu0 %v1908_v59  ;;  %v1911_v4 = vand.u32 4294901760, %v1910_v1  ;;  %v1917_v6 = vsub.f32 %v1915_v61, %v1916_v0 }
 0x295   :  { %v1428_v29 = vadd.f32 %v1427_v14, %v1327_v12 }
 0x296   :  { %8536 = vmatmul.mubr.f32.vlgmr.msra.gmra.mxu0 %v1872_v3  ;;  %8538 = vmatprep.subr.mxu1 %v1911_v4  ;;  %v1918_v8 = vand.u32 4294901760, %v1917_v6 }
 0x297   :  { %8539 = vmatpush3.xpose.msra.mxu1 %v1911_v4  ;;  %8546 = vmatpush3.xpose.msra.mxu0 %v1908_v59 }
 0x298   :  { %8549 = vmatprep.mubr.f32.mxu0 %v9766_v28  ;;  %8540 = vmatprep.subr.mxu1 %v1918_v8 }
 0x299   :  { %8547 = vmatprep.subr.mxu0 %v1915_v61 }
 0x29a   :  { %v8497_v13 = vpop.f32.mrf.mxu0 }
 0x29b   :  { %8541 = vmatpush3.xpose.msra.mxu1 %v1918_v8  ;;  %8548 = vmatpush3.xpose.msra.mxu0 %v1915_v61  ;;  %v1521_v24 = vadd.f32 %v8497_v13, %v1434_v16  ;;  %v8530_v37 = vpop.f32.mrf.mxu1 }
 0x29c   :  { %8552 = vmatprep.subr.mxu1 %v9780_v56  ;;  %8559 = vmatprep.subr.mxu0 %v1909_v63  ;;  %v1513_v19 = vpop.f32.mrf.mxu0 }
 0x29d   :  { %v1514_v33 = vadd.f32 %v1513_v19, %v1428_v29  ;;  %v1606_v36 = vadd.f32 %v8508_v5, %v1521_v24  ;;  %v1769_v21 = vpop.f32.mrf.mxu1 }
 0x29e   :  { %8543 = vmatmul.mubr.f32.vlgmr.msra.gmra.mxu1 %v9774_v42  ;;  %8550 = vmatmul.mubr.f32.vlgmr.msra.gmra.mxu0 %v9777_v49 }
 0x29f   :  { %8553 = vmatpush3.xpose.msra.mxu1 %v9780_v56  ;;  %8556 = vmatprep.mubr.f32.mxu1 %v1860_v32  ;;  %v1598_v17 = vadd.f32 %v1597_v35, %v1514_v33 }
 0x2a0   :  { %8560 = vmatpush3.xpose.msra.mxu0 %v1909_v63  ;;  %8563 = vmatprep.mubr.f32.mxu0 %v9763_v23 }
 0x2a1   :  { %8554 = vmatprep.subr.mxu1 %v9785_v60  ;;  %8561 = vmatprep.subr.mxu0 %v1916_v0 }
 0x2a3   :  { %v8519_v38 = vpop.f32.mrf.mxu0  ;;  %8555 = vmatpush3.xpose.msra.mxu1 %v9785_v60 }
 0x2a4   :  { %v1695_v15 = vadd.f32 %v8519_v38, %v1606_v36  ;;  %8562 = vmatpush3.xpose.msra.mxu0 %v1916_v0  ;;  %8566 = vmatprep.subr.mxu1 %v9780_v56  ;;  %v107_v0 = vld [vmem:[#allocation9 + $0x10] sm:$0xff] }
 0x2a5   :  { %v1688_v28 = vpop.f32.mrf.mxu0 }
 0x2a6   :  { %v1776_v32 = vadd.f32 %v8530_v37, %v1695_v15  ;;  %v1689_v39 = vadd.f32 %v1688_v28, %v1598_v17  ;;  %8557 = vmatmul.mubr.f32.vlgmr.msra.gmra.mxu1 %v1870_v57 }
 0x2a7   :  { %8564 = vmatmul.mubr.f32.vlgmr.msra.gmra.mxu0 %v9774_v42  ;;  %8567 = vmatpush3.xpose.msra.mxu1 %v9780_v56 }
 0x2a8   :  { %v9810_v18 = vand.u32 4294901760, %v1776_v32  ;;  %v1770_v26 = vadd.f32 %v1769_v21, %v1689_v39  ;;  %8570 = vmatprep.mubr.f32.mxu1 %v9763_v23  ;;  %8568 = vmatprep.subr.mxu1 %v9785_v60 }
 0x2aa   :  { %v9815_v22 = vsub.f32 %v1776_v32, %v9810_v18  ;;  %v9817_v31 = vand.u32 4294901760, %v1770_v26  ;;  %8573 = vmatprep.subr.mxu0 %v9810_v18 }
 0x2ab   :  { %8574 = vmatpush3.msra.mxu0 %v9810_v18  ;;  %8569 = vmatpush3.xpose.msra.mxu1 %v9785_v60 }
 0x2ac   :  { %v9823_v27 = vsub.f32 %v1770_v26, %v9817_v31  ;;  %8575 = vmatprep.subr.mxu0 %v9817_v31  ;;  %v9827_v23 = vand.u32 4294901760, %v9815_v22 }
 0x2ad   :  { %8576 = vmatpush3.msra.mxu0 %v9817_v31 }
 0x2ae   :  { %8587 = vmatprep.subr.mxu0 %v9815_v22  ;;  %v2445_v20 = vsub.f32 %v9815_v22, %v9827_v23  ;;  %8571 = vmatmul.mubr.f32.vlgmr.msra.gmra.mxu1 %v9774_v42  ;;  %v9835_v25 = vand.u32 4294901760, %v9823_v27 }
 0x2b0   :  { %v2446_v30 = vand.u32 4294901760, %v2445_v20  ;;  %v2452_v34 = vsub.f32 %v9823_v27, %v9835_v25 }
 0x2b2   :  { %8580 = vmatprep.subr.mxu1 %v2446_v30  ;;  %v2453_v40 = vand.u32 4294901760, %v2452_v34 }
 0x2b3   :  { %8581 = vmatpush3.msra.mxu1 %v2446_v30 }
 0x2b4   :  { %8582 = vmatprep.subr.mxu1 %v2453_v40 }
 0x2b5   :  { %8583 = vmatpush3.msra.mxu1 %v2453_v40 }
 0x2b6   :  { %8594 = vmatprep.subr.mxu1 %v9810_v18 }
 0x356   :  { %v8537_v41 = vpop.f32.mrf.mxu0 }
 0x358   :  { %v1864_v44 = vpop.f32.mrf.mxu0 }
 0x35e   :  { %v8544_v43 = vpop.f32.mrf.mxu1  ;;  %v8551_v42 = vpop.f32.mrf.mxu0 }
 0x35f   :  { %v1962_v46 = vadd.f32 %v8544_v43, %v8537_v41 }
 0x360   :  { %v1955_v45 = vpop.f32.mrf.mxu1  ;;  %v2037_v50 = vpop.f32.mrf.mxu0 }
 0x361   :  { %v1956_v47 = vadd.f32 %v1955_v45, %v1864_v44  ;;  %v2045_v49 = vadd.f32 %v8551_v42, %v1962_v46  ;;  %v2828_v45 = vld [vmem:[#allocation8 + $0x60] sm:$0xff] }
 0x363   :  { %v2038_v52 = vadd.f32 %v2037_v50, %v1956_v47 }
 0x366   :  { %v8558_v48 = vpop.f32.mrf.mxu1 }
 0x367   :  { %v2128_v53 = vadd.f32 %v8558_v48, %v2045_v49  ;;  %v8565_v54 = vpop.f32.mrf.mxu0  ;;  %v9887_v48 = vand.u32 4294901760, %v2828_v45 }
 0x368   :  { %v2119_v51 = vpop.f32.mrf.mxu1 }
 0x369   :  { %v2120_v55 = vadd.f32 %v2119_v51, %v2038_v52  ;;  %v2211_v56 = vadd.f32 %v8565_v54, %v2128_v53  ;;  %v2204_v57 = vpop.f32.mrf.mxu0  ;;  %v9897_v52 = vsub.f32 %v2828_v45, %v9887_v48 }
 0x36b   :  { %v2205_v59 = vadd.f32 %v2204_v57, %v2120_v55  ;;  %v9904_v55 = vand.u32 4294901760, %v9897_v52 }
 0x36d   :  { %v2981_v57 = vsub.f32 %v9897_v52, %v9904_v55 }
 0x36e   :  { %v8572_v58 = vpop.f32.mrf.mxu1 }
 0x36f   :  { %v2290_v60 = vadd.f32 %v8572_v58, %v2211_v56  ;;  %v2982_v58 = vand.u32 4294901760, %v2981_v57 }
 0x370   :  { %v2283_v61 = vpop.f32.mrf.mxu1 }
 0x371   :  { %v2294_v63 = vmul.f32 0.17677669, %v2290_v60  ;;  %v2284_v1 = vadd.f32 %v2283_v61, %v2205_v59 }
 0x373   :  { %v2293_v2 = vmul.f32 0.17677669, %v2284_v1  ;;  %v2296_v3 = vadd.f32 %v2294_v63, %v108_v62 }
 0x375   :  { %v2301_v4 = vsel %vm2297_vm5, %v2296_v3, -inf  ;;  %v2295_v6 = vadd.f32 %v2293_v2, %v107_v0 }
 0x376   :  { %2302 = vmax.xlane.f32.xlu1 %v2301_v4 }
 0x377   :  { %v2298_v7 = vsel %vm2297_vm5, %v2295_v6, -inf }
 0x378   :  { %2299 = vmax.xlane.f32.xlu0 %v2298_v7 }
 0x3ff   :  { %v2303_v8 = vpop.xlane.xlu1 %2302 }
 0x400   :  { %v2305_v9 = vsub.f32 %v2296_v3, %v2303_v8 }
 0x401   :  { %v2300_v10 = vpop.xlane.xlu0 %2299 }
 0x402   :  { %v2308_v11 = vmul.f32 1.442695, %v2305_v9  ;;  %v2304_v12 = vsub.f32 %v2295_v6, %v2300_v10 }
 0x404   :  { %9225 = vpow2.f32 %v2308_v11  ;;  %v2306_v13 = vmul.f32 1.442695, %v2304_v12 }
 0x406   :  { %9227 = vpow2.f32 %v2306_v13 }
 0x411   :  { %v9226_v14 = vpop.eup %9225 }
 0x412   :  { %v2313_v16 = vsel %vm2297_vm5, %v9226_v14, 0.0 }
 0x413   :  { %v9228_v5 = vpop.eup %9227  ;;  %2314 = vadd.xlane.f32.xlu1 %v2313_v16 }
 0x414   :  { %v2310_v19 = vsel %vm2297_vm5, %v9228_v5, 0.0 }
 0x415   :  { %2311 = vadd.xlane.f32.xlu0 %v2310_v19 }
 0x49c   :  { %v2315_v24 = vpop.xlane.xlu1 %2314 }
 0x49d   :  { %9229 = vrcp.f32 %v2315_v24 }
 0x49e   :  { %v2312_v29 = vpop.xlane.xlu0 %2311 }
 0x49f   :  { %9231 = vrcp.f32 %v2312_v29 }
 0x4aa   :  { %v9230_v33 = vpop.eup %9229 }
 0x4ab   :  { %v2319_v35 = vmul.f32 %v9230_v33, %v9226_v14 }
 0x4ac   :  { %v9232_v36 = vpop.eup %9231 }
 0x4ad   :  { %v2317_v37 = vmul.f32 %v9232_v36, %v9228_v5  ;;  %v2324_v38 = vsel %vm2297_vm5, %v2319_v35, 0 }
 0x4ae   :  { %v2403_v15 = vand.u32 4294901760, %v2324_v38 }
 0x4af   :  { %v2321_v17 = vsel %vm2297_vm5, %v2317_v37, 0 }
 0x4b0   :  { %v2393_v28 = vand.u32 4294901760, %v2321_v17  ;;  %v2404_v32 = vsub.f32 %v2324_v38, %v2403_v15 }
 0x4b2   :  { %8584 = vmatprep.mubr.f32.mxu1 %v2393_v28  ;;  %v2394_v39 = vsub.f32 %v2321_v17, %v2393_v28  ;;  %v2405_v21 = vand.u32 4294901760, %v2404_v32 }
 0x4b3   :  { %8585 = vmatmul.mubr.f32.vlgmr.msra.gmra.mxu1 %v2403_v15 }
 0x4b4   :  { %8595 = vmatpush3.msra.mxu1 %v9810_v18  ;;  %v2395_v26 = vand.u32 4294901760, %v2394_v39  ;;  %v2406_v20 = vsub.f32 %v2404_v32, %v2405_v21 }
 0x4b5   :  { %8596 = vmatprep.subr.mxu1 %v9817_v31 }
 0x4b6   :  { %8597 = vmatpush3.msra.mxu1 %v9817_v31  ;;  %8598 = vmatprep.mubr.f32.mxu1 %v2395_v26  ;;  %v2396_v30 = vsub.f32 %v2394_v39, %v2395_v26  ;;  %v2407_v40 = vand.u32 4294901760, %v2406_v20  ;;  %v7842_v26 = vld [vmem:[#allocation9 + $0x3] ss:$0 sm:$0xff] }
 0x4b7   :  { %8608 = vmatprep.subr.mxu1 %v9810_v18  ;;  %8599 = vmatmul.mubr.f32.vlgmr.msra.gmra.mxu1 %v2405_v21 }
 0x4b8   :  { %8609 = vmatpush3.msra.mxu1 %v9810_v18  ;;  %8612 = vmatprep.mubr.f32.mxu1 %v2393_v28  ;;  %v2397_v34 = vand.u32 4294901760, %v2396_v30  ;;  %v2831_v18 = vld [vmem:[#allocation8 + $0x78] sm:$0xff] }
 0x4b9   :  { %8610 = vmatprep.subr.mxu1 %v9817_v31 }
 0x4ba   :  { %8611 = vmatpush3.msra.mxu1 %v9817_v31  ;;  %8577 = vmatprep.mubr.f32.mxu0 %v2397_v34  ;;  %v9860_v31 = vand.u32 4294901760, %v2831_v18 }
 0x4bb   :  { %8578 = vmatmul.mubr.f32.vlgmr.msra.gmra.mxu0 %v2407_v40  ;;  %8613 = vmatmul.mubr.f32.vlgmr.msra.gmra.mxu1 %v2403_v15 }
 0x4bc   :  { %8588 = vmatpush3.msra.mxu0 %v9815_v22  ;;  %8591 = vmatprep.mubr.f32.mxu0 %v2394_v39  ;;  %v2830_v22 = vld [vmem:[#allocation8 + $0x70] sm:$0xff]  ;;  %v9863_v41 = vsub.f32 %v2831_v18, %v9860_v31 }
 0x4bd   :  { %8589 = vmatprep.subr.mxu0 %v9823_v27  ;;  %v9865_v43 = vand.u32 4294901760, %v2830_v22 }
 0x4be   :  { %8590 = vmatpush3.msra.mxu0 %v9823_v27  ;;  %v2829_v27 = vld [vmem:[#allocation8 + $0x68] sm:$0xff] }
 0x4bf   :  { %8601 = vmatprep.subr.mxu0 %v9827_v23  ;;  %8592 = vmatmul.mubr.f32.vlgmr.msra.gmra.mxu0 %v2404_v32  ;;  %v9875_v44 = vand.u32 4294901760, %v2829_v27 }
 0x4c0   :  { %8602 = vmatpush3.msra.mxu0 %v9827_v23  ;;  %8605 = vmatprep.mubr.f32.mxu0 %v2393_v28  ;;  %v9870_v23 = vand.u32 4294901760, %v9863_v41 }
 0x4c1   :  { %8603 = vmatprep.subr.mxu0 %v9835_v25  ;;  %v9885_v47 = vsub.f32 %v2829_v27, %v9875_v44 }
 0x4c2   :  { %8604 = vmatpush3.msra.mxu0 %v9835_v25  ;;  %v9873_v25 = vsub.f32 %v2830_v22, %v9865_v43  ;;  %v2960_v46 = vsub.f32 %v9863_v41, %v9870_v23 }
 0x4c3   :  { %8606 = vmatmul.mubr.f32.vlgmr.msra.gmra.mxu0 %v2403_v15  ;;  %8615 = vmatprep.subr.mxu0 %v9860_v31  ;;  %v9894_v51 = vand.u32 4294901760, %v9885_v47 }
 0x4c4   :  { %8616 = vmatpush3.msra.mxu0 %v9860_v31  ;;  %v9882_v42 = vand.u32 4294901760, %v9873_v25  ;;  %v2961_v49 = vand.u32 4294901760, %v2960_v46 }
 0x4c5   :  { %8617 = vmatprep.subr.mxu0 %v9865_v43  ;;  %v2974_v54 = vsub.f32 %v9885_v47, %v9894_v51 }
 0x4c6   :  { %8618 = vmatpush3.msra.mxu0 %v9865_v43  ;;  %v2967_v50 = vsub.f32 %v9873_v25, %v9882_v42  ;;  %8626 = vmatprep.subr.mxu1 %v2961_v49 }
 0x4c7   :  { %8619 = vmatprep.subr.mxu0 %v9875_v44  ;;  %8627 = vmatpush3.msra.mxu1 %v2961_v49  ;;  %v2975_v56 = vand.u32 4294901760, %v2974_v54 }
 0x4c8   :  { %8620 = vmatpush3.msra.mxu0 %v9875_v44  ;;  %v2968_v53 = vand.u32 4294901760, %v2967_v50 }
 0x4c9   :  { %8621 = vmatprep.subr.mxu0 %v9887_v48 }
 0x4ca   :  { %8622 = vmatpush3.msra.mxu0 %v9887_v48  ;;  %8628 = vmatprep.subr.mxu1 %v2968_v53 }
 0x4cb   :  { %8637 = vmatprep.subr.mxu0 %v9863_v41  ;;  %8629 = vmatpush3.msra.mxu1 %v2968_v53  ;;  %v9257_v53 = vld [vmem:[#allocation2 + $0x8] sm:$0xff] }
 0x4cc   :  { %8630 = vmatprep.subr.mxu1 %v2975_v56 }
 0x4cd   :  { %8631 = vmatpush3.msra.mxu1 %v2975_v56  ;;  %v9258_v56 = vld [vmem:[#allocation2] sm:$0xff] }
 0x4ce   :  { %8632 = vmatprep.subr.mxu1 %v2982_v58 }
 0x4cf   :  { %8633 = vmatpush3.msra.mxu1 %v2982_v58 }
 0x4d0   :  { %8648 = vmatprep.subr.mxu1 %v9860_v31 }
 0x573   :  { %v8586_v59 = vpop.f32.mrf.mxu1 }
 0x575   :  { %v2490_v60 = vpop.f32.mrf.mxu1 }
 0x577   :  { %v8600_v61 = vpop.f32.mrf.mxu1 }
 0x579   :  { %v2654_v0 = vpop.f32.mrf.mxu1 }
 0x57b   :  { %v8579_v62 = vpop.f32.mrf.mxu0  ;;  %v8614_v9 = vpop.f32.mrf.mxu1 }
 0x57c   :  { %v2497_v1 = vadd.f32 %v8586_v59, %v8579_v62 }
 0x57d   :  { %v2399_v63 = vpop.f32.mrf.mxu0  ;;  %v2818_v5 = vpop.f32.mrf.mxu1 }
 0x57e   :  { %v2491_v3 = vadd.f32 %v2490_v60, %v2399_v63 }
 0x57f   :  { %v8593_v2 = vpop.f32.mrf.mxu0 }
 0x580   :  { %v2580_v4 = vadd.f32 %v8593_v2, %v2497_v1 }
 0x581   :  { %v2572_v6 = vpop.f32.mrf.mxu0 }
 0x582   :  { %v2573_v7 = vadd.f32 %v2572_v6, %v2491_v3  ;;  %v2663_v8 = vadd.f32 %v8600_v61, %v2580_v4 }
 0x583   :  { %v8607_v10 = vpop.f32.mrf.mxu0 }
 0x584   :  { %v2746_v11 = vadd.f32 %v8607_v10, %v2663_v8  ;;  %v2655_v12 = vadd.f32 %v2654_v0, %v2573_v7  ;;  %v3424_v7 = vld [vmem:[#allocation8 + $0x98] sm:$0xff]  ;;  %v3423_v8 = vld [vmem:[#allocation8 + $0x90] sm:$0xff] }
 0x585   :  { %v2739_v13 = vpop.f32.mrf.mxu0  ;;  %v9962_v10 = vand.u32 4294901760, %v3424_v7 }
 0x586   :  { %v2825_v14 = vadd.f32 %v8614_v9, %v2746_v11  ;;  %v2740_v16 = vadd.f32 %v2739_v13, %v2655_v12  ;;  %v3422_v9 = vld [vmem:[#allocation8 + $0x88] sm:$0xff]  ;;  %v9964_v11 = vand.u32 4294901760, %v3423_v8  ;;  %v3421_v13 = vld [vmem:[#allocation8 + $0x80] sm:$0xff] }
 0x587   :  { %v9966_v12 = vand.u32 4294901760, %v3422_v9 }
 0x588   :  { %v2841_v19 = vsel %vm113_vm0, %v2825_v14, 0  ;;  %v2819_v24 = vadd.f32 %v2818_v5, %v2740_v16  ;;  %v9968_v14 = vand.u32 4294901760, %v3421_v13  ;;  %v9971_v16 = vsub.f32 %v3424_v7, %v9962_v10 }
 0x589   :  { %v2922_v29 = vand.u32 4294901760, %v2841_v19  ;;  %v9974_v5 = vsub.f32 %v3423_v8, %v9964_v11  ;;  %v91_v8 = vld [vmem:[#allocation6] sm:$0xff] }
 0x58a   :  { %v2838_v33 = vsel %vm113_vm0, %v2819_v24, 0  ;;  %v9981_v24 = vsub.f32 %v3421_v13, %v9968_v14 }
 0x58b   :  { %v2923_v35 = vsub.f32 %v2841_v19, %v2922_v29  ;;  %v2912_v36 = vand.u32 4294901760, %v2838_v33  ;;  %v9977_v19 = vsub.f32 %v3422_v9, %v9966_v12 }
 0x58d   :  { %v2913_v37 = vsub.f32 %v2838_v33, %v2912_v36  ;;  %8634 = vmatprep.mubr.f32.mxu1 %v2912_v36  ;;  %v2924_v38 = vand.u32 4294901760, %v2923_v35  ;;  %v9988_v33 = vand.u32 4294901760, %v9974_v5 }
 0x58e   :  { %8635 = vmatmul.mubr.f32.vlgmr.msra.gmra.mxu1 %v2922_v29 }
 0x58f   :  { %8649 = vmatpush3.msra.mxu1 %v9860_v31  ;;  %v2914_v15 = vand.u32 4294901760, %v2913_v37  ;;  %v2925_v28 = vsub.f32 %v2923_v35, %v2924_v38 }
 0x590   :  { %8650 = vmatprep.subr.mxu1 %v9865_v43 }
 0x591   :  { %8651 = vmatpush3.msra.mxu1 %v9865_v43  ;;  %8656 = vmatprep.mubr.f32.mxu1 %v2914_v15  ;;  %v2915_v17 = vsub.f32 %v2913_v37, %v2914_v15  ;;  %v2926_v39 = vand.u32 4294901760, %v2925_v28 }
 0x592   :  { %8652 = vmatprep.subr.mxu1 %v9875_v44 }
 0x593   :  { %8653 = vmatpush3.msra.mxu1 %v9875_v44  ;;  %v2916_v32 = vand.u32 4294901760, %v2915_v17 }
 0x594   :  { %8654 = vmatprep.subr.mxu1 %v9887_v48 }
 0x595   :  { %8655 = vmatpush3.msra.mxu1 %v9887_v48  ;;  %8623 = vmatprep.mubr.f32.mxu0 %v2916_v32 }
 0x596   :  { %8657 = vmatmul.mubr.f32.vlgmr.msra.gmra.mxu1 %v2924_v38  ;;  %8670 = vmatprep.subr.mxu1 %v9860_v31  ;;  %v3560_v38 = vsub.f32 %v9974_v5, %v9988_v33 }
 0x597   :  { %8624 = vmatmul.mubr.f32.vlgmr.msra.gmra.mxu0 %v2926_v39  ;;  %8671 = vmatpush3.msra.mxu1 %v9860_v31 }
 0x598   :  { %8638 = vmatpush3.msra.mxu0 %v9863_v41  ;;  %8678 = vmatprep.mubr.f32.mxu1 %v2912_v36  ;;  %v3561_v28 = vand.u32 4294901760, %v3560_v38 }
 0x599   :  { %8639 = vmatprep.subr.mxu0 %v9873_v25  ;;  %8645 = vmatprep.mubr.f32.mxu0 %v2913_v37 }
 0x59a   :  { %8672 = vmatprep.subr.mxu1 %v9865_v43  ;;  %8640 = vmatpush3.msra.mxu0 %v9873_v25 }
 0x59b   :  { %8673 = vmatpush3.msra.mxu1 %v9865_v43  ;;  %8641 = vmatprep.subr.mxu0 %v9885_v47 }
 0x59c   :  { %8674 = vmatprep.subr.mxu1 %v9875_v44  ;;  %8642 = vmatpush3.msra.mxu0 %v9885_v47 }
 0x59d   :  { %8675 = vmatpush3.msra.mxu1 %v9875_v44  ;;  %8643 = vmatprep.subr.mxu0 %v9897_v52 }
 0x59e   :  { %8676 = vmatprep.subr.mxu1 %v9887_v48  ;;  %8644 = vmatpush3.msra.mxu0 %v9897_v52 }
 0x59f   :  { %8677 = vmatpush3.msra.mxu1 %v9887_v48  ;;  %8646 = vmatmul.mubr.f32.vlgmr.msra.gmra.mxu0 %v2923_v35  ;;  %v9991_v35 = vand.u32 4294901760, %v9977_v19 }
 0x5a0   :  { %8659 = vmatprep.subr.mxu0 %v9870_v23  ;;  %8679 = vmatmul.mubr.f32.vlgmr.msra.gmra.mxu1 %v2922_v29 }
 0x5a1   :  { %8660 = vmatpush3.msra.mxu0 %v9870_v23  ;;  %8667 = vmatprep.mubr.f32.mxu0 %v2912_v36  ;;  %v9995_v36 = vand.u32 4294901760, %v9981_v24  ;;  %v3567_v15 = vsub.f32 %v9977_v19, %v9991_v35 }
 0x5a2   :  { %8661 = vmatprep.subr.mxu0 %v9882_v42 }
 0x5a3   :  { %8662 = vmatpush3.msra.mxu0 %v9882_v42  ;;  %v3574_v32 = vsub.f32 %v9981_v24, %v9995_v36  ;;  %v3568_v39 = vand.u32 4294901760, %v3567_v15  ;;  %v3964_v15 = vld [vmem:[#allocation8 + $0xa0] sm:$0xff] }
 0x5a4   :  { %8663 = vmatprep.subr.mxu0 %v9894_v51 }
 0x5a5   :  { %8664 = vmatpush3.msra.mxu0 %v9894_v51 }
 0x5a6   :  { %8665 = vmatprep.subr.mxu0 %v9904_v55 }
 0x5a7   :  { %8666 = vmatpush3.msra.mxu0 %v9904_v55 }
 0x5a8   :  { %8668 = vmatmul.mubr.f32.vlgmr.msra.gmra.mxu0 %v2922_v29  ;;  %8681 = vmatprep.subr.mxu0 %v9962_v10  ;;  %v9985_v29 = vand.u32 4294901760, %v9971_v16 }
 0x5a9   :  { %8682 = vmatpush3.msra.mxu0 %v9962_v10 }
 0x5aa   :  { %8683 = vmatprep.subr.mxu0 %v9964_v11  ;;  %v3553_v37 = vsub.f32 %v9971_v16, %v9985_v29 }
 0x5ab   :  { %8684 = vmatpush3.msra.mxu0 %v9964_v11 }
 0x5ac   :  { %8685 = vmatprep.subr.mxu0 %v9966_v12  ;;  %v3554_v17 = vand.u32 4294901760, %v3553_v37 }
 0x5ad   :  { %8686 = vmatpush3.msra.mxu0 %v9966_v12 }
 0x5ae   :  { %8687 = vmatprep.subr.mxu0 %v9968_v14  ;;  %8692 = vmatprep.subr.mxu1 %v3554_v17 }
 0x5af   :  { %8688 = vmatpush3.msra.mxu0 %v9968_v14  ;;  %8693 = vmatpush3.msra.mxu1 %v3554_v17 }
 0x5b0   :  { %8703 = vmatprep.subr.mxu0 %v9971_v16  ;;  %8694 = vmatprep.subr.mxu1 %v3561_v28 }
 0x5b1   :  { %8695 = vmatpush3.msra.mxu1 %v3561_v28  ;;  %v3974_v28 = vsel %vm113_vm0, %v91_v8, 0 }
 0x5b2   :  { %8696 = vmatprep.subr.mxu1 %v3568_v39 }
 0x5b3   :  { %8697 = vmatpush3.msra.mxu1 %v3568_v39 }
 0x64e   :  { %v8636_v20 = vpop.f32.mrf.mxu1 }
 0x650   :  { %v3019_v31 = vpop.f32.mrf.mxu1 }
 0x656   :  { %v8658_v41 = vpop.f32.mrf.mxu1 }
 0x657   :  { %v8625_v21 = vpop.f32.mrf.mxu0 }
 0x658   :  { %v2929_v34 = vadd.f32 %v8625_v21, %v7842_v26  ;;  %v3189_v44 = vpop.f32.mrf.mxu1  ;;  %v3575_v21 = vand.u32 4294901760, %v3574_v32 }
 0x659   :  { %v2918_v30 = vpop.f32.mrf.mxu0 }
 0x65a   :  { %v2919_v40 = vadd.f32 %v7842_v26, %v2918_v30  ;;  %v3026_v22 = vadd.f32 %v8636_v20, %v2929_v34  ;;  %8698 = vmatprep.subr.mxu1 %v3575_v21 }
 0x65b   :  { %8699 = vmatpush3.msra.mxu1 %v3575_v21  ;;  %v10048_v21 = vand.u32 4294901760, %v3964_v15 }
 0x65c   :  { %v3020_v23 = vadd.f32 %v3019_v31, %v2919_v40  ;;  %8714 = vmatprep.subr.mxu1 %v9962_v10 }
 0x65f   :  { %v8647_v18 = vpop.f32.mrf.mxu0 }
 0x660   :  { %v3113_v27 = vadd.f32 %v8647_v18, %v3026_v22  ;;  %v8680_v46 = vpop.f32.mrf.mxu1 }
 0x661   :  { %v3105_v43 = vpop.f32.mrf.mxu0 }
 0x662   :  { %v3106_v25 = vadd.f32 %v3105_v43, %v3020_v23  ;;  %v3198_v45 = vadd.f32 %v8658_v41, %v3113_v27  ;;  %v3361_v52 = vpop.f32.mrf.mxu1 }
 0x664   :  { %v3190_v48 = vadd.f32 %v3189_v44, %v3106_v25 }
 0x668   :  { %v8669_v42 = vpop.f32.mrf.mxu0 }
 0x669   :  { %v3287_v47 = vadd.f32 %v8669_v42, %v3198_v45  ;;  %v3395_v42 = vstv %s7843_s17 }
 0x66a   :  { %v3280_v49 = vpop.f32.mrf.mxu0 }
 0x66b   :  { %v3368_v50 = vadd.f32 %v8680_v46, %v3287_v47  ;;  %v3281_v51 = vadd.f32 %v3280_v49, %v3190_v48  ;;  %v3418_v49 = vstv %s7844_s18 }
 0x66d   :  { %v9942_v54 = vadd.f32 %v9257_v53, %v3368_v50  ;;  %v3362_v55 = vadd.f32 %v3361_v52, %v3281_v51 }
 0x66f   :  { %v9944_v57 = vadd.f32 %v9258_v56, %v3362_v55  ;;  %v3378_v58 = vsel %vm113_vm0, %v9942_v54, 0.0 }
 0x670   :  { %3379 = vadd.xlane.f32.xlu1 %v3378_v58 }
 0x671   :  { %v3375_v59 = vsel %vm113_vm0, %v9944_v57, 0.0 }
 0x672   :  { %3376 = vadd.xlane.f32.xlu0 %v3375_v59 }
 0x6f9   :  { %v3380_v60 = vpop.xlane.xlu1 %3379 }
 0x6fa   :  { %v3382_v61 = vmul.f32 0.03125, %v3380_v60 }
 0x6fb   :  { %v3377_v62 = vpop.xlane.xlu0 %3376 }
 0x6fc   :  { %v9951_v63 = vsub.f32 %v9942_v54, %v3382_v61  ;;  %v3381_v1 = vmul.f32 0.03125, %v3377_v62 }
 0x6fe   :  { %v9954_v0 = vsub.f32 %v9944_v57, %v3381_v1  ;;  %v3386_v2 = vmul.f32 %v9951_v63, %v9951_v63  ;;  %v3397_v47 = vmul.f32 %v3395_v42, %v9951_v63  ;;  %v3967_v63 = vld [vmem:[#allocation8 + $0xb8] sm:$0xff] }
 0x700   :  { %v3390_v3 = vsel %vm113_vm0, %v3386_v2, 0.0  ;;  %v3385_v4 = vmul.f32 %v9954_v0, %v9954_v0  ;;  %v3396_v51 = vmul.f32 %v3395_v42, %v9954_v0  ;;  %v3966_v2 = vld [vmem:[#allocation8 + $0xb0] sm:$0xff] }
 0x701   :  { %3391 = vadd.xlane.f32.xlu1 %v3390_v3  ;;  %v10027_v3 = vand.u32 4294901760, %v3967_v63  ;;  %v10031_v7 = vand.u32 4294901760, %v3966_v2  ;;  %v4509_v42 = vld [vmem:[#allocation8 + $0xd0] sm:$0xff] }
 0x702   :  { %v3387_v6 = vsel %vm113_vm0, %v3385_v4, 0.0 }
 0x703   :  { %3388 = vadd.xlane.f32.xlu0 %v3387_v6  ;;  %v3965_v6 = vld [vmem:[#allocation8 + $0xa8] sm:$0xff]  ;;  %v10037_v37 = vsub.f32 %v3967_v63, %v10027_v3  ;;  %v10045_v32 = vsub.f32 %v3966_v2, %v10031_v7 }
 0x704   :  { %v10039_v38 = vand.u32 4294901760, %v3965_v6 }
 0x78a   :  { %v3392_v26 = vpop.xlane.xlu1 %3391 }
 0x78b   :  { %v3394_v20 = vmul.f32 0.032258064, %v3392_v26  ;;  %v10052_v26 = vand.u32 4294901760, %v10037_v37 }
 0x78c   :  { %v3389_v30 = vpop.xlane.xlu0 %3388 }
 0x78d   :  { %9233 = vrsqrt.f32 %v3394_v20  ;;  %v3393_v34 = vmul.f32 0.032258064, %v3389_v30  ;;  %vm3407_vm6 = vcmp.eq.f32.partialorder %v3394_v20, inf  ;;  %v3410_v31 = vand.u32 2147483648, %v3394_v20 }
 0x78e   :  { %vm3409_vm7 = vcmp.eq.f32.partialorder %v3394_v20, 0.0  ;;  %v10057_v30 = vand.u32 4294901760, %v3974_v28 }
 0x78f   :  { %9235 = vrsqrt.f32 %v3393_v34  ;;  %vm3400_vm8 = vcmp.eq.f32.partialorder %v3393_v34, inf  ;;  %v3403_v25 = vand.u32 2147483648, %v3393_v34  ;;  %vm3402_vm9 = vcmp.eq.f32.partialorder %v3393_v34, 0.0 }
 0x79a   :  { %v9234_v40 = vpop.eup %9233 }
 0x79b   :  { %v3406_v18 = vmul.f32 %v9234_v40, %v3394_v20  ;;  %v10063_v40 = vand.u32 4294901760, %v10045_v32 }
 0x79c   :  { %v9236_v22 = vpop.eup %9235 }
 0x79d   :  { %v3408_v41 = vsel %vm3407_vm6, %v3394_v20, %v3406_v18  ;;  %v3399_v27 = vmul.f32 %v9236_v22, %v3393_v34  ;;  %v10055_v20 = vsub.f32 %v3965_v6, %v10039_v38  ;;  %v10067_v18 = vsub.f32 %v3964_v15, %v10048_v21 }
 0x79e   :  { %v3411_v43 = vsel %vm3409_vm7, %v3410_v31, %v3408_v41  ;;  %v10078_v22 = vsub.f32 %v3974_v28, %v10057_v30 }
 0x79f   :  { %v3413_v23 = vadd.f32 1e-06, %v3411_v43  ;;  %v3401_v44 = vsel %vm3400_vm8, %v3393_v34, %v3399_v27  ;;  %v92_v34 = vld [vmem:[#allocation6 + $0x8] sm:$0xff]  ;;  %v10091_v43 = vand.u32 4294901760, %v10067_v18 }
 0x7a0   :  { %v3404_v45 = vsel %vm3402_vm9, %v3403_v25, %v3401_v44  ;;  %v3977_v31 = vsel %vm113_vm0, %v92_v34, 0  ;;  %v10098_v27 = vand.u32 4294901760, %v10078_v22 }
 0x7a1   :  { %9237 = vrcp.f32 %v3413_v23  ;;  %v3412_v46 = vadd.f32 1e-06, %v3404_v45  ;;  %v10086_v41 = vand.u32 4294901760, %v3977_v31 }
 0x7a2   :  { %v4051_v25 = vsub.f32 %v10078_v22, %v10098_v27 }
 0x7a3   :  { %9239 = vrcp.f32 %v3412_v46  ;;  %v10105_v23 = vsub.f32 %v3977_v31, %v10086_v41 }
 0x7a4   :  { %v4052_v45 = vand.u32 4294901760, %v4051_v25 }
 0x7ae   :  { %v9238_v48 = vpop.eup %9237 }
 0x7af   :  { %v3417_v50 = vmul.f32 %v9238_v48, %v3397_v47  ;;  %v10182_v48 = vand.u32 4294901760, %v4509_v42 }
 0x7b0   :  { %v9240_v52 = vpop.eup %9239 }
 0x7b1   :  { %v3420_v53 = vadd.f32 %v3418_v49, %v3417_v50  ;;  %v3415_v55 = vmul.f32 %v9240_v52, %v3396_v51  ;;  %v4638_v51 = vsub.f32 %v4509_v42, %v10182_v48 }
 0x7b3   :  { %v3434_v56 = vsel %vm113_vm0, %v3420_v53, 0  ;;  %v3419_v58 = vadd.f32 %v3418_v49, %v3415_v55  ;;  %v4508_v49 = vld [vmem:[#allocation8 + $0xc8] sm:$0xff]  ;;  %v4507_v53 = vld [vmem:[#allocation8 + $0xc0] sm:$0xff] }
 0x7b4   :  { %v10015_v59 = vand.u32 4294901760, %v3434_v56  ;;  %v10187_v52 = vand.u32 4294901760, %v4508_v49 }
 0x7b5   :  { %v3431_v60 = vsel %vm113_vm0, %v3419_v58, 0 }
 0x7b6   :  { %v10019_v61 = vsub.f32 %v3434_v56, %v10015_v59  ;;  %v10021_v62 = vand.u32 4294901760, %v3431_v60  ;;  %v4639_v56 = vand.u32 4294901760, %v4638_v51  ;;  %v4645_v58 = vsub.f32 %v4508_v49, %v10187_v52 }
 0x7b8   :  { %8700 = vmatprep.mubr.f32.mxu1 %v10021_v62  ;;  %v3506_v1 = vsub.f32 %v3431_v60, %v10021_v62  ;;  %v3517_v0 = vand.u32 4294901760, %v10019_v61 }
 0x7b9   :  { %8701 = vmatmul.mubr.f32.vlgmr.msra.gmra.mxu1 %v10015_v59 }
 0x7ba   :  { %8715 = vmatpush3.msra.mxu1 %v9962_v10  ;;  %v3507_v4 = vand.u32 4294901760, %v3506_v1  ;;  %v3518_v13 = vsub.f32 %v10019_v61, %v3517_v0 }
 0x7bb   :  { %8716 = vmatprep.subr.mxu1 %v9964_v11 }
 0x7bc   :  { %8717 = vmatpush3.msra.mxu1 %v9964_v11  ;;  %8722 = vmatprep.mubr.f32.mxu1 %v3507_v4  ;;  %v3508_v9 = vsub.f32 %v3506_v1, %v3507_v4  ;;  %v3519_v39 = vand.u32 4294901760, %v3518_v13  ;;  %v7845_v13 = vld [vmem:[#allocation9 + $0x4] ss:$0 sm:$0xff] }
 0x7bd   :  { %8718 = vmatprep.subr.mxu1 %v9966_v12 }
 0x7be   :  { %8719 = vmatpush3.msra.mxu1 %v9966_v12  ;;  %v3509_v17 = vand.u32 4294901760, %v3508_v9 }
 0x7bf   :  { %8720 = vmatprep.subr.mxu1 %v9968_v14 }
 0x7c0   :  { %8721 = vmatpush3.msra.mxu1 %v9968_v14  ;;  %8689 = vmatprep.mubr.f32.mxu0 %v3509_v17 }
 0x7c1   :  { %8723 = vmatmul.mubr.f32.vlgmr.msra.gmra.mxu1 %v3517_v0  ;;  %8736 = vmatprep.subr.mxu1 %v9962_v10 }
 0x7c2   :  { %8690 = vmatmul.mubr.f32.vlgmr.msra.gmra.mxu0 %v3519_v39  ;;  %8737 = vmatpush3.msra.mxu1 %v9962_v10  ;;  %v4096_v10 = vsub.f32 %v10037_v37, %v10052_v26 }
 0x7c3   :  { %8704 = vmatpush3.msra.mxu0 %v9971_v16  ;;  %8744 = vmatprep.mubr.f32.mxu1 %v10021_v62  ;;  %v10075_v16 = vand.u32 4294901760, %v10055_v20 }
 0x7c4   :  { %8705 = vmatprep.subr.mxu0 %v9974_v5  ;;  %8711 = vmatprep.mubr.f32.mxu0 %v3506_v1 }
 0x7c5   :  { %8738 = vmatprep.subr.mxu1 %v9964_v11  ;;  %8706 = vmatpush3.msra.mxu0 %v9974_v5  ;;  %v4103_v5 = vsub.f32 %v10045_v32, %v10063_v40 }
 0x7c6   :  { %8739 = vmatpush3.msra.mxu1 %v9964_v11  ;;  %8707 = vmatprep.subr.mxu0 %v9977_v19  ;;  %v4097_v11 = vand.u32 4294901760, %v4096_v10 }
 0x7c7   :  { %8740 = vmatprep.subr.mxu1 %v9966_v12  ;;  %8708 = vmatpush3.msra.mxu0 %v9977_v19  ;;  %v4110_v19 = vsub.f32 %v10055_v20, %v10075_v16 }
 0x7c8   :  { %8741 = vmatpush3.msra.mxu1 %v9966_v12  ;;  %8709 = vmatprep.subr.mxu0 %v9981_v24  ;;  %v4104_v12 = vand.u32 4294901760, %v4103_v5 }
 0x7c9   :  { %8742 = vmatprep.subr.mxu1 %v9968_v14  ;;  %8710 = vmatpush3.msra.mxu0 %v9981_v24  ;;  %v4117_v24 = vsub.f32 %v10067_v18, %v10091_v43 }
 0x7ca   :  { %8743 = vmatpush3.msra.mxu1 %v9968_v14  ;;  %8712 = vmatmul.mubr.f32.vlgmr.msra.gmra.mxu0 %v10019_v61  ;;  %v4111_v14 = vand.u32 4294901760, %v4110_v19  ;;  %v4640_v61 = vsub.f32 %v4638_v51, %v4639_v56 }
 0x7cb   :  { %8725 = vmatprep.subr.mxu0 %v9985_v29  ;;  %8745 = vmatmul.mubr.f32.vlgmr.msra.gmra.mxu1 %v10015_v59  ;;  %v4118_v44 = vand.u32 4294901760, %v4117_v24 }
 0x7cc   :  { %8726 = vmatpush3.msra.mxu0 %v9985_v29  ;;  %8733 = vmatprep.mubr.f32.mxu0 %v10021_v62  ;;  %v10117_v29 = vand.u32 4294901760, %v10105_v23  ;;  %v4646_v62 = vand.u32 4294901760, %v4645_v58  ;;  %v4641_v1 = vand.u32 4294901760, %v4640_v61 }
 0x7cd   :  { %8727 = vmatprep.subr.mxu0 %v9988_v33  ;;  %8758 = vmatprep.subr.mxu1 %v4097_v11 }
 0x7ce   :  { %8728 = vmatpush3.msra.mxu0 %v9988_v33  ;;  %8759 = vmatpush3.msra.mxu1 %v4097_v11  ;;  %v4061_v33 = vsub.f32 %v10105_v23, %v10117_v29  ;;  %v4647_v0 = vsub.f32 %v4645_v58, %v4646_v62 }
 0x7cf   :  { %8729 = vmatprep.subr.mxu0 %v9991_v35  ;;  %8760 = vmatprep.subr.mxu1 %v4104_v12 }
 0x7d0   :  { %8730 = vmatpush3.msra.mxu0 %v9991_v35  ;;  %8761 = vmatpush3.msra.mxu1 %v4104_v12  ;;  %v10130_v35 = vand.u32 4294901760, %v4061_v33 }
 0x7d1   :  { %8731 = vmatprep.subr.mxu0 %v9995_v36  ;;  %8762 = vmatprep.subr.mxu1 %v4111_v14 }
 0x7d2   :  { %8732 = vmatpush3.msra.mxu0 %v9995_v36  ;;  %8763 = vmatpush3.msra.mxu1 %v4111_v14  ;;  %v4510_v36 = vld [vmem:[#allocation8 + $0xd8] sm:$0xff] }
 0x7d3   :  { %8734 = vmatmul.mubr.f32.vlgmr.msra.gmra.mxu0 %v10015_v59  ;;  %8747 = vmatprep.subr.mxu0 %v10027_v3  ;;  %v10179_v46 = vand.u32 4294901760, %v4510_v36  ;;  %v4550_v59 = vand.u32 4294901760, %v4507_v53 }
 0x7d4   :  { %8748 = vmatpush3.msra.mxu0 %v10027_v3  ;;  %8764 = vmatprep.subr.mxu1 %v4118_v44 }
 0x7d5   :  { %8749 = vmatprep.subr.mxu0 %v10031_v7  ;;  %8755 = vmatprep.mubr.f32.mxu0 %v4052_v45  ;;  %v4631_v47 = vsub.f32 %v4510_v36, %v10179_v46  ;;  %v4652_v63 = vsub.f32 %v4507_v53, %v4550_v59 }
 0x7d6   :  { %8750 = vmatpush3.msra.mxu0 %v10031_v7  ;;  %8765 = vmatpush3.msra.mxu1 %v4118_v44 }
 0x7d7   :  { %8751 = vmatprep.subr.mxu0 %v10039_v38  ;;  %8766 = vmatprep.mubr.f32.mxu1 %v10057_v30  ;;  %v4632_v50 = vand.u32 4294901760, %v4631_v47  ;;  %v4653_v2 = vand.u32 4294901760, %v4652_v63 }
 0x7d8   :  { %8752 = vmatpush3.msra.mxu0 %v10039_v38  ;;  %8780 = vmatprep.subr.mxu1 %v10027_v3 }
 0x7d9   :  { %8753 = vmatprep.subr.mxu0 %v10048_v21  ;;  %8767 = vmatmul.mubr.f32.vlgmr.msra.gmra.mxu1 %v10086_v41  ;;  %v4633_v55 = vsub.f32 %v4631_v47, %v4632_v50  ;;  %v4654_v4 = vsub.f32 %v4652_v63, %v4653_v2 }
 0x7da   :  { %8754 = vmatpush3.msra.mxu0 %v10048_v21  ;;  %8781 = vmatpush3.msra.mxu1 %v10027_v3 }
 0x7db   :  { %8756 = vmatmul.mubr.f32.vlgmr.msra.gmra.mxu0 %v10130_v35  ;;  %8769 = vmatprep.subr.mxu0 %v10037_v37  ;;  %v4634_v60 = vand.u32 4294901760, %v4633_v55  ;;  %v4655_v6 = vand.u32 4294901760, %v4654_v4 }
 0x7dc   :  { %8770 = vmatpush3.msra.mxu0 %v10037_v37  ;;  %8782 = vmatprep.subr.mxu1 %v10031_v7 }
 0x7dd   :  { %8771 = vmatprep.subr.mxu0 %v10045_v32  ;;  %8783 = vmatpush3.msra.mxu1 %v10031_v7 }
 0x7de   :  { %8772 = vmatpush3.msra.mxu0 %v10045_v32  ;;  %8784 = vmatprep.subr.mxu1 %v10039_v38 }
 0x7df   :  { %8773 = vmatprep.subr.mxu0 %v10055_v20  ;;  %8785 = vmatpush3.msra.mxu1 %v10039_v38 }
 0x7e0   :  { %8774 = vmatpush3.msra.mxu0 %v10055_v20  ;;  %8786 = vmatprep.subr.mxu1 %v10048_v21 }
 0x7e1   :  { %8775 = vmatprep.subr.mxu0 %v10067_v18  ;;  %8777 = vmatprep.mubr.f32.mxu0 %v10078_v22 }
 0x7e2   :  { %8776 = vmatpush3.msra.mxu0 %v10067_v18  ;;  %8787 = vmatpush3.msra.mxu1 %v10048_v21 }
 0x7e3   :  { %8778 = vmatmul.mubr.f32.vlgmr.msra.gmra.mxu0 %v10105_v23  ;;  %8788 = vmatprep.mubr.f32.mxu1 %v10098_v27 }
 0x7e4   :  { %8791 = vmatprep.subr.mxu0 %v10052_v26  ;;  %8802 = vmatprep.subr.mxu1 %v10027_v3 }
 0x7e5   :  { %8789 = vmatmul.mubr.f32.vlgmr.msra.gmra.mxu1 %v10117_v29  ;;  %8792 = vmatpush3.msra.mxu0 %v10052_v26 }
 0x7e6   :  { %8803 = vmatpush3.msra.mxu1 %v10027_v3  ;;  %8793 = vmatprep.subr.mxu0 %v10063_v40  ;;  %v4648_v3 = vand.u32 4294901760, %v4647_v0 }
 0x7e7   :  { %8804 = vmatprep.subr.mxu1 %v10031_v7  ;;  %8794 = vmatpush3.msra.mxu0 %v10063_v40 }
 0x7e8   :  { %8805 = vmatpush3.msra.mxu1 %v10031_v7  ;;  %8795 = vmatprep.subr.mxu0 %v10075_v16 }
 0x7e9   :  { %8806 = vmatprep.subr.mxu1 %v10039_v38  ;;  %8796 = vmatpush3.msra.mxu0 %v10075_v16 }
 0x7ea   :  { %8807 = vmatpush3.msra.mxu1 %v10039_v38  ;;  %8797 = vmatprep.subr.mxu0 %v10091_v43 }
 0x7eb   :  { %8808 = vmatprep.subr.mxu1 %v10048_v21  ;;  %8798 = vmatpush3.msra.mxu0 %v10091_v43 }
 0x7ec   :  { %8799 = vmatprep.mubr.f32.mxu0 %v10057_v30  ;;  %8809 = vmatpush3.msra.mxu1 %v10048_v21 }
 0x7ed   :  { %8810 = vmatprep.mubr.f32.mxu1 %v10057_v30  ;;  %8800 = vmatmul.mubr.f32.vlgmr.msra.gmra.mxu0 %v10086_v41 }
 0x7ee   :  { %8811 = vmatmul.mubr.f32.vlgmr.msra.gmra.mxu1 %v10086_v41  ;;  %8821 = vmatprep.mubr.f32.mxu0 %v4052_v45 }
 0x7ef   :  { %8832 = vmatprep.mubr.f32.mxu1 %v10057_v30  ;;  %8813 = vmatprep.subr.mxu0 %v10179_v46 }
 0x7f0   :  { %8814 = vmatpush3.msra.mxu0 %v10179_v46  ;;  %8824 = vmatprep.subr.mxu1 %v4634_v60 }
 0x7f1   :  { %8815 = vmatprep.subr.mxu0 %v10182_v48  ;;  %8825 = vmatpush3.msra.mxu1 %v4634_v60 }
 0x7f2   :  { %8816 = vmatpush3.msra.mxu0 %v10182_v48  ;;  %8826 = vmatprep.subr.mxu1 %v4641_v1 }
 0x7f3   :  { %8817 = vmatprep.subr.mxu0 %v10187_v52  ;;  %8827 = vmatpush3.msra.mxu1 %v4641_v1 }
 0x7f4   :  { %8818 = vmatpush3.msra.mxu0 %v10187_v52  ;;  %8828 = vmatprep.subr.mxu1 %v4648_v3 }
 0x7f5   :  { %8819 = vmatprep.subr.mxu0 %v4550_v59  ;;  %8829 = vmatpush3.msra.mxu1 %v4648_v3 }
 0x7f6   :  { %8820 = vmatpush3.msra.mxu0 %v4550_v59  ;;  %8830 = vmatprep.subr.mxu1 %v4655_v6 }
 0x7f7   :  { %8835 = vmatprep.subr.mxu0 %v4631_v47  ;;  %8822 = vmatmul.mubr.f32.vlgmr.msra.gmra.mxu0 %v10130_v35 }
 0x7f8   :  { %8836 = vmatpush3.msra.mxu0 %v4631_v47  ;;  %8831 = vmatpush3.msra.mxu1 %v4655_v6 }
 0x7f9   :  { %8837 = vmatprep.subr.mxu0 %v4638_v51  ;;  %8846 = vmatprep.subr.mxu1 %v10179_v46 }
 0x7fa   :  { %8838 = vmatpush3.msra.mxu0 %v4638_v51  ;;  %8833 = vmatmul.mubr.f32.vlgmr.msra.gmra.mxu1 %v10086_v41 }
 0x7fb   :  { %8839 = vmatprep.subr.mxu0 %v4645_v58  ;;  %8847 = vmatpush3.msra.mxu1 %v10179_v46 }
 0x7fc   :  { %8840 = vmatpush3.msra.mxu0 %v4645_v58  ;;  %8854 = vmatprep.mubr.f32.mxu1 %v10098_v27  ;;  %v7846_v27 = vld [vmem:[#allocation9 + $0x5] ss:$0 sm:$0xff] }
 0x7fd   :  { %8841 = vmatprep.subr.mxu0 %v4652_v63  ;;  %8848 = vmatprep.subr.mxu1 %v10182_v48 }
 0x7fe   :  { %8842 = vmatpush3.msra.mxu0 %v4652_v63  ;;  %8849 = vmatpush3.msra.mxu1 %v10182_v48 }
 0x7ff   :  { %8843 = vmatprep.mubr.f32.mxu0 %v10078_v22  ;;  %8850 = vmatprep.subr.mxu1 %v10187_v52 }
 0x800   :  { %8857 = vmatprep.subr.mxu0 %v4632_v50  ;;  %8851 = vmatpush3.msra.mxu1 %v10187_v52 }
 0x801   :  { %8844 = vmatmul.mubr.f32.vlgmr.msra.gmra.mxu0 %v10105_v23  ;;  %8852 = vmatprep.subr.mxu1 %v4550_v59 }
 0x802   :  { %8858 = vmatpush3.msra.mxu0 %v4632_v50  ;;  %8853 = vmatpush3.msra.mxu1 %v4550_v59 }
 0x803   :  { %8859 = vmatprep.subr.mxu0 %v4639_v56  ;;  %8868 = vmatprep.subr.mxu1 %v10179_v46 }
 0x804   :  { %8855 = vmatmul.mubr.f32.vlgmr.msra.gmra.mxu1 %v10117_v29  ;;  %8860 = vmatpush3.msra.mxu0 %v4639_v56 }
 0x805   :  { %8869 = vmatpush3.msra.mxu1 %v10179_v46  ;;  %8876 = vmatprep.mubr.f32.mxu1 %v10057_v30 }
 0x806   :  { %8870 = vmatprep.subr.mxu1 %v10182_v48  ;;  %8861 = vmatprep.subr.mxu0 %v4646_v62 }
 0x807   :  { %8871 = vmatpush3.msra.mxu1 %v10182_v48  ;;  %8862 = vmatpush3.msra.mxu0 %v4646_v62 }
 0x808   :  { %8872 = vmatprep.subr.mxu1 %v10187_v52  ;;  %8863 = vmatprep.subr.mxu0 %v4653_v2 }
 0x809   :  { %8873 = vmatpush3.msra.mxu1 %v10187_v52  ;;  %8864 = vmatpush3.msra.mxu0 %v4653_v2 }
 0x80a   :  { %8874 = vmatprep.subr.mxu1 %v4550_v59  ;;  %8865 = vmatprep.mubr.f32.mxu0 %v10057_v30 }
 0x80b   :  { %8875 = vmatpush3.msra.mxu1 %v4550_v59  ;;  %8866 = vmatmul.mubr.f32.vlgmr.msra.gmra.mxu0 %v10086_v41 }
 0x80c   :  { %8877 = vmatmul.mubr.f32.vlgmr.msra.gmra.mxu1 %v10086_v41 }
 0x879   :  { %v8702_v8 = vpop.f32.mrf.mxu1 }
 0x87b   :  { %v3612_v15 = vpop.f32.mrf.mxu1 }
 0x881   :  { %v8724_v17 = vpop.f32.mrf.mxu1 }
 0x882   :  { %v8691_v7 = vpop.f32.mrf.mxu0 }
 0x883   :  { %v3782_v21 = vpop.f32.mrf.mxu1  ;;  %v3522_v34 = vadd.f32 %v8691_v7, %v7845_v13 }
 0x884   :  { %v3511_v9 = vpop.f32.mrf.mxu0 }
 0x885   :  { %v3512_v37 = vadd.f32 %v7845_v13, %v3511_v9  ;;  %v3619_v10 = vadd.f32 %v8702_v8, %v3522_v34 }
 0x887   :  { %v3613_v32 = vadd.f32 %v3612_v15, %v3512_v37 }
 0x88a   :  { %v8713_v38 = vpop.f32.mrf.mxu0 }
 0x88b   :  { %v8746_v26 = vpop.f32.mrf.mxu1  ;;  %v3706_v22 = vadd.f32 %v8713_v38, %v3619_v10 }
 0x88c   :  { %v3698_v28 = vpop.f32.mrf.mxu0 }
 0x88d   :  { %v3699_v39 = vadd.f32 %v3698_v28, %v3613_v32  ;;  %v3954_v31 = vpop.f32.mrf.mxu1  ;;  %v3791_v19 = vadd.f32 %v8724_v17, %v3706_v22 }
 0x88f   :  { %v3783_v30 = vadd.f32 %v3782_v21, %v3699_v39 }
 0x893   :  { %v8735_v20 = vpop.f32.mrf.mxu0 }
 0x894   :  { %v3880_v23 = vadd.f32 %v8735_v20, %v3791_v19  ;;  %v7847_v20 = vld [vmem:[#allocation9 + $0x6] ss:$0 sm:$0xff] }
 0x895   :  { %v3873_v40 = vpop.f32.mrf.mxu0 }
 0x896   :  { %v3874_v18 = vadd.f32 %v3873_v40, %v3783_v30  ;;  %v3961_v33 = vadd.f32 %v8746_v26, %v3880_v23 }
 0x898   :  { %v3955_v16 = vadd.f32 %v3954_v31, %v3874_v18  ;;  %v5048_v48 = vsel %vm113_vm0, %v3961_v33, 0 }
 0x899   :  { %v8768_v24 = vpop.f32.mrf.mxu1  ;;  %v10228_v52 = vand.u32 4294901760, %v5048_v48 }
 0x89a   :  { %v5045_v5 = vsel %vm113_vm0, %v3955_v16, 0 }
 0x89b   :  { %v10217_v41 = vand.u32 4294901760, %v5045_v5  ;;  %v8757_v11 = vpop.f32.mrf.mxu0  ;;  %v4155_v36 = vpop.f32.mrf.mxu1  ;;  %v5134_v61 = vsub.f32 %v5048_v48, %v10228_v52 }
 0x89c   :  { %v4065_v29 = vadd.f32 %v8757_v11, %v7846_v27 }
 0x89d   :  { %v10220_v43 = vsub.f32 %v5045_v5, %v10217_v41  ;;  %8890 = vmatprep.mubr.f32.mxu1 %v10217_v41  ;;  %v4054_v14 = vpop.f32.mrf.mxu0  ;;  %v5135_v6 = vand.u32 4294901760, %v5134_v61 }
 0x89e   :  { %v4055_v35 = vadd.f32 %v7846_v27, %v4054_v14  ;;  %v4162_v46 = vadd.f32 %v8768_v24, %v4065_v29 }
 0x89f   :  { %v5125_v12 = vand.u32 4294901760, %v10220_v43  ;;  %v5136_v37 = vsub.f32 %v5134_v61, %v5135_v6 }
 0x8a0   :  { %v4156_v49 = vadd.f32 %v4155_v36, %v4055_v35 }
 0x8a1   :  { %v5126_v25 = vsub.f32 %v10220_v43, %v5125_v12  ;;  %v5137_v28 = vand.u32 4294901760, %v5136_v37 }
 0x8a3   :  { %v8779_v44 = vpop.f32.mrf.mxu0  ;;  %v5127_v45 = vand.u32 4294901760, %v5126_v25 }
 0x8a4   :  { %v4249_v50 = vadd.f32 %v8779_v44, %v4162_v46 }
 0x8a5   :  { %8883 = vmatprep.mubr.f32.mxu0 %v5127_v45  ;;  %v8790_v42 = vpop.f32.mrf.mxu1  ;;  %v4241_v47 = vpop.f32.mrf.mxu0 }
 0x8a6   :  { %v4242_v51 = vadd.f32 %v4241_v47, %v4156_v49  ;;  %v4334_v55 = vadd.f32 %v8790_v42, %v4249_v50 }
 0x8a7   :  { %v4325_v53 = vpop.f32.mrf.mxu1 }
 0x8a8   :  { %v4326_v58 = vadd.f32 %v4325_v53, %v4242_v51 }
 0x8ad   :  { %v8801_v56 = vpop.f32.mrf.mxu0 }
 0x8ae   :  { %v4423_v59 = vadd.f32 %v8801_v56, %v4334_v55  ;;  %v8812_v60 = vpop.f32.mrf.mxu1 }
 0x8af   :  { %v4416_v62 = vpop.f32.mrf.mxu0 }
 0x8b0   :  { %v4504_v63 = vadd.f32 %v8812_v60, %v4423_v59  ;;  %v4417_v1 = vadd.f32 %v4416_v62, %v4326_v58  ;;  %v4497_v0 = vpop.f32.mrf.mxu1 }
 0x8b2   :  { %v5054_v2 = vsel %vm113_vm0, %v4504_v63, 0  ;;  %v4498_v3 = vadd.f32 %v4497_v0, %v4417_v1 }
 0x8b3   :  { %v5085_v4 = vand.u32 4294901760, %v5054_v2 }
 0x8b4   :  { %v5051_v7 = vsel %vm113_vm0, %v4498_v3, 0 }
 0x8b5   :  { %v5173_v8 = vsub.f32 %v5054_v2, %v5085_v4  ;;  %v5088_v9 = vand.u32 4294901760, %v5051_v7  ;;  %8879 = vmatprep.subr.mxu0 %v5085_v4 }
 0x8b6   :  { %8880 = vmatpush3.xpose.msra.mxu0 %v5085_v4 }
 0x8b7   :  { %v5180_v13 = vsub.f32 %v5051_v7, %v5088_v9  ;;  %8881 = vmatprep.subr.mxu0 %v5088_v9  ;;  %v5174_v38 = vand.u32 4294901760, %v5173_v8  ;;  %v8823_v26 = vpop.f32.mrf.mxu0 }
 0x8b8   :  { %v4602_v40 = vadd.f32 %v8823_v26, %v7847_v20 }
 0x8b9   :  { %v5175_v15 = vsub.f32 %v5173_v8, %v5174_v38  ;;  %v5181_v17 = vand.u32 4294901760, %v5180_v13  ;;  %v4591_v34 = vpop.f32.mrf.mxu0 }
 0x8ba   :  { %8882 = vmatpush3.xpose.msra.mxu0 %v5088_v9  ;;  %v8834_v30 = vpop.f32.mrf.mxu1  ;;  %v4592_v18 = vadd.f32 %v7847_v20, %v4591_v34 }
 0x8bb   :  { %8893 = vmatprep.subr.mxu0 %v5173_v8  ;;  %v5176_v32 = vand.u32 4294901760, %v5175_v15  ;;  %v5182_v39 = vsub.f32 %v5180_v13, %v5181_v17  ;;  %v4699_v10 = vadd.f32 %v8834_v30, %v4602_v40  ;;  %v110_v15 = vld [vmem:[#allocation9 + $0x28] sm:$0xff] }
 0x8bc   :  { %v4692_v31 = vpop.f32.mrf.mxu1 }
 0x8bd   :  { %8884 = vmatmul.mubr.f32.vlgmr.msra.gmra.mxu0 %v5137_v28  ;;  %8886 = vmatprep.subr.mxu1 %v5176_v32  ;;  %v5183_v21 = vand.u32 4294901760, %v5182_v39  ;;  %v4693_v22 = vadd.f32 %v4692_v31, %v4592_v18 }
 0x8be   :  { %8887 = vmatpush3.xpose.msra.mxu1 %v5176_v32  ;;  %8894 = vmatpush3.xpose.msra.mxu0 %v5173_v8  ;;  %v109_v32 = vld [vmem:[#allocation9 + $0x20] sm:$0xff] }
 0x8bf   :  { %8897 = vmatprep.mubr.f32.mxu0 %v10220_v43  ;;  %8888 = vmatprep.subr.mxu1 %v5183_v21 }
 0x8c0   :  { %8895 = vmatprep.subr.mxu0 %v5180_v13 }
 0x8c1   :  { %v8845_v16 = vpop.f32.mrf.mxu0 }
 0x8c2   :  { %8889 = vmatpush3.xpose.msra.mxu1 %v5183_v21  ;;  %8896 = vmatpush3.xpose.msra.mxu0 %v5180_v13  ;;  %v4786_v11 = vadd.f32 %v8845_v16, %v4699_v10 }
 0x8c3   :  { %8900 = vmatprep.subr.mxu1 %v5085_v4  ;;  %8907 = vmatprep.subr.mxu0 %v5174_v38  ;;  %v4778_v5 = vpop.f32.mrf.mxu0 }
 0x8c4   :  { %v8856_v43 = vpop.f32.mrf.mxu1  ;;  %v4779_v19 = vadd.f32 %v4778_v5, %v4693_v22 }
 0x8c5   :  { %8891 = vmatmul.mubr.f32.vlgmr.msra.gmra.mxu1 %v10228_v52  ;;  %8898 = vmatmul.mubr.f32.vlgmr.msra.gmra.mxu0 %v5134_v61 }
 0x8c6   :  { %8901 = vmatpush3.xpose.msra.mxu1 %v5085_v4  ;;  %8904 = vmatprep.mubr.f32.mxu1 %v5125_v12  ;;  %v4862_v27 = vpop.f32.mrf.mxu1  ;;  %v4871_v12 = vadd.f32 %v8856_v43, %v4786_v11 }
 0x8c7   :  { %8908 = vmatpush3.xpose.msra.mxu0 %v5174_v38  ;;  %8911 = vmatprep.mubr.f32.mxu0 %v10217_v41  ;;  %v4863_v23 = vadd.f32 %v4862_v27, %v4779_v19 }
 0x8c8   :  { %8902 = vmatprep.subr.mxu1 %v5088_v9  ;;  %8909 = vmatprep.subr.mxu0 %v5181_v17 }
 0x8ca   :  { %8903 = vmatpush3.xpose.msra.mxu1 %v5088_v9 }
 0x8cb   :  { %8910 = vmatpush3.xpose.msra.mxu0 %v5181_v17  ;;  %8914 = vmatprep.subr.mxu1 %v5085_v4 }
 0x8cc   :  { %v8878_v24 = vpop.f32.mrf.mxu1 }
 0x8cd   :  { %8905 = vmatmul.mubr.f32.vlgmr.msra.gmra.mxu1 %v5135_v6 }
 0x8ce   :  { %8912 = vmatmul.mubr.f32.vlgmr.msra.gmra.mxu0 %v10228_v52  ;;  %8915 = vmatpush3.xpose.msra.mxu1 %v5085_v4  ;;  %v5034_v29 = vpop.f32.mrf.mxu1 }
 0x8cf   :  { %8918 = vmatprep.mubr.f32.mxu1 %v10217_v41  ;;  %8916 = vmatprep.subr.mxu1 %v5088_v9  ;;  %v8867_v41 = vpop.f32.mrf.mxu0 }
 0x8d0   :  { %v4960_v14 = vadd.f32 %v8867_v41, %v4871_v12 }
 0x8d1   :  { %v4953_v25 = vpop.f32.mrf.mxu0 }
 0x8d2   :  { %8917 = vmatpush3.xpose.msra.mxu1 %v5088_v9  ;;  %v4954_v44 = vadd.f32 %v4953_v25, %v4863_v23  ;;  %v5041_v45 = vadd.f32 %v8878_v24, %v4960_v14 }
 0x8d4   :  { %v10241_v33 = vand.u32 4294901760, %v5041_v45  ;;  %v5035_v35 = vadd.f32 %v5034_v29, %v4954_v44 }
 0x8d5   :  { %8919 = vmatmul.mubr.f32.vlgmr.msra.gmra.mxu1 %v10228_v52 }
 0x8d6   :  { %v10244_v36 = vsub.f32 %v5041_v45, %v10241_v33  ;;  %v10246_v46 = vand.u32 4294901760, %v5035_v35  ;;  %8921 = vmatprep.subr.mxu0 %v10241_v33 }
 0x8d7   :  { %8922 = vmatpush3.msra.mxu0 %v10241_v33 }
 0x8d8   :  { %v10251_v42 = vsub.f32 %v5035_v35, %v10246_v46  ;;  %v10254_v47 = vand.u32 4294901760, %v10244_v36  ;;  %8923 = vmatprep.subr.mxu0 %v10246_v46 }
 0x8d9   :  { %8924 = vmatpush3.msra.mxu0 %v10246_v46 }
 0x8da   :  { %v5709_v48 = vsub.f32 %v10244_v36, %v10254_v47  ;;  %v10261_v49 = vand.u32 4294901760, %v10251_v42  ;;  %8935 = vmatprep.subr.mxu0 %v10244_v36 }
 0x8dc   :  { %v5710_v50 = vand.u32 4294901760, %v5709_v48  ;;  %v5716_v51 = vsub.f32 %v10251_v42, %v10261_v49 }
 0x8de   :  { %8928 = vmatprep.subr.mxu1 %v5710_v50  ;;  %v5717_v52 = vand.u32 4294901760, %v5716_v51 }
 0x8df   :  { %8929 = vmatpush3.msra.mxu1 %v5710_v50 }
 0x8e0   :  { %8930 = vmatprep.subr.mxu1 %v5717_v52 }
 0x8e1   :  { %8931 = vmatpush3.msra.mxu1 %v5717_v52 }
 0x8e2   :  { %8942 = vmatprep.subr.mxu1 %v10241_v33 }
 0x97d   :  { %v8885_v53 = vpop.f32.mrf.mxu0 }
 0x97f   :  { %v5129_v56 = vpop.f32.mrf.mxu0 }
 0x985   :  { %v8892_v55 = vpop.f32.mrf.mxu1  ;;  %v8899_v60 = vpop.f32.mrf.mxu0 }
 0x986   :  { %v5227_v59 = vadd.f32 %v8892_v55, %v8885_v53 }
 0x987   :  { %v5220_v58 = vpop.f32.mrf.mxu1  ;;  %v5302_v1 = vpop.f32.mrf.mxu0 }
 0x988   :  { %v5221_v61 = vadd.f32 %v5220_v58, %v5129_v56  ;;  %v5310_v63 = vadd.f32 %v8899_v60, %v5227_v59  ;;  %v6092_v60 = vld [vmem:[#allocation8 + $0xe0] sm:$0xff] }
 0x98a   :  { %v5303_v2 = vadd.f32 %v5302_v1, %v5221_v61  ;;  %v10314_v1 = vand.u32 4294901760, %v6092_v60 }
 0x98d   :  { %v8906_v62 = vpop.f32.mrf.mxu1 }
 0x98e   :  { %v5393_v3 = vadd.f32 %v8906_v62, %v5310_v63  ;;  %v8913_v4 = vpop.f32.mrf.mxu0 }
 0x98f   :  { %v5384_v0 = vpop.f32.mrf.mxu1 }
 0x990   :  { %v5385_v6 = vadd.f32 %v5384_v0, %v5303_v2  ;;  %v5476_v7 = vadd.f32 %v8913_v4, %v5393_v3  ;;  %v5469_v8 = vpop.f32.mrf.mxu0  ;;  %v10324_v4 = vsub.f32 %v6092_v60, %v10314_v1 }
 0x992   :  { %v5470_v13 = vadd.f32 %v5469_v8, %v5385_v6  ;;  %v10331_v8 = vand.u32 4294901760, %v10324_v4 }
 0x995   :  { %v8920_v9 = vpop.f32.mrf.mxu1 }
 0x996   :  { %v5555_v37 = vadd.f32 %v8920_v9, %v5476_v7 }
 0x997   :  { %v5548_v38 = vpop.f32.mrf.mxu1 }
 0x998   :  { %v5559_v17 = vmul.f32 0.17677669, %v5555_v37  ;;  %v5549_v28 = vadd.f32 %v5548_v38, %v5470_v13  ;;  %v6245_v13 = vsub.f32 %v10324_v4, %v10331_v8 }
 0x99a   :  { %v5558_v39 = vmul.f32 0.17677669, %v5549_v28  ;;  %v5561_v21 = vadd.f32 %v5559_v17, %v110_v15  ;;  %v6246_v37 = vand.u32 4294901760, %v6245_v13 }
 0x99c   :  { %v5565_v26 = vsel %vm2297_vm5, %v5561_v21, -inf  ;;  %v5560_v20 = vadd.f32 %v5558_v39, %v109_v32 }
 0x99d   :  { %5566 = vmax.xlane.f32.xlu1 %v5565_v26 }
 0x99e   :  { %v5562_v34 = vsel %vm2297_vm5, %v5560_v20, -inf }
 0x99f   :  { %5563 = vmax.xlane.f32.xlu0 %v5562_v34 }
 0xa26   :  { %v5567_v30 = vpop.xlane.xlu1 %5566 }
 0xa27   :  { %v5569_v40 = vsub.f32 %v5561_v21, %v5567_v30 }
 0xa28   :  { %v5564_v18 = vpop.xlane.xlu0 %5563 }
 0xa29   :  { %v5572_v31 = vmul.f32 1.442695, %v5569_v40  ;;  %v5568_v10 = vsub.f32 %v5560_v20, %v5564_v18 }
 0xa2b   :  { %9241 = vpow2.f32 %v5572_v31  ;;  %v5570_v16 = vmul.f32 1.442695, %v5568_v10 }
 0xa2d   :  { %9243 = vpow2.f32 %v5570_v16 }
 0xa38   :  { %v9242_v22 = vpop.eup %9241 }
 0xa39   :  { %v5577_v5 = vsel %vm2297_vm5, %v9242_v22, 0.0 }
 0xa3a   :  { %v9244_v43 = vpop.eup %9243  ;;  %5578 = vadd.xlane.f32.xlu1 %v5577_v5 }
 0xa3b   :  { %v5574_v11 = vsel %vm2297_vm5, %v9244_v43, 0.0 }
 0xa3c   :  { %5575 = vadd.xlane.f32.xlu0 %v5574_v11 }
 0xac3   :  { %v5579_v19 = vpop.xlane.xlu1 %5578 }
 0xac4   :  { %9245 = vrcp.f32 %v5579_v19 }
 0xac5   :  { %v5576_v27 = vpop.xlane.xlu0 %5575 }
 0xac6   :  { %9247 = vrcp.f32 %v5576_v27 }
 0xad1   :  { %v9246_v12 = vpop.eup %9245 }
 0xad2   :  { %v5583_v23 = vmul.f32 %v9246_v12, %v9242_v22 }
 0xad3   :  { %v9248_v41 = vpop.eup %9247 }
 0xad4   :  { %v5581_v24 = vmul.f32 %v9248_v41, %v9244_v43  ;;  %v5588_v14 = vsel %vm2297_vm5, %v5583_v23, 0 }
 0xad5   :  { %v5667_v25 = vand.u32 4294901760, %v5588_v14 }
 0xad6   :  { %v5585_v29 = vsel %vm2297_vm5, %v5581_v24, 0 }
 0xad7   :  { %v5657_v44 = vand.u32 4294901760, %v5585_v29  ;;  %v5668_v45 = vsub.f32 %v5588_v14, %v5667_v25 }
 0xad9   :  { %8932 = vmatprep.mubr.f32.mxu1 %v5657_v44  ;;  %v5658_v35 = vsub.f32 %v5585_v29, %v5657_v44  ;;  %v5669_v48 = vand.u32 4294901760, %v5668_v45 }
 0xada   :  { %8933 = vmatmul.mubr.f32.vlgmr.msra.gmra.mxu1 %v5667_v25 }
 0xadb   :  { %8943 = vmatpush3.msra.mxu1 %v10241_v33  ;;  %v5659_v50 = vand.u32 4294901760, %v5658_v35  ;;  %v5670_v51 = vsub.f32 %v5668_v45, %v5669_v48 }
 0xadc   :  { %8944 = vmatprep.subr.mxu1 %v10246_v46 }
 0xadd   :  { %8945 = vmatpush3.msra.mxu1 %v10246_v46  ;;  %8946 = vmatprep.mubr.f32.mxu1 %v5659_v50  ;;  %v5660_v52 = vsub.f32 %v5658_v35, %v5659_v50  ;;  %v5671_v55 = vand.u32 4294901760, %v5670_v51 }
 0xade   :  { %8956 = vmatprep.subr.mxu1 %v10241_v33  ;;  %8947 = vmatmul.mubr.f32.vlgmr.msra.gmra.mxu1 %v5669_v48 }
 0xadf   :  { %8957 = vmatpush3.msra.mxu1 %v10241_v33  ;;  %8960 = vmatprep.mubr.f32.mxu1 %v5657_v44  ;;  %v5661_v53 = vand.u32 4294901760, %v5660_v52  ;;  %v6095_v33 = vld [vmem:[#allocation8 + $0xf8] sm:$0xff]  ;;  %v7848_v52 = vld [vmem:[#allocation9 + $0x7] ss:$0 sm:$0xff] }
 0xae0   :  { %8958 = vmatprep.subr.mxu1 %v10246_v46 }
 0xae1   :  { %8959 = vmatpush3.msra.mxu1 %v10246_v46  ;;  %8925 = vmatprep.mubr.f32.mxu0 %v5661_v53  ;;  %v10287_v46 = vand.u32 4294901760, %v6095_v33 }
 0xae2   :  { %8926 = vmatmul.mubr.f32.vlgmr.msra.gmra.mxu0 %v5671_v55  ;;  %8961 = vmatmul.mubr.f32.vlgmr.msra.gmra.mxu1 %v5667_v25 }
 0xae3   :  { %8936 = vmatpush3.msra.mxu0 %v10244_v36  ;;  %8939 = vmatprep.mubr.f32.mxu0 %v5658_v35  ;;  %v6094_v36 = vld [vmem:[#allocation8 + $0xf0] sm:$0xff]  ;;  %v10290_v56 = vsub.f32 %v6095_v33, %v10287_v46 }
 0xae4   :  { %8937 = vmatprep.subr.mxu0 %v10251_v42  ;;  %v10292_v58 = vand.u32 4294901760, %v6094_v36 }
 0xae5   :  { %8938 = vmatpush3.msra.mxu0 %v10251_v42  ;;  %v6093_v42 = vld [vmem:[#allocation8 + $0xe8] sm:$0xff] }
 0xae6   :  { %8949 = vmatprep.subr.mxu0 %v10254_v47  ;;  %8940 = vmatmul.mubr.f32.vlgmr.msra.gmra.mxu0 %v5668_v45  ;;  %v10302_v59 = vand.u32 4294901760, %v6093_v42 }
 0xae7   :  { %8950 = vmatpush3.msra.mxu0 %v10254_v47  ;;  %8953 = vmatprep.mubr.f32.mxu0 %v5657_v44  ;;  %v10297_v47 = vand.u32 4294901760, %v10290_v56 }
 0xae8   :  { %8951 = vmatprep.subr.mxu0 %v10261_v49  ;;  %v10312_v63 = vsub.f32 %v6093_v42, %v10302_v59 }
 0xae9   :  { %8952 = vmatpush3.msra.mxu0 %v10261_v49  ;;  %v10300_v49 = vsub.f32 %v6094_v36, %v10292_v58  ;;  %v6224_v61 = vsub.f32 %v10290_v56, %v10297_v47 }
 0xaea   :  { %8954 = vmatmul.mubr.f32.vlgmr.msra.gmra.mxu0 %v5667_v25  ;;  %8963 = vmatprep.subr.mxu0 %v10287_v46  ;;  %v10321_v3 = vand.u32 4294901760, %v10312_v63 }
 0xaeb   :  { %8964 = vmatpush3.msra.mxu0 %v10287_v46  ;;  %v10309_v62 = vand.u32 4294901760, %v10300_v49  ;;  %v6225_v0 = vand.u32 4294901760, %v6224_v61 }
 0xaec   :  { %8965 = vmatprep.subr.mxu0 %v10292_v58  ;;  %v6238_v7 = vsub.f32 %v10312_v63, %v10321_v3 }
 0xaed   :  { %8966 = vmatpush3.msra.mxu0 %v10292_v58  ;;  %v6231_v2 = vsub.f32 %v10300_v49, %v10309_v62  ;;  %8974 = vmatprep.subr.mxu1 %v6225_v0 }
 0xaee   :  { %8967 = vmatprep.subr.mxu0 %v10302_v59  ;;  %8975 = vmatpush3.msra.mxu1 %v6225_v0  ;;  %v6239_v9 = vand.u32 4294901760, %v6238_v7 }
 0xaef   :  { %8968 = vmatpush3.msra.mxu0 %v10302_v59  ;;  %v6232_v6 = vand.u32 4294901760, %v6231_v2 }
 0xaf0   :  { %8969 = vmatprep.subr.mxu0 %v10314_v1 }
 0xaf1   :  { %8970 = vmatpush3.msra.mxu0 %v10314_v1  ;;  %8976 = vmatprep.subr.mxu1 %v6232_v6 }
 0xaf2   :  { %8985 = vmatprep.subr.mxu0 %v10290_v56  ;;  %8977 = vmatpush3.msra.mxu1 %v6232_v6 }
 0xaf3   :  { %8978 = vmatprep.subr.mxu1 %v6239_v9 }
 0xaf4   :  { %8979 = vmatpush3.msra.mxu1 %v6239_v9 }
 0xaf5   :  { %8980 = vmatprep.subr.mxu1 %v6246_v37 }
 0xaf6   :  { %8981 = vmatpush3.msra.mxu1 %v6246_v37 }
 0xaf7   :  { %8996 = vmatprep.subr.mxu1 %v10287_v46 }
 0xb9a   :  { %v8934_v38 = vpop.f32.mrf.mxu1 }
 0xb9c   :  { %v5754_v15 = vpop.f32.mrf.mxu1 }
 0xb9e   :  { %v8948_v17 = vpop.f32.mrf.mxu1 }
 0xba0   :  { %v5918_v21 = vpop.f32.mrf.mxu1 }
 0xba2   :  { %v8927_v28 = vpop.f32.mrf.mxu0  ;;  %v8962_v31 = vpop.f32.mrf.mxu1 }
 0xba3   :  { %v5761_v39 = vadd.f32 %v8934_v38, %v8927_v28 }
 0xba4   :  { %v5663_v32 = vpop.f32.mrf.mxu0  ;;  %v6082_v19 = vpop.f32.mrf.mxu1 }
 0xba5   :  { %v5755_v20 = vadd.f32 %v5754_v15, %v5663_v32 }
 0xba6   :  { %v8941_v26 = vpop.f32.mrf.mxu0 }
 0xba7   :  { %v5844_v34 = vadd.f32 %v8941_v26, %v5761_v39 }
 0xba8   :  { %v5836_v30 = vpop.f32.mrf.mxu0 }
 0xba9   :  { %v5837_v40 = vadd.f32 %v5836_v30, %v5755_v20  ;;  %v5927_v18 = vadd.f32 %v8948_v17, %v5844_v34  ;;  %v96_v34 = vld [vmem:[#allocation8 + $0x118] sm:$0xff]  ;;  %v95_v30 = vld [vmem:[#allocation8 + $0x110] sm:$0xff] }
 0xbaa   :  { %v8955_v10 = vpop.f32.mrf.mxu0 }
 0xbab   :  { %v6010_v16 = vadd.f32 %v8955_v10, %v5927_v18  ;;  %v5919_v22 = vadd.f32 %v5918_v21, %v5837_v40  ;;  %v94_v40 = vld [vmem:[#allocation8 + $0x108] sm:$0xff]  ;;  %v10391_v18 = vand.u32 4294901760, %v96_v34 }
 0xbac   :  { %v6003_v5 = vpop.f32.mrf.mxu0  ;;  %v10395_v10 = vand.u32 4294901760, %v94_v40 }
 0xbad   :  { %v6089_v43 = vadd.f32 %v8962_v31, %v6010_v16  ;;  %v6004_v11 = vadd.f32 %v6003_v5, %v5919_v22  ;;  %v10393_v31 = vand.u32 4294901760, %v95_v30  ;;  %v93_v16 = vld [vmem:[#allocation8 + $0x100] sm:$0xff]  ;;  %v10400_v5 = vsub.f32 %v96_v34, %v10391_v18  ;;  %v104_v34 = vld [vmem:[#allocation8 + $0x158] sm:$0xff] }
 0xbae   :  { %v10397_v22 = vand.u32 4294901760, %v93_v16 }
 0xbaf   :  { %v6105_v27 = vsel %vm113_vm0, %v6089_v43, 0  ;;  %v6083_v12 = vadd.f32 %v6082_v19, %v6004_v11  ;;  %v10403_v43 = vsub.f32 %v95_v30, %v10393_v31  ;;  %v10406_v11 = vsub.f32 %v94_v40, %v10395_v10  ;;  %v103_v40 = vld [vmem:[#allocation8 + $0x150] sm:$0xff] }
 0xbb0   :  { %v6186_v23 = vand.u32 4294901760, %v6105_v27  ;;  %v10410_v19 = vsub.f32 %v93_v16, %v10397_v22  ;;  %v10475_v30 = vand.u32 4294901760, %v104_v34 }
 0xbb1   :  { %v6102_v41 = vsel %vm113_vm0, %v6083_v12, 0  ;;  %v10417_v12 = vand.u32 4294901760, %v10403_v43 }
 0xbb2   :  { %v6187_v24 = vsub.f32 %v6105_v27, %v6186_v23  ;;  %v6176_v14 = vand.u32 4294901760, %v6102_v41  ;;  %v10414_v27 = vand.u32 4294901760, %v10400_v5 }
 0xbb4   :  { %v6177_v25 = vsub.f32 %v6102_v41, %v6176_v14  ;;  %8982 = vmatprep.mubr.f32.mxu1 %v6176_v14  ;;  %v6188_v29 = vand.u32 4294901760, %v6187_v24  ;;  %v10424_v41 = vand.u32 4294901760, %v10410_v19 }
 0xbb5   :  { %8983 = vmatmul.mubr.f32.vlgmr.msra.gmra.mxu1 %v6186_v23 }
 0xbb6   :  { %8997 = vmatpush3.msra.mxu1 %v10287_v46  ;;  %v6178_v44 = vand.u32 4294901760, %v6177_v25  ;;  %v6189_v35 = vsub.f32 %v6187_v24, %v6188_v29 }
 0xbb7   :  { %8998 = vmatprep.subr.mxu1 %v10292_v58 }
 0xbb8   :  { %8999 = vmatpush3.msra.mxu1 %v10292_v58  ;;  %9004 = vmatprep.mubr.f32.mxu1 %v6178_v44  ;;  %v6179_v45 = vsub.f32 %v6177_v25, %v6178_v44  ;;  %v6190_v50 = vand.u32 4294901760, %v6189_v35 }
 0xbb9   :  { %9000 = vmatprep.subr.mxu1 %v10302_v59 }
 0xbba   :  { %9001 = vmatpush3.msra.mxu1 %v10302_v59  ;;  %v6180_v48 = vand.u32 4294901760, %v6179_v45  ;;  %v6833_v45 = vsub.f32 %v10410_v19, %v10424_v41 }
 0xbbb   :  { %9002 = vmatprep.subr.mxu1 %v10314_v1 }
 0xbbc   :  { %9003 = vmatpush3.msra.mxu1 %v10314_v1  ;;  %8971 = vmatprep.mubr.f32.mxu0 %v6180_v48  ;;  %v6834_v48 = vand.u32 4294901760, %v6833_v45 }
 0xbbd   :  { %9005 = vmatmul.mubr.f32.vlgmr.msra.gmra.mxu1 %v6188_v29  ;;  %9018 = vmatprep.subr.mxu1 %v10287_v46 }
 0xbbe   :  { %8972 = vmatmul.mubr.f32.vlgmr.msra.gmra.mxu0 %v6190_v50  ;;  %9019 = vmatpush3.msra.mxu1 %v10287_v46 }
 0xbbf   :  { %8986 = vmatpush3.msra.mxu0 %v10290_v56  ;;  %9026 = vmatprep.mubr.f32.mxu1 %v6176_v14 }
 0xbc0   :  { %8987 = vmatprep.subr.mxu0 %v10300_v49  ;;  %8993 = vmatprep.mubr.f32.mxu0 %v6177_v25 }
 0xbc1   :  { %9020 = vmatprep.subr.mxu1 %v10292_v58  ;;  %8988 = vmatpush3.msra.mxu0 %v10300_v49 }
 0xbc2   :  { %9021 = vmatpush3.msra.mxu1 %v10292_v58  ;;  %8989 = vmatprep.subr.mxu0 %v10312_v63 }
 0xbc3   :  { %9022 = vmatprep.subr.mxu1 %v10302_v59  ;;  %8990 = vmatpush3.msra.mxu0 %v10312_v63 }
 0xbc4   :  { %9023 = vmatpush3.msra.mxu1 %v10302_v59  ;;  %8991 = vmatprep.subr.mxu0 %v10324_v4 }
 0xbc5   :  { %9024 = vmatprep.subr.mxu1 %v10314_v1  ;;  %8992 = vmatpush3.msra.mxu0 %v10324_v4 }
 0xbc6   :  { %9025 = vmatpush3.msra.mxu1 %v10314_v1  ;;  %8994 = vmatmul.mubr.f32.vlgmr.msra.gmra.mxu0 %v6187_v24  ;;  %v6812_v24 = vsub.f32 %v10400_v5, %v10414_v27 }
 0xbc7   :  { %9007 = vmatprep.subr.mxu0 %v10297_v47  ;;  %9027 = vmatmul.mubr.f32.vlgmr.msra.gmra.mxu1 %v6186_v23 }
 0xbc8   :  { %9008 = vmatpush3.msra.mxu0 %v10297_v47  ;;  %9015 = vmatprep.mubr.f32.mxu0 %v6176_v14  ;;  %v6819_v14 = vsub.f32 %v10403_v43, %v10417_v12  ;;  %v6813_v29 = vand.u32 4294901760, %v6812_v24 }
 0xbc9   :  { %9009 = vmatprep.subr.mxu0 %v10309_v62 }
 0xbca   :  { %9010 = vmatpush3.msra.mxu0 %v10309_v62  ;;  %v6820_v44 = vand.u32 4294901760, %v6819_v14  ;;  %9040 = vmatprep.subr.mxu1 %v6813_v29 }
 0xbcb   :  { %9011 = vmatprep.subr.mxu0 %v10321_v3  ;;  %9041 = vmatpush3.msra.mxu1 %v6813_v29 }
 0xbcc   :  { %9012 = vmatpush3.msra.mxu0 %v10321_v3  ;;  %9042 = vmatprep.subr.mxu1 %v6820_v44 }
 0xbcd   :  { %9013 = vmatprep.subr.mxu0 %v10331_v8  ;;  %9043 = vmatpush3.msra.mxu1 %v6820_v44  ;;  %v99_v44 = vld [vmem:[#allocation8 + $0x130] sm:$0xff] }
 0xbce   :  { %9014 = vmatpush3.msra.mxu0 %v10331_v8 }
 0xbcf   :  { %9016 = vmatmul.mubr.f32.vlgmr.msra.gmra.mxu0 %v6186_v23  ;;  %9029 = vmatprep.subr.mxu0 %v10391_v18  ;;  %v10420_v23 = vand.u32 4294901760, %v10406_v11 }
 0xbd0   :  { %9030 = vmatpush3.msra.mxu0 %v10391_v18 }
 0xbd1   :  { %9031 = vmatprep.subr.mxu0 %v10393_v31  ;;  %v6826_v25 = vsub.f32 %v10406_v11, %v10420_v23 }
 0xbd2   :  { %9032 = vmatpush3.msra.mxu0 %v10393_v31 }
 0xbd3   :  { %9033 = vmatprep.subr.mxu0 %v10395_v10  ;;  %v6827_v35 = vand.u32 4294901760, %v6826_v25 }
 0xbd4   :  { %9034 = vmatpush3.msra.mxu0 %v10395_v10 }
 0xbd5   :  { %9035 = vmatprep.subr.mxu0 %v10397_v22  ;;  %9044 = vmatprep.subr.mxu1 %v6827_v35 }
 0xbd6   :  { %9036 = vmatpush3.msra.mxu0 %v10397_v22  ;;  %9045 = vmatpush3.msra.mxu1 %v6827_v35 }
 0xbd7   :  { %9051 = vmatprep.subr.mxu0 %v10400_v5  ;;  %9046 = vmatprep.subr.mxu1 %v6834_v48 }
 0xbd8   :  { %9047 = vmatpush3.msra.mxu1 %v6834_v48 }
 0xbd9   :  { %9062 = vmatprep.subr.mxu1 %v10391_v18 }
 0xc75   :  { %v8984_v53 = vpop.f32.mrf.mxu1 }
 0xc77   :  { %v6283_v56 = vpop.f32.mrf.mxu1 }
 0xc7d   :  { %v9006_v42 = vpop.f32.mrf.mxu1 }
 0xc7e   :  { %v8973_v51 = vpop.f32.mrf.mxu0 }
 0xc7f   :  { %v6193_v33 = vadd.f32 %v8973_v51, %v7848_v52  ;;  %v6453_v61 = vpop.f32.mrf.mxu1 }
 0xc80   :  { %v6182_v55 = vpop.f32.mrf.mxu0 }
 0xc81   :  { %v6183_v46 = vadd.f32 %v7848_v52, %v6182_v55  ;;  %v6290_v58 = vadd.f32 %v8984_v53, %v6193_v33 }
 0xc83   :  { %v6284_v59 = vadd.f32 %v6283_v56, %v6183_v46 }
 0xc86   :  { %v8995_v36 = vpop.f32.mrf.mxu0 }
 0xc87   :  { %v6377_v49 = vadd.f32 %v8995_v36, %v6290_v58  ;;  %v9028_v63 = vpop.f32.mrf.mxu1 }
 0xc88   :  { %v6369_v47 = vpop.f32.mrf.mxu0 }
 0xc89   :  { %v6370_v60 = vadd.f32 %v6369_v47, %v6284_v59  ;;  %v6462_v62 = vadd.f32 %v9006_v42, %v6377_v49  ;;  %v6625_v7 = vpop.f32.mrf.mxu1 }
 0xc8b   :  { %v6454_v2 = vadd.f32 %v6453_v61, %v6370_v60 }
 0xc8f   :  { %v9017_v1 = vpop.f32.mrf.mxu0 }
 0xc90   :  { %v6551_v0 = vadd.f32 %v9017_v1, %v6462_v62  ;;  %v6659_v62 = vstv %s7849_s19 }
 0xc91   :  { %v6544_v3 = vpop.f32.mrf.mxu0 }
 0xc92   :  { %v6632_v4 = vadd.f32 %v9028_v63, %v6551_v0  ;;  %v6545_v6 = vadd.f32 %v6544_v3, %v6454_v2  ;;  %v6682_v0 = vstv %s7850_s20 }
 0xc94   :  { %v10370_v8 = vadd.f32 %v6632_v4, %v9942_v54  ;;  %v6626_v9 = vadd.f32 %v6625_v7, %v6545_v6 }
 0xc96   :  { %v10373_v13 = vadd.f32 %v6626_v9, %v9944_v57  ;;  %v6642_v37 = vsel %vm113_vm0, %v10370_v8, 0.0 }
 0xc97   :  { %6643 = vadd.xlane.f32.xlu1 %v6642_v37 }
 0xc98   :  { %v6639_v38 = vsel %vm113_vm0, %v10373_v13, 0.0 }
 0xc99   :  { %6640 = vadd.xlane.f32.xlu0 %v6639_v38 }
 0xd20   :  { %v6644_v15 = vpop.xlane.xlu1 %6643 }
 0xd21   :  { %v6646_v17 = vmul.f32 0.03125, %v6644_v15 }
 0xd22   :  { %v6641_v28 = vpop.xlane.xlu0 %6640 }
 0xd23   :  { %v10380_v32 = vsub.f32 %v10370_v8, %v6646_v17  ;;  %v6645_v54 = vmul.f32 0.03125, %v6641_v28 }
 0xd25   :  { %v10383_v39 = vsub.f32 %v10373_v13, %v6645_v54  ;;  %v6650_v57 = vmul.f32 %v10380_v32, %v10380_v32  ;;  %v6661_v63 = vmul.f32 %v6659_v62, %v10380_v32 }
 0xd27   :  { %v6654_v21 = vsel %vm113_vm0, %v6650_v57, 0.0  ;;  %v6649_v26 = vmul.f32 %v10383_v39, %v10383_v39  ;;  %v6660_v3 = vmul.f32 %v6659_v62, %v10383_v39 }
 0xd28   :  { %6655 = vadd.xlane.f32.xlu1 %v6654_v21 }
 0xd29   :  { %v6651_v20 = vsel %vm113_vm0, %v6649_v26, 0.0 }
 0xd2a   :  { %6652 = vadd.xlane.f32.xlu0 %v6651_v20 }
 0xdb1   :  { %v6656_v50 = vpop.xlane.xlu1 %6655 }
 0xdb2   :  { %v6658_v51 = vmul.f32 0.032258064, %v6656_v50  ;;  %v10523_v50 = vand.u32 4294901760, %v99_v44 }
 0xdb3   :  { %v6653_v52 = vpop.xlane.xlu0 %6652 }
 0xdb4   :  { %9249 = vrsqrt.f32 %v6658_v51  ;;  %v6657_v53 = vmul.f32 0.032258064, %v6653_v52  ;;  %vm6671_vm10 = vcmp.eq.f32.partialorder %v6658_v51, inf  ;;  %v6674_v46 = vand.u32 2147483648, %v6658_v51  ;;  %v98_v52 = vld [vmem:[#allocation8 + $0x128] sm:$0xff] }
 0xdb5   :  { %vm6673_vm11 = vcmp.eq.f32.partialorder %v6658_v51, 0.0 }
 0xdb6   :  { %9251 = vrsqrt.f32 %v6657_v53  ;;  %vm6664_vm12 = vcmp.eq.f32.partialorder %v6657_v53, inf  ;;  %v6667_v49 = vand.u32 2147483648, %v6657_v53  ;;  %vm6666_vm13 = vcmp.eq.f32.partialorder %v6657_v53, 0.0 }
 0xdc1   :  { %v9250_v55 = vpop.eup %9249 }
 0xdc2   :  { %v6670_v33 = vmul.f32 %v9250_v55, %v6658_v51 }
 0xdc3   :  { %v9252_v36 = vpop.eup %9251 }
 0xdc4   :  { %v6672_v56 = vsel %vm6671_vm10, %v6658_v51, %v6670_v33  ;;  %v6663_v42 = vmul.f32 %v9252_v36, %v6657_v53  ;;  %v10532_v33 = vsub.f32 %v99_v44, %v10523_v50 }
 0xdc5   :  { %v6675_v58 = vsel %vm6673_vm11, %v6674_v46, %v6672_v56  ;;  %v10534_v46 = vand.u32 4294901760, %v98_v52  ;;  %v97_v56 = vld [vmem:[#allocation8 + $0x120] sm:$0xff] }
 0xdc6   :  { %v6677_v47 = vadd.f32 1e-06, %v6675_v58  ;;  %v6665_v59 = vsel %vm6664_vm12, %v6657_v53, %v6663_v42  ;;  %v10542_v42 = vand.u32 4294901760, %v10532_v33 }
 0xdc7   :  { %v6668_v60 = vsel %vm6666_vm13, %v6667_v49, %v6665_v59  ;;  %v10547_v49 = vand.u32 4294901760, %v97_v56 }
 0xdc8   :  { %9253 = vrcp.f32 %v6677_v47  ;;  %v6676_v61 = vadd.f32 1e-06, %v6668_v60  ;;  %v10545_v47 = vsub.f32 %v98_v52, %v10534_v46  ;;  %v7382_v60 = vsub.f32 %v10532_v33, %v10542_v42 }
 0xdc9   :  { %v10559_v62 = vsub.f32 %v97_v56, %v10547_v49 }
 0xdca   :  { %9255 = vrcp.f32 %v6676_v61  ;;  %v10556_v61 = vand.u32 4294901760, %v10545_v47 }
 0xdd5   :  { %v9254_v1 = vpop.eup %9253 }
 0xdd6   :  { %v6681_v2 = vmul.f32 %v9254_v1, %v6661_v63  ;;  %v7383_v1 = vand.u32 4294901760, %v7382_v60 }
 0xdd7   :  { %v9256_v4 = vpop.eup %9255 }
 0xdd8   :  { %v6684_v6 = vadd.f32 %v6682_v0, %v6681_v2  ;;  %v6679_v7 = vmul.f32 %v9256_v4, %v6660_v3  ;;  %v10566_v2 = vand.u32 4294901760, %v10559_v62 }
 0xdda   :  { %v6693_v9 = vsel %vm113_vm0, %v6684_v6, 0  ;;  %v6683_v37 = vadd.f32 %v6682_v0, %v6679_v7  ;;  %v7389_v0 = vsub.f32 %v10545_v47, %v10556_v61  ;;  %v7396_v4 = vsub.f32 %v10559_v62, %v10566_v2 }
 0xddb   :  { %v6774_v38 = vand.u32 4294901760, %v6693_v9 }
 0xddc   :  { %v6690_v15 = vsel %vm113_vm0, %v6683_v37, 0  ;;  %v7390_v3 = vand.u32 4294901760, %v7389_v0  ;;  %v7397_v6 = vand.u32 4294901760, %v7396_v4 }
 0xddd   :  { %v6775_v17 = vsub.f32 %v6693_v9, %v6774_v38  ;;  %v6764_v28 = vand.u32 4294901760, %v6690_v15  ;;  %v7851_v9 = vld [vmem:[#allocation9 + $0x8] ss:$0 sm:$0xff] }
 0xddf   :  { %9048 = vmatprep.mubr.f32.mxu1 %v6764_v28  ;;  %v6765_v54 = vsub.f32 %v6690_v15, %v6764_v28  ;;  %v6776_v57 = vand.u32 4294901760, %v6775_v17 }
 0xde0   :  { %9049 = vmatmul.mubr.f32.vlgmr.msra.gmra.mxu1 %v6774_v38 }
 0xde1   :  { %9063 = vmatpush3.msra.mxu1 %v10391_v18  ;;  %v6766_v32 = vand.u32 4294901760, %v6765_v54  ;;  %v6777_v21 = vsub.f32 %v6775_v17, %v6776_v57 }
 0xde2   :  { %9064 = vmatprep.subr.mxu1 %v10393_v31 }
 0xde3   :  { %9065 = vmatpush3.msra.mxu1 %v10393_v31  ;;  %9070 = vmatprep.mubr.f32.mxu1 %v6766_v32  ;;  %v6767_v39 = vsub.f32 %v6765_v54, %v6766_v32  ;;  %v6778_v20 = vand.u32 4294901760, %v6777_v21 }
 0xde4   :  { %9066 = vmatprep.subr.mxu1 %v10395_v10 }
 0xde5   :  { %9067 = vmatpush3.msra.mxu1 %v10395_v10  ;;  %v6768_v26 = vand.u32 4294901760, %v6767_v39 }
 0xde6   :  { %9068 = vmatprep.subr.mxu1 %v10397_v22 }
 0xde7   :  { %9069 = vmatpush3.msra.mxu1 %v10397_v22  ;;  %9037 = vmatprep.mubr.f32.mxu0 %v6768_v26 }
 0xde8   :  { %9071 = vmatmul.mubr.f32.vlgmr.msra.gmra.mxu1 %v6776_v57  ;;  %9084 = vmatprep.subr.mxu1 %v10391_v18 }
 0xde9   :  { %9038 = vmatmul.mubr.f32.vlgmr.msra.gmra.mxu0 %v6778_v20  ;;  %9085 = vmatpush3.msra.mxu1 %v10391_v18  ;;  %v10478_v18 = vsub.f32 %v104_v34, %v10475_v30 }
 0xdea   :  { %9052 = vmatpush3.msra.mxu0 %v10400_v5  ;;  %9092 = vmatprep.mubr.f32.mxu1 %v6764_v28 }
 0xdeb   :  { %9053 = vmatprep.subr.mxu0 %v10403_v43  ;;  %9059 = vmatprep.mubr.f32.mxu0 %v6765_v54  ;;  %v10485_v16 = vand.u32 4294901760, %v10478_v18 }
 0xdec   :  { %9086 = vmatprep.subr.mxu1 %v10393_v31  ;;  %9054 = vmatpush3.msra.mxu0 %v10403_v43  ;;  %v101_v43 = vld [vmem:[#allocation8 + $0x140] sm:$0xff] }
 0xded   :  { %9087 = vmatpush3.msra.mxu1 %v10393_v31  ;;  %9055 = vmatprep.subr.mxu0 %v10406_v11  ;;  %v10480_v31 = vand.u32 4294901760, %v103_v40 }
 0xdee   :  { %9088 = vmatprep.subr.mxu1 %v10395_v10  ;;  %9056 = vmatpush3.msra.mxu0 %v10406_v11  ;;  %v7347_v11 = vsub.f32 %v10478_v18, %v10485_v16 }
 0xdef   :  { %9089 = vmatpush3.msra.mxu1 %v10395_v10  ;;  %9057 = vmatprep.subr.mxu0 %v10410_v19  ;;  %v102_v10 = vld [vmem:[#allocation8 + $0x148] sm:$0xff] }
 0xdf0   :  { %9090 = vmatprep.subr.mxu1 %v10397_v22  ;;  %9058 = vmatpush3.msra.mxu0 %v10410_v19  ;;  %v10490_v5 = vand.u32 4294901760, %v102_v10 }
 0xdf1   :  { %9091 = vmatpush3.msra.mxu1 %v10397_v22  ;;  %9060 = vmatmul.mubr.f32.vlgmr.msra.gmra.mxu0 %v6775_v17  ;;  %v10488_v22 = vsub.f32 %v103_v40, %v10480_v31 }
 0xdf2   :  { %9073 = vmatprep.subr.mxu0 %v10414_v27  ;;  %9093 = vmatmul.mubr.f32.vlgmr.msra.gmra.mxu1 %v6774_v38 }
 0xdf3   :  { %9074 = vmatpush3.msra.mxu0 %v10414_v27  ;;  %9081 = vmatprep.mubr.f32.mxu0 %v6764_v28  ;;  %v10497_v19 = vand.u32 4294901760, %v10488_v22  ;;  %v10500_v27 = vsub.f32 %v102_v10, %v10490_v5 }
 0xdf4   :  { %9075 = vmatprep.subr.mxu0 %v10417_v12 }
 0xdf5   :  { %9076 = vmatpush3.msra.mxu0 %v10417_v12  ;;  %v10502_v12 = vand.u32 4294901760, %v101_v43  ;;  %v7354_v24 = vsub.f32 %v10488_v22, %v10497_v19  ;;  %v10509_v14 = vand.u32 4294901760, %v10500_v27 }
 0xdf6   :  { %9077 = vmatprep.subr.mxu0 %v10420_v23 }
 0xdf7   :  { %9078 = vmatpush3.msra.mxu0 %v10420_v23  ;;  %v100_v23 = vld [vmem:[#allocation8 + $0x138] sm:$0xff]  ;;  %v10512_v25 = vsub.f32 %v101_v43, %v10502_v12  ;;  %v7355_v45 = vand.u32 4294901760, %v7354_v24  ;;  %v7361_v35 = vsub.f32 %v10500_v27, %v10509_v14 }
 0xdf8   :  { %9079 = vmatprep.subr.mxu0 %v10424_v41  ;;  %v10515_v29 = vand.u32 4294901760, %v100_v23 }
 0xdf9   :  { %9080 = vmatpush3.msra.mxu0 %v10424_v41  ;;  %v7348_v41 = vand.u32 4294901760, %v7347_v11  ;;  %v10521_v48 = vand.u32 4294901760, %v10512_v25  ;;  %v7362_v53 = vand.u32 4294901760, %v7361_v35 }
 0xdfa   :  { %9082 = vmatmul.mubr.f32.vlgmr.msra.gmra.mxu0 %v6774_v38  ;;  %9095 = vmatprep.subr.mxu0 %v10475_v30  ;;  %v10526_v51 = vsub.f32 %v100_v23, %v10515_v29 }
 0xdfb   :  { %9096 = vmatpush3.msra.mxu0 %v10475_v30  ;;  %9114 = vmatprep.subr.mxu1 %v7348_v41  ;;  %v7368_v55 = vsub.f32 %v10512_v25, %v10521_v48 }
 0xdfc   :  { %9097 = vmatprep.subr.mxu0 %v10480_v31  ;;  %9115 = vmatpush3.msra.mxu1 %v7348_v41  ;;  %v10538_v36 = vand.u32 4294901760, %v10526_v51 }
 0xdfd   :  { %9098 = vmatpush3.msra.mxu0 %v10480_v31  ;;  %9116 = vmatprep.subr.mxu1 %v7355_v45  ;;  %v7369_v58 = vand.u32 4294901760, %v7368_v55 }
 0xdfe   :  { %9099 = vmatprep.subr.mxu0 %v10490_v5  ;;  %9117 = vmatpush3.msra.mxu1 %v7355_v45  ;;  %v7375_v59 = vsub.f32 %v10526_v51, %v10538_v36 }
 0xdff   :  { %9100 = vmatpush3.msra.mxu0 %v10490_v5  ;;  %9118 = vmatprep.subr.mxu1 %v7362_v53 }
 0xe00   :  { %9101 = vmatprep.subr.mxu0 %v10502_v12  ;;  %9119 = vmatpush3.msra.mxu1 %v7362_v53  ;;  %v7376_v63 = vand.u32 4294901760, %v7375_v59 }
 0xe01   :  { %9102 = vmatpush3.msra.mxu0 %v10502_v12  ;;  %9120 = vmatprep.subr.mxu1 %v7369_v58 }
 0xe02   :  { %9103 = vmatprep.subr.mxu0 %v10515_v29  ;;  %9121 = vmatpush3.msra.mxu1 %v7369_v58 }
 0xe03   :  { %9104 = vmatpush3.msra.mxu0 %v10515_v29  ;;  %9122 = vmatprep.subr.mxu1 %v7376_v63 }
 0xe04   :  { %9105 = vmatprep.subr.mxu0 %v10523_v50  ;;  %9123 = vmatpush3.msra.mxu1 %v7376_v63 }
 0xe05   :  { %9106 = vmatpush3.msra.mxu0 %v10523_v50  ;;  %9124 = vmatprep.subr.mxu1 %v7383_v1 }
 0xe06   :  { %9107 = vmatprep.subr.mxu0 %v10534_v46  ;;  %9125 = vmatpush3.msra.mxu1 %v7383_v1 }
 0xe07   :  { %9108 = vmatpush3.msra.mxu0 %v10534_v46  ;;  %9126 = vmatprep.subr.mxu1 %v7390_v3 }
 0xe08   :  { %9109 = vmatprep.subr.mxu0 %v10547_v49  ;;  %9127 = vmatpush3.msra.mxu1 %v7390_v3 }
 0xe09   :  { %9110 = vmatpush3.msra.mxu0 %v10547_v49  ;;  %9128 = vmatprep.subr.mxu1 %v7397_v6 }
 0xe0a   :  { %9133 = vmatprep.subr.mxu0 %v10478_v18  ;;  %9129 = vmatpush3.msra.mxu1 %v7397_v6 }
 0xe0b   :  { %9152 = vmatprep.subr.mxu1 %v10475_v30 }
 0xea0   :  { %v9050_v37 = vpop.f32.mrf.mxu1 }
 0xea2   :  { %v6871_v54 = vpop.f32.mrf.mxu1 }
 0xea8   :  { %v9072_v32 = vpop.f32.mrf.mxu1 }
 0xea9   :  { %v9039_v7 = vpop.f32.mrf.mxu0 }
 0xeaa   :  { %v6781_v15 = vadd.f32 %v9039_v7, %v7851_v9  ;;  %v7041_v34 = vpop.f32.mrf.mxu1 }
 0xeab   :  { %v6770_v38 = vpop.f32.mrf.mxu0 }
 0xeac   :  { %v6771_v17 = vadd.f32 %v7851_v9, %v6770_v38  ;;  %v6878_v57 = vadd.f32 %v9050_v37, %v6781_v15 }
 0xeae   :  { %v6872_v26 = vadd.f32 %v6871_v54, %v6771_v17 }
 0xeb1   :  { %v9061_v28 = vpop.f32.mrf.mxu0 }
 0xeb2   :  { %v6965_v21 = vadd.f32 %v9061_v28, %v6878_v57  ;;  %v9094_v10 = vpop.f32.mrf.mxu1 }
 0xeb3   :  { %v6957_v39 = vpop.f32.mrf.mxu0 }
 0xeb4   :  { %v6958_v20 = vadd.f32 %v6957_v39, %v6872_v26  ;;  %v7050_v40 = vadd.f32 %v9072_v32, %v6965_v21  ;;  %v7213_v45 = vpop.f32.mrf.mxu1 }
 0xeb6   :  { %v7042_v23 = vadd.f32 %v7041_v34, %v6958_v20 }
 0xeba   :  { %v9083_v43 = vpop.f32.mrf.mxu0 }
 0xebb   :  { %v7139_v11 = vadd.f32 %v9083_v43, %v7050_v40 }
 0xebc   :  { %v7132_v41 = vpop.f32.mrf.mxu0 }
 0xebd   :  { %v7220_v24 = vadd.f32 %v9094_v10, %v7139_v11  ;;  %v7133_v44 = vadd.f32 %v7132_v41, %v7042_v23 }
 0xebf   :  { %v7232_v35 = vsel %vm7227_vm14, %v7220_v24, 0  ;;  %v7214_v52 = vadd.f32 %v7213_v45, %v7133_v44 }
 0xec0   :  { %v10573_v53 = vand.u32 4294901760, %v7232_v35 }
 0xec1   :  { %v7229_v55 = vsel %vm7227_vm14, %v7214_v52, 0 }
 0xec2   :  { %v7318_v56 = vsub.f32 %v7232_v35, %v10573_v53  ;;  %v7307_v58 = vand.u32 4294901760, %v7229_v55 }
 0xec4   :  { %v7308_v59 = vsub.f32 %v7229_v55, %v7307_v58  ;;  %9130 = vmatprep.mubr.f32.mxu1 %v7307_v58  ;;  %v7319_v60 = vand.u32 4294901760, %v7318_v56 }
 0xec5   :  { %9131 = vmatmul.mubr.f32.vlgmr.msra.gmra.mxu1 %v10573_v53 }
 0xec6   :  { %9153 = vmatpush3.msra.mxu1 %v10475_v30  ;;  %v7309_v63 = vand.u32 4294901760, %v7308_v59  ;;  %v7320_v1 = vsub.f32 %v7318_v56, %v7319_v60 }
 0xec7   :  { %9154 = vmatprep.subr.mxu1 %v10480_v31 }
 0xec8   :  { %9155 = vmatpush3.msra.mxu1 %v10480_v31  ;;  %9168 = vmatprep.mubr.f32.mxu1 %v7309_v63  ;;  %v7310_v0 = vsub.f32 %v7308_v59, %v7309_v63  ;;  %v7321_v4 = vand.u32 4294901760, %v7320_v1 }
 0xec9   :  { %9156 = vmatprep.subr.mxu1 %v10490_v5 }
 0xeca   :  { %9157 = vmatpush3.msra.mxu1 %v10490_v5  ;;  %v7311_v3 = vand.u32 4294901760, %v7310_v0 }
 0xecb   :  { %9158 = vmatprep.subr.mxu1 %v10502_v12 }
 0xecc   :  { %9159 = vmatpush3.msra.mxu1 %v10502_v12  ;;  %9111 = vmatprep.mubr.f32.mxu0 %v7311_v3 }
 0xecd   :  { %9160 = vmatprep.subr.mxu1 %v10515_v29  ;;  %9112 = vmatmul.mubr.f32.vlgmr.msra.gmra.mxu0 %v7321_v4 }
 0xece   :  { %9134 = vmatpush3.msra.mxu0 %v10478_v18  ;;  %9161 = vmatpush3.msra.mxu1 %v10515_v29  ;;  %v7852_v18 = vld [vmem:[#allocation9 + $0x9] ss:$0 sm:$0xff] }
 0xecf   :  { %9135 = vmatprep.subr.mxu0 %v10488_v22  ;;  %9149 = vmatprep.mubr.f32.mxu0 %v7308_v59 }
 0xed0   :  { %9162 = vmatprep.subr.mxu1 %v10523_v50  ;;  %9136 = vmatpush3.msra.mxu0 %v10488_v22 }
 0xed1   :  { %9163 = vmatpush3.msra.mxu1 %v10523_v50  ;;  %9137 = vmatprep.subr.mxu0 %v10500_v27 }
 0xed2   :  { %9164 = vmatprep.subr.mxu1 %v10534_v46  ;;  %9138 = vmatpush3.msra.mxu0 %v10500_v27 }
 0xed3   :  { %9165 = vmatpush3.msra.mxu1 %v10534_v46  ;;  %9139 = vmatprep.subr.mxu0 %v10512_v25 }
 0xed4   :  { %9166 = vmatprep.subr.mxu1 %v10547_v49  ;;  %9140 = vmatpush3.msra.mxu0 %v10512_v25 }
 0xed5   :  { %9167 = vmatpush3.msra.mxu1 %v10547_v49  ;;  %9141 = vmatprep.subr.mxu0 %v10526_v51 }
 0xed6   :  { %9169 = vmatmul.mubr.f32.vlgmr.msra.gmra.mxu1 %v7319_v60  ;;  %9190 = vmatprep.subr.mxu1 %v10475_v30 }
 0xed7   :  { %9142 = vmatpush3.msra.mxu0 %v10526_v51  ;;  %9191 = vmatpush3.msra.mxu1 %v10475_v30 }
 0xed8   :  { %9206 = vmatprep.mubr.f32.mxu1 %v7307_v58  ;;  %9143 = vmatprep.subr.mxu0 %v10532_v33 }
 0xed9   :  { %9192 = vmatprep.subr.mxu1 %v10480_v31  ;;  %9144 = vmatpush3.msra.mxu0 %v10532_v33 }
 0xeda   :  { %9193 = vmatpush3.msra.mxu1 %v10480_v31  ;;  %9145 = vmatprep.subr.mxu0 %v10545_v47 }
 0xedb   :  { %9194 = vmatprep.subr.mxu1 %v10490_v5  ;;  %9146 = vmatpush3.msra.mxu0 %v10545_v47 }
 0xedc   :  { %9195 = vmatpush3.msra.mxu1 %v10490_v5  ;;  %9147 = vmatprep.subr.mxu0 %v10559_v62 }
 0xedd   :  { %9196 = vmatprep.subr.mxu1 %v10502_v12  ;;  %9148 = vmatpush3.msra.mxu0 %v10559_v62 }
 0xede   :  { %9197 = vmatpush3.msra.mxu1 %v10502_v12  ;;  %9150 = vmatmul.mubr.f32.vlgmr.msra.gmra.mxu0 %v7318_v56 }
 0xedf   :  { %9171 = vmatprep.subr.mxu0 %v10485_v16  ;;  %9198 = vmatprep.subr.mxu1 %v10515_v29 }
 0xee0   :  { %9172 = vmatpush3.msra.mxu0 %v10485_v16  ;;  %9187 = vmatprep.mubr.f32.mxu0 %v7307_v58 }
 0xee1   :  { %9199 = vmatpush3.msra.mxu1 %v10515_v29  ;;  %9173 = vmatprep.subr.mxu0 %v10497_v19 }
 0xee2   :  { %9200 = vmatprep.subr.mxu1 %v10523_v50  ;;  %9174 = vmatpush3.msra.mxu0 %v10497_v19 }
 0xee3   :  { %9201 = vmatpush3.msra.mxu1 %v10523_v50  ;;  %9175 = vmatprep.subr.mxu0 %v10509_v14 }
 0xee4   :  { %9202 = vmatprep.subr.mxu1 %v10534_v46  ;;  %9176 = vmatpush3.msra.mxu0 %v10509_v14 }
 0xee5   :  { %9203 = vmatpush3.msra.mxu1 %v10534_v46  ;;  %9177 = vmatprep.subr.mxu0 %v10521_v48 }
 0xee6   :  { %9204 = vmatprep.subr.mxu1 %v10547_v49  ;;  %9178 = vmatpush3.msra.mxu0 %v10521_v48 }
 0xee7   :  { %9205 = vmatpush3.msra.mxu1 %v10547_v49  ;;  %9179 = vmatprep.subr.mxu0 %v10538_v36 }
 0xee8   :  { %9207 = vmatmul.mubr.f32.vlgmr.msra.gmra.mxu1 %v10573_v53  ;;  %9180 = vmatpush3.msra.mxu0 %v10538_v36 }
 0xee9   :  { %9181 = vmatprep.subr.mxu0 %v10542_v42 }
 0xeea   :  { %9182 = vmatpush3.msra.mxu0 %v10542_v42 }
 0xeeb   :  { %9183 = vmatprep.subr.mxu0 %v10556_v61 }
 0xeec   :  { %9184 = vmatpush3.msra.mxu0 %v10556_v61 }
 0xeed   :  { %9185 = vmatprep.subr.mxu0 %v10566_v2 }
 0xeee   :  { %9186 = vmatpush3.msra.mxu0 %v10566_v2 }
 0xeef   :  { %9188 = vmatmul.mubr.f32.vlgmr.msra.gmra.mxu0 %v10573_v53 }
 0xf85   :  { %v9132_v31 = vpop.f32.mrf.mxu1 }
 0xf87   :  { %v7434_v27 = vpop.f32.mrf.mxu1 }
 0xf8d   :  { %v9113_v30 = vpop.f32.mrf.mxu0 }
 0xf8e   :  { %v7324_v22 = vadd.f32 %v9113_v30, %v7852_v18 }
 0xf8f   :  { %v7313_v16 = vpop.f32.mrf.mxu0 }
 0xf90   :  { %v7314_v19 = vadd.f32 %v7852_v18, %v7313_v16  ;;  %v7441_v12 = vadd.f32 %v9132_v31, %v7324_v22 }
 0xf92   :  { %v7435_v48 = vadd.f32 %v7434_v27, %v7314_v19 }
 0xf96   :  { %v9170_v14 = vpop.f32.mrf.mxu1 }
 0xf98   :  { %v7616_v51 = vpop.f32.mrf.mxu1 }
 0xf9e   :  { %v9151_v5 = vpop.f32.mrf.mxu0 }
 0xf9f   :  { %v7536_v29 = vadd.f32 %v9151_v5, %v7441_v12 }
 0xfa0   :  { %v7528_v25 = vpop.f32.mrf.mxu0 }
 0xfa1   :  { %v7529_v50 = vadd.f32 %v7528_v25, %v7435_v48  ;;  %v7625_v33 = vadd.f32 %v9170_v14, %v7536_v29 }
 0xfa3   :  { %v7617_v47 = vadd.f32 %v7616_v51, %v7529_v50 }
 0xfa8   :  { %v9208_v46 = vpop.f32.mrf.mxu1 }
 0xfaa   :  { %v7804_v2 = vpop.f32.mrf.mxu1 }
 0xfaf   :  { %v9189_v36 = vpop.f32.mrf.mxu0 }
 0xfb0   :  { %v7726_v42 = vadd.f32 %v9189_v36, %v7625_v33 }
 0xfb1   :  { %v7719_v49 = vpop.f32.mrf.mxu0 }
 0xfb2   :  { %v7811_v61 = vadd.f32 %v9208_v46, %v7726_v42  ;;  %v7720_v62 = vadd.f32 %v7719_v49, %v7617_v47 }
 0xfb4   :  { %v7805_v6 = vadd.f32 %v7804_v2, %v7720_v62  ;;  %v7815_v7 = vadd.f32 %v7811_v61, %v10370_v8 }
 0xfb6   :  { %v7814_v9 = vadd.f32 %v7805_v6, %v10373_v13  ;;  %7817 = vst.msk [vmem:[#allocation12 + $0x8] sm:$0xff] %vm113_vm0, %v7815_v7 }
 0xfb8   :  { %7816 = vst.msk [vmem:[#allocation12] sm:$0xff] %vm113_vm0, %v7814_v9 }
 0xfb9   :  { %9362 = shalt.err (!%p9359_p1)
}
 0xfba   :  { %7829 = dma.vmem_to_hbm [thread:$0]  %s7824_s22, 256, %s10656_s5, [#allocation4], %s9383_s23, %s9383_s23, %s9384_s24  }
 0xfbb   :  { %9379 = dma.done.wait [#allocation4], 256  }
 0xfbc   :  { %9380 = vsyncadd [#allocation4], 4294967040 }
 0xfbd   :  { %7833 = vsyncpa [#allocation3], 1 }
 0xfbe   :  { %7834 = vsyncpa [#allocation7], 1 }
 0xfbf   :  { %7835 = vsyncpa [#allocation10], 1 }
 0xfc0   :  { %7836 = vsyncpa [#allocation4], 1 }
 0xfc1   :  { %7837 = vsyncpa [#allocation5], 1 }

</bundles_post_ra>
